<compile_context>
chip_gen: v5e
topology: v5e:2x2
jax: 0.10.0
libtpu: 0.0.40
codegen_flags: <defaults>
</compile_context>

<pallas_src>
import numpy as np
import jax
import jax.numpy as jnp
from jax.experimental import pallas as pl
from jax.experimental.pallas import tpu as pltpu


TILE_B = 512   # batch rows per grid step (review: 512 reaches ~85% of HBM roofline)


def easyrec_kernel(uemb_ref, nemb_ref, vemb_ref, mask_ref,
                   w1_ref, w2_ref, b_ref, out_ref):
    ue16 = uemb_ref[...]                                      # [TB, D] bf16
    ne16 = nemb_ref[...]                                      # [TB, D] bf16
    # Linear(concat(ue, nemb)) == ue @ W1 + nemb @ W2 + b     (MXU, f32 accumulate)
    lin = (jnp.dot(ue16, w1_ref[...], preferred_element_type=jnp.float32)
           + jnp.dot(ne16, w2_ref[...], preferred_element_type=jnp.float32)
           + b_ref[...])                                      # [TB, D] f32
    # f32 epilogue (v5e has no bf16 VPU): users w/o neighbors keep raw embedding.
    ue = ue16.astype(jnp.float32)
    ve = vemb_ref[...].astype(jnp.float32)
    fused = jnp.where(mask_ref[...] > 0.0, lin, ue)           # [TB, D] (VPU)
    scores = jnp.sum(fused * ve, axis=1)                      # [TB]    (XLU reduce)
    out_ref[...] = scores[None, :]                            # lane-dense (1, TB)


def build_social_tables(social_adj_list, num_users):
    """One-time host preprocessing: flat edge list + per-user degree
    (replaces the padded [U, max_deg] table / per-call python loop)."""
    dst, src = [], []
    deg = np.zeros((num_users,), dtype=np.int32)
    for u in range(num_users):
        ns = social_adj_list.get(u, [])
        deg[u] = len(ns)
        for n in ns:
            dst.append(u)
            src.append(int(n))
    edge_dst = jnp.asarray(np.asarray(dst, dtype=np.int32))
    edge_src = jnp.asarray(np.asarray(src, dtype=np.int32))
    return edge_dst, edge_src, jnp.asarray(deg)


def prepare_linear(lin_w, lin_b):
    """One-time weight prep.  torch Linear: y = x @ W.T + b with W: [D, 2D].
    Split W.T into the halves acting on u_emb / neighbor-mean; bf16 for the MXU."""
    lin_w = jnp.asarray(lin_w, jnp.float32)
    lin_b = jnp.asarray(lin_b, jnp.float32)
    D = lin_b.shape[0]
    wt = lin_w.T                                              # [2D, D]
    w1 = wt[:D, :].astype(jnp.bfloat16)                       # acts on u_emb
    w2 = wt[D:, :].astype(jnp.bfloat16)                       # acts on neighbor mean
    b_row = lin_b.reshape(1, D)                               # f32 bias row
    return w1, w2, b_row


@jax.jit
def easyrec_forward(nodes_u, nodes_v, u2e, v2e, w1, w2, b_row,
                    edge_dst, edge_src, deg):
    """nodes_u, nodes_v: int32 device arrays.  Other args from prepare_* helpers."""
    U, D = u2e.shape
    B = nodes_u.shape[0]

    # ---- device-side glue: per-user neighbor mean via flat-edge segment_sum ----
    # (no [B, max_deg, D] padded gather; uses the *current* u2e every call)
    nsum = jax.ops.segment_sum(u2e[edge_src], edge_dst, num_segments=U)    # [U, D]
    nmean = nsum / jnp.maximum(deg, 1).astype(jnp.float32)[:, None]        # [U, D]

    u_emb = u2e[nodes_u]                                       # [B, D] f32
    v_emb = v2e[nodes_v]                                       # [B, D] f32
    nemb = nmean[nodes_u]                                      # [B, D] f32
    mask = (deg[nodes_u] > 0).astype(jnp.float32)[:, None]     # [B, 1]

    # bf16 streams -> half the HBM bytes of the three dominant [B, D] inputs.
    u16 = u_emb.astype(jnp.bfloat16)
    n16 = nemb.astype(jnp.bfloat16)
    v16 = v_emb.astype(jnp.bfloat16)

    grid = (pl.cdiv(B, TILE_B),)
    flops = 4 * B * D * D + 4 * B * D
    bytes_accessed = 2 * (3 * B * D + 2 * D * D) + 4 * (2 * B + D)

    out = pl.pallas_call(
        easyrec_kernel,
        out_shape=jax.ShapeDtypeStruct((1, B), jnp.float32),
        grid=grid,
        in_specs=[
            pl.BlockSpec((TILE_B, D), lambda i: (i, 0)),       # u_emb   (streamed, bf16)
            pl.BlockSpec((TILE_B, D), lambda i: (i, 0)),       # nbr mean(streamed, bf16)
            pl.BlockSpec((TILE_B, D), lambda i: (i, 0)),       # v_emb   (streamed, bf16)
            pl.BlockSpec((TILE_B, 1), lambda i: (i, 0)),       # has-neighbor mask (f32)
            pl.BlockSpec((D, D), lambda i: (0, 0)),            # W1 (VMEM resident)
            pl.BlockSpec((D, D), lambda i: (0, 0)),            # W2 (VMEM resident)
            pl.BlockSpec((1, D), lambda i: (0, 0)),            # bias (VMEM resident)
        ],
        out_specs=pl.BlockSpec((1, TILE_B), lambda i: (0, i)),  # lane-dense scores
        compiler_params=pltpu.CompilerParams(
            dimension_semantics=("parallel",)),                 # megacore on v7x
        cost_estimate=pl.CostEstimate(flops=flops, transcendentals=0,
                                      bytes_accessed=bytes_accessed),
    )(u16, n16, v16, mask, w1, w2, b_row)

    return out[0]


def easyrec_reference(nodes_u, nodes_v, u2e, v2e, lin_w, lin_b, social_adj_list):
    """Pure numpy reference mirroring the PyTorch forward exactly (f32)."""
    nodes_u = np.asarray(nodes_u, dtype=np.int32)
    nodes_v = np.asarray(nodes_v, dtype=np.int32)
    uembs = []
    for u in nodes_u:
        neibs = social_adj_list[int(u)]
        if len(neibs) > 0:
            nemb = u2e[np.asarray(neibs, dtype=np.int32)].mean(axis=0)
            cat = np.concatenate([u2e[int(u)], nemb])
            uemb = cat @ lin_w.T + lin_b
        else:
            uemb = u2e[int(u)]
        uembs.append(uemb)
    uembs = np.stack(uembs)
    return (uembs * v2e[nodes_v]).sum(axis=1)


if __name__ == "__main__":
    # Small deterministic problem consistent with the module's __init__ shapes.
    # B = 1100 -> two full TILE_B=512 tiles plus a partial boundary tile, so the
    # unpadded-grid path (partial blocks) is exercised.
    num_users, num_items, embed_dim = 64, 48, 32
    B = 1100

    key = jax.random.PRNGKey(0)
    k1, k2, k3, k4, k5, k6 = jax.random.split(key, 6)

    # Parameters (torch.nn.Embedding ~ N(0,1); Linear ~ small uniform)
    u2e = jax.random.normal(k1, (num_users, embed_dim), jnp.float32)
    v2e = jax.random.normal(k2, (num_items, embed_dim), jnp.float32)
    lin_w = jax.random.uniform(k3, (embed_dim, 2 * embed_dim), jnp.float32, -0.1, 0.1)
    lin_b = jax.random.uniform(k4, (embed_dim,), jnp.float32, -0.1, 0.1)

    # Deterministic social adjacency (some users have no neighbors).
    social_adj_list = {}
    for u in range(num_users):
        if u % 4 == 3:
            social_adj_list[u] = []
        else:
            deg_u = (u % 3) + 1
            social_adj_list[u] = [(u + 1) % num_users, (u + 3) % num_users,
                                  (u + 7) % num_users][:deg_u]

    nodes_u = jax.random.randint(k5, (B,), 0, num_users, dtype=jnp.int32)
    nodes_v = jax.random.randint(k6, (B,), 0, num_items, dtype=jnp.int32)

    # One-time preprocessing (hoisted off the per-call hot path).
    edge_dst, edge_src, deg = build_social_tables(social_adj_list, num_users)
    w1, w2, b_row = prepare_linear(lin_w, lin_b)

    scores = easyrec_forward(nodes_u, nodes_v, u2e, v2e, w1, w2, b_row,
                             edge_dst, edge_src, deg)
    scores = jax.block_until_ready(scores)

    ref = easyrec_reference(np.asarray(nodes_u), np.asarray(nodes_v),
                            np.asarray(u2e), np.asarray(v2e),
                            np.asarray(lin_w), np.asarray(lin_b),
                            social_adj_list)
    # bf16 matmul operands with f32 accumulation -> widened tolerances vs f32 ref.
    np.testing.assert_allclose(np.asarray(scores), ref, rtol=2e-2, atol=2e-1)

    print("KERNEL_OK")
</pallas_src>

<mosaic_0001>
module attributes {stable_mosaic.version = 11 : i64} {
  func.func @easyrec_kernel(%arg0: i32, %arg1: memref<512x32xbf16, #tpu.memory_space<vmem>>, %arg2: memref<512x32xbf16, #tpu.memory_space<vmem>>, %arg3: memref<512x32xbf16, #tpu.memory_space<vmem>>, %arg4: memref<512x1xf32, #tpu.memory_space<vmem>>, %arg5: memref<32x32xbf16, #tpu.memory_space<vmem>>, %arg6: memref<32x32xbf16, #tpu.memory_space<vmem>>, %arg7: memref<1x32xf32, #tpu.memory_space<vmem>>, %arg8: memref<1x512xf32, #tpu.memory_space<vmem>>) attributes {dimension_semantics = [#tpu.dimension_semantics<parallel>], iteration_bounds = array<i64: 3>, scalar_prefetch = 0 : i64, scratch_operands = 0 : i64, tpu.core_type = #tpu.core_type<tc>, window_params = [{transform_indices = @transform_0, window_bounds = array<i64: 512, 32>}, {transform_indices = @transform_1, window_bounds = array<i64: 512, 32>}, {transform_indices = @transform_2, window_bounds = array<i64: 512, 32>}, {transform_indices = @transform_3, window_bounds = array<i64: 512, 1>}, {pipeline_mode = #tpu.pipeline_mode<synchronous>, transform_indices = @transform_4, window_bounds = array<i64: 32, 32>}, {pipeline_mode = #tpu.pipeline_mode<synchronous>, transform_indices = @transform_5, window_bounds = array<i64: 32, 32>}, {pipeline_mode = #tpu.pipeline_mode<synchronous>, transform_indices = @transform_6, window_bounds = array<i64: 1, 32>}, {transform_indices = @transform_7, window_bounds = array<i64: 1, 512>}]} {
    %c0 = arith.constant 0 : index
    %c0_0 = arith.constant 0 : index
    %0 = vector.load %arg1[%c0, %c0_0] : memref<512x32xbf16, #tpu.memory_space<vmem>>, vector<512x32xbf16>
    %c0_1 = arith.constant 0 : index
    %c0_2 = arith.constant 0 : index
    %1 = vector.load %arg2[%c0_1, %c0_2] : memref<512x32xbf16, #tpu.memory_space<vmem>>, vector<512x32xbf16>
    %c0_3 = arith.constant 0 : index
    %c0_4 = arith.constant 0 : index
    %2 = vector.load %arg5[%c0_3, %c0_4] : memref<32x32xbf16, #tpu.memory_space<vmem>>, vector<32x32xbf16>
    %cst = arith.constant dense<0.000000e+00> : vector<512x32xf32>
    %3 = tpu.matmul %0, %2, %cst {dimension_numbers = #tpu.dot_dimension_numbers<[1], [0], [0], [1], [0, 0, 1, 1], [], []>} : vector<512x32xbf16>, vector<32x32xbf16>, vector<512x32xf32> -> vector<512x32xf32>
    %c0_5 = arith.constant 0 : index
    %c0_6 = arith.constant 0 : index
    %4 = vector.load %arg6[%c0_5, %c0_6] : memref<32x32xbf16, #tpu.memory_space<vmem>>, vector<32x32xbf16>
    %cst_7 = arith.constant dense<0.000000e+00> : vector<512x32xf32>
    %5 = tpu.matmul %1, %4, %cst_7 {dimension_numbers = #tpu.dot_dimension_numbers<[1], [0], [0], [1], [0, 0, 1, 1], [], []>} : vector<512x32xbf16>, vector<32x32xbf16>, vector<512x32xf32> -> vector<512x32xf32>
    %6 = arith.addf %3, %5 : vector<512x32xf32>
    %c0_8 = arith.constant 0 : index
    %c0_9 = arith.constant 0 : index
    %7 = vector.load %arg7[%c0_8, %c0_9] : memref<1x32xf32, #tpu.memory_space<vmem>>, vector<1x32xf32>
    %8 = vector.broadcast %7 : vector<1x32xf32> to vector<512x32xf32>
    %9 = arith.addf %6, %8 : vector<512x32xf32>
    %10 = arith.extf %0 : vector<512x32xbf16> to vector<512x32xf32>
    %c0_10 = arith.constant 0 : index
    %c0_11 = arith.constant 0 : index
    %11 = vector.load %arg3[%c0_10, %c0_11] : memref<512x32xbf16, #tpu.memory_space<vmem>>, vector<512x32xbf16>
    %12 = arith.extf %11 : vector<512x32xbf16> to vector<512x32xf32>
    %c0_12 = arith.constant 0 : index
    %c0_13 = arith.constant 0 : index
    %13 = vector.load %arg4[%c0_12, %c0_13] : memref<512x1xf32, #tpu.memory_space<vmem>>, vector<512x1xf32>
    %cst_14 = arith.constant 0.000000e+00 : f32
    %14 = vector.broadcast %cst_14 : f32 to vector<512x1xf32>
    %15 = arith.cmpf ogt, %13, %14 : vector<512x1xf32>
    %16 = vector.shape_cast %15 : vector<512x1xi1> to vector<512x1xi1>
    %17 = vector.broadcast %16 : vector<512x1xi1> to vector<512x32xi1>
    %18 = arith.select %17, %9, %10 : vector<512x32xi1>, vector<512x32xf32>
    %19 = arith.mulf %18, %12 : vector<512x32xf32>
    %cst_15 = arith.constant dense<0.000000e+00> : vector<512xf32>
    %20 = vector.multi_reduction <add>, %19, %cst_15 [1] : vector<512x32xf32> to vector<512xf32>
    %21 = vector.shape_cast %20 : vector<512xf32> to vector<1x512xf32>
    %c0_16 = arith.constant 0 : index
    %c0_17 = arith.constant 0 : index
    %22 = vector.load %arg8[%c0_16, %c0_17] : memref<1x512xf32, #tpu.memory_space<vmem>>, vector<1x512xf32>
    tpu.vector_store %arg8[%c0_16, %c0_17], %21 {strides = array<i32>} : memref<1x512xf32, #tpu.memory_space<vmem>>, vector<1x512xf32>,
    return
  }
  func.func @transform_0(%arg0: i32) -> (i32, i32) {
    %c0_i32 = arith.constant 0 : i32
    %c0_i32_0 = arith.constant 0 : i32
    return %arg0, %c0_i32 : i32, i32
  }
  func.func @transform_1(%arg0: i32) -> (i32, i32) {
    %c0_i32 = arith.constant 0 : i32
    %c0_i32_0 = arith.constant 0 : i32
    return %arg0, %c0_i32 : i32, i32
  }
  func.func @transform_2(%arg0: i32) -> (i32, i32) {
    %c0_i32 = arith.constant 0 : i32
    %c0_i32_0 = arith.constant 0 : i32
    return %arg0, %c0_i32 : i32, i32
  }
  func.func @transform_3(%arg0: i32) -> (i32, i32) {
    %c0_i32 = arith.constant 0 : i32
    %c0_i32_0 = arith.constant 0 : i32
    return %arg0, %c0_i32 : i32, i32
  }
  func.func @transform_4(%arg0: i32) -> (i32, i32) {
    %c0_i32 = arith.constant 0 : i32
    %c0_i32_0 = arith.constant 0 : i32
    %c0_i32_1 = arith.constant 0 : i32
    return %c0_i32, %c0_i32_0 : i32, i32
  }
  func.func @transform_5(%arg0: i32) -> (i32, i32) {
    %c0_i32 = arith.constant 0 : i32
    %c0_i32_0 = arith.constant 0 : i32
    %c0_i32_1 = arith.constant 0 : i32
    return %c0_i32, %c0_i32_0 : i32, i32
  }
  func.func @transform_6(%arg0: i32) -> (i32, i32) {
    %c0_i32 = arith.constant 0 : i32
    %c0_i32_0 = arith.constant 0 : i32
    %c0_i32_1 = arith.constant 0 : i32
    return %c0_i32, %c0_i32_0 : i32, i32
  }
  func.func @transform_7(%arg0: i32) -> (i32, i32) {
    %c0_i32 = arith.constant 0 : i32
    %c0_i32_0 = arith.constant 0 : i32
    return %c0_i32, %arg0 : i32, i32
  }
}

</mosaic_0001>

<bundles_post_ra>
// kernel: easyrec_forward.1
= control target key start
LH: loop header
LB: loop body
LE: loop exit
PB: predicated region body
PF: predicated region fallthrough
CT: control target
= control target key end

     0   :  { %s5405_s24 = smov 0   ;;  %s5407_s25 = smov 0   ;;  %s7340_s0 = inlined_call_operand.vmem [shape: bf16[1100,32], index: 0, kind: input, shape index: {}]   ;;  %s7341_s1 = inlined_call_operand.vmem [shape: bf16[1100,32], index: 1, kind: input, shape index: {}]   ;;  %s7342_s2 = inlined_call_operand.vmem [shape: bf16[1100,32], index: 2, kind: input, shape index: {}]   ;;  %s7343_s3 = inlined_call_operand.vmem [shape: f32[1100,1], index: 3, kind: input, shape index: {}]   ;;  %s7344_s4 = inlined_call_operand.vmem [shape: bf16[32,32], index: 4, kind: input, shape index: {}]   ;;  %s7345_s5 = inlined_call_operand.vmem [shape: bf16[32,32], index: 5, kind: input, shape index: {}]   ;;  %s7346_s6 = inlined_call_operand.vmem [shape: f32[1,32], index: 6, kind: input, shape index: {}]   ;;  %s7347_s7 = inlined_call_operand.vmem [shape: f32[1,1100], index: 7, kind: output, shape index: {}]  }
   0x1   :  { %s5409_s26 = smov 0  }
   0x2 LB: > { %s5418_s27 = sadd.s32 4294967295, %s5296_s26   ;;  %s5420_s28 = sadd.s32 1, %s5296_s26   ;;  %s5296_s26 = sphi %s5409_s26, %s7411_s26   ;;  %s5292_s25 = sphi %s5407_s25, %s7410_s25   ;;  %s5288_s24 = sphi %s5405_s24, %s7409_s24  }
   0x3   : > { %s188_s29 = ssub.s32 %s5296_s26, %s5420_s28  ;;  %s191_s30 = sadd.s32 1, %s5292_s25 }
   0x4   : > { %p189_p0 = scmp.eq.s32.totalorder %s188_s29, 0  ;;  %p201_p1 = scmp.ne.s32.totalorder %s5292_s25, %s5288_s24 }
   0x5   : > { %p202_p2 = scmp.eq.s32.totalorder %s5418_s27, 2  ;;  %p4438_p3 = scmp.ge.s32.totalorder %s5296_s26, 1 }
   0x6   : > { %s5428_s8 = scalar_select %p189_p0, %s5292_s25, %s191_s30  }
   0x7   : > { %p5430_p4 = por %p202_p2, %p201_p1  ;;  %p303_p5 = scmp.lt.s32.totalorder %s5296_s26, 4 }
   0x9   : > { %p304_p6 = pnand %p4438_p3, %p303_p5 }
   0xb   : > { %307 = sbr.rel (%p304_p6) target bundleno = 1581 (0x62d), region = 48 }
  0x10   : > { %v4879_v0 = vld [vmem:[%s7345_s5 + $0x8] sm:$0xff]  ;;  %s4440_s14 = sshll.u32 %s5418_s27, 6  ;;  %v7348_v2 = vmov 0   ;;  %v4878_v3 = vld [vmem:[%s7345_s5] sm:$0xff]  ;;  %vm734_vm0 = vcmask 261120   ;;  %s362_s26 = sand.u32 1, %s5288_s24  }
  0x11   : > { %v4877_v1 = vld [vmem:[%s7344_s4 + $0x8] sm:$0xff]  ;;  %5204 = vset.pattern.permute.xlu2 %v7348_v2  ;;  %5203 = vset.pattern.permute.xlu1 %v7348_v2  ;;  %p370_p7 = scmp.lt.s32.totalorder %s4440_s14, 137  ;;  %v4876_v4 = vld [vmem:[%s7344_s4] sm:$0xff]  ;;  %s4439_s29 = sshll.u32 %s362_s26, 2 }
  0x12   : > { %837 = vmatpush.bf16.msra.mxu0 %v4879_v0  ;;  %5043 = vmatpush.bf16.msra.mxu2 %v4879_v0  ;;  %s7043_s24 = scalar_lea.vmem [#allocation2], %s4439_s29  }
  0x13   : > { %1274 = vmatpush.bf16.msra.mxu1 %v4877_v1  ;;  %5045 = vmatpush.bf16.msra.mxu3 %v4877_v1  ;;  %s7413_s14 = smov (!%p370_p7, %s4440_s14), 137 }
  0x14   : > { %5202 = vset.pattern.permute.xlu0 %v7348_v2  ;;  %s4447_s19 = sshll.u32 %s7413_s14, 3  ;;  %s5450_s20 = sshll.u32 %s7413_s14, 2 }
  0x15   : > { %s5455_s23 = scalar_lea.vmem %s7343_s3, %s4447_s19  ;;  %s5461_s30 = scalar_lea.vmem %s7340_s0, %s5450_s20 }
  0x16   : > { %838 = vmatpush.bf16.msra.mxu0 %v4878_v3  ;;  %5044 = vmatpush.bf16.msra.mxu2 %v4878_v3  ;;  %v1701_v5 = vld [vmem:[%s5455_s23 + $0x20] sm:$0xff]  ;;  %v1699_v6 = vld [vmem:[%s5455_s23 + $0x10] sm:$0xff]  ;;  %s5470_s12 = scalar_lea.vmem %s7341_s1, %s5450_s20  ;;  %v1702_v15 = vld [vmem:[%s5455_s23 + $0x28] sm:$0xff]  ;;  %s5787_s17 = scalar_lea.vmem %s7342_s2, %s5450_s20 }
  0x17   : > { %1275 = vmatpush.bf16.msra.mxu1 %v4876_v4  ;;  %5046 = vmatpush.bf16.msra.mxu3 %v4876_v4  ;;  %v1697_v7 = vld [vmem:[%s5455_s23] sm:$0xff]  ;;  %vm1765_vm1 = vcmp.gt.f32.partialorder %v1701_v5, 0.0  ;;  %vm1763_vm2 = vcmp.gt.f32.partialorder %v1699_v6, 0.0  ;;  %v1700_v16 = vld [vmem:[%s5455_s23 + $0x18] sm:$0xff]  ;;  %v1698_v17 = vld [vmem:[%s5455_s23 + $0x8] sm:$0xff]  ;;  %vm1766_vm4 = vcmp.gt.f32.partialorder %v1702_v15, 0.0 }
  0x18   : > { %vm1761_vm3 = vcmp.gt.f32.partialorder %v1697_v7, 0.0  ;;  %v4844_v8 = vld [vmem:[%s5470_s12] sm:$0xff]  ;;  %v1829_v11 = vsel %vm1765_vm1, 1, %v7348_v2  ;;  %v1827_v12 = vsel %vm1763_vm2, 1, %v7348_v2  ;;  %vm1764_vm5 = vcmp.gt.f32.partialorder %v1700_v16, 0.0  ;;  %v1704_v22 = vld [vmem:[%s5455_s23 + $0x38] sm:$0xff] }
  0x19   : > { %v4860_v9 = vld [vmem:[%s5470_s12 + $0x80] sm:$0xff]  ;;  %v1825_v13 = vsel %vm1761_vm3, 1, %v7348_v2  ;;  %1902 = vperm.xlu2 %5204, %v1829_v11   ;;  %1896 = vperm.xlu1 %5203, %v1827_v12   ;;  %vm1762_vm6 = vcmp.gt.f32.partialorder %v1698_v17, 0.0  ;;  %v1830_v18 = vsel %vm1766_vm4, 1, %v7348_v2  ;;  %v1828_v19 = vsel %vm1764_vm5, 1, %v7348_v2  ;;  %v1703_v23 = vld [vmem:[%s5455_s23 + $0x30] sm:$0xff] }
  0x1a   : > { %v4812_v10 = vld [vmem:[%s5461_s30] sm:$0xff]  ;;  %1890 = vperm.xlu0 %5202, %v1825_v13   ;;  %4584 = vmatmul.msk.bf16.vlgmr.msra.gmra.mxu0 %vm734_vm0, %v4844_v8  ;;  %v1826_v20 = vsel %vm1762_vm6, 1, %v7348_v2  ;;  %vm1768_vm8 = vcmp.gt.f32.partialorder %v1704_v22, 0.0  ;;  %vm1767_vm9 = vcmp.gt.f32.partialorder %v1703_v23, 0.0  ;;  %v4845_v26 = vld [vmem:[%s5470_s12 + $0x8] sm:$0xff]  ;;  %v1708_v31 = vld [vmem:[%s5455_s23 + $0x58] sm:$0xff] }
  0x1b   : > { %v4828_v14 = vld [vmem:[%s5461_s30 + $0x80] sm:$0xff]  ;;  %4600 = vmatmul.msk.bf16.vlgmr.msra.gmra.mxu2 %vm734_vm0, %v4860_v9  ;;  %4752 = vmatmul.msk.bf16.vlgmr.msra.gmra.mxu1 %vm734_vm0, %v4812_v10  ;;  %v1832_v25 = vsel %vm1768_vm8, 1, %v7348_v2  ;;  %v1831_v27 = vsel %vm1767_vm9, 1, %v7348_v2  ;;  %v4861_v28 = vld [vmem:[%s5470_s12 + $0x88] sm:$0xff]  ;;  %v1707_v32 = vld [vmem:[%s5455_s23 + $0x50] sm:$0xff]  ;;  %vm1772_vm10 = vcmp.gt.f32.partialorder %v1708_v31, 0.0 }
  0x1c   : > { %4768 = vmatmul.msk.bf16.vlgmr.msra.gmra.mxu3 %vm734_vm0, %v4828_v14  ;;  %v1705_v21 = vld [vmem:[%s5455_s23 + $0x40] sm:$0xff]  ;;  %v4813_v29 = vld [vmem:[%s5461_s30 + $0x8] sm:$0xff]  ;;  %vm1771_vm11 = vcmp.gt.f32.partialorder %v1707_v32, 0.0  ;;  %v1836_v34 = vsel %vm1772_vm10, 1, %v7348_v2  ;;  %v1711_v37 = vld [vmem:[%s5455_s23 + $0x70] sm:$0xff] }
  0x1d   : > { %vm1769_vm7 = vcmp.gt.f32.partialorder %v1705_v21, 0.0  ;;  %v4829_v30 = vld [vmem:[%s5461_s30 + $0x88] sm:$0xff]  ;;  %v1835_v35 = vsel %vm1771_vm11, 1, %v7348_v2  ;;  %v1709_v39 = vld [vmem:[%s5455_s23 + $0x60] sm:$0xff]  ;;  %vm1775_vm13 = vcmp.gt.f32.partialorder %v1711_v37, 0.0  ;;  %v4846_v42 = vld [vmem:[%s5470_s12 + $0x10] sm:$0xff] }
  0x1e   : > { %v1833_v24 = vsel %vm1769_vm7, 1, %v7348_v2  ;;  %v1706_v33 = vld [vmem:[%s5455_s23 + $0x48] sm:$0xff]  ;;  %vm1773_vm15 = vcmp.gt.f32.partialorder %v1709_v39, 0.0  ;;  %v1839_v40 = vsel %vm1775_vm13, 1, %v7348_v2  ;;  %v4862_v44 = vld [vmem:[%s5470_s12 + $0x90] sm:$0xff]  ;;  %v1713_v48 = vld [vmem:[%s5455_s23 + $0x80] sm:$0xff] }
  0x1f   : > { %vm1770_vm12 = vcmp.gt.f32.partialorder %v1706_v33, 0.0  ;;  %v1710_v38 = vld [vmem:[%s5455_s23 + $0x68] sm:$0xff]  ;;  %v1837_v43 = vsel %vm1773_vm15, 1, %v7348_v2  ;;  %v4814_v45 = vld [vmem:[%s5461_s30 + $0x10] sm:$0xff]  ;;  %v1712_v49 = vld [vmem:[%s5455_s23 + $0x78] sm:$0xff]  ;;  %vm1777_vm2 = vcmp.gt.f32.partialorder %v1713_v48, 0.0 }
  0x20   : > { %v1834_v36 = vsel %vm1770_vm12, 1, %v7348_v2  ;;  %vm1774_vm14 = vcmp.gt.f32.partialorder %v1710_v38, 0.0  ;;  %v4830_v46 = vld [vmem:[%s5461_s30 + $0x90] sm:$0xff]  ;;  %v1714_v47 = vld [vmem:[%s5455_s23 + $0x88] sm:$0xff]  ;;  %vm1776_vm3 = vcmp.gt.f32.partialorder %v1712_v49, 0.0  ;;  %v1841_v51 = vsel %vm1777_vm2, 1, %v7348_v2 }
  0x21   : > { %1905 = vperm.xlu2 %5204, %v1830_v18   ;;  %1899 = vperm.xlu1 %5203, %v1828_v19   ;;  %v1838_v41 = vsel %vm1774_vm14, 1, %v7348_v2  ;;  %vm1778_vm1 = vcmp.gt.f32.partialorder %v1714_v47, 0.0  ;;  %v1840_v52 = vsel %vm1776_vm3, 1, %v7348_v2  ;;  %v1717_v53 = vld [vmem:[%s5455_s23 + $0xa0] sm:$0xff]  ;;  %v1716_v54 = vld [vmem:[%s5455_s23 + $0x98] sm:$0xff]  ;;  %v1715_v55 = vld [vmem:[%s5455_s23 + $0x90] sm:$0xff] }
  0x22   : > { %1893 = vperm.xlu0 %5202, %v1826_v20   ;;  %v1842_v50 = vsel %vm1778_vm1, 1, %v7348_v2  ;;  %vm1781_vm4 = vcmp.gt.f32.partialorder %v1717_v53, 0.0  ;;  %vm1780_vm5 = vcmp.gt.f32.partialorder %v1716_v54, 0.0  ;;  %vm1779_vm6 = vcmp.gt.f32.partialorder %v1715_v55, 0.0  ;;  %v4847_v58 = vld [vmem:[%s5470_s12 + $0x18] sm:$0xff]  ;;  %v1719_v0 = vld [vmem:[%s5455_s23 + $0xb0] sm:$0xff] }
  0x23   : > { %v1845_v56 = vsel %vm1781_vm4, 1, %v7348_v2  ;;  %v1844_v57 = vsel %vm1780_vm5, 1, %v7348_v2  ;;  %v1843_v59 = vsel %vm1779_vm6, 1, %v7348_v2  ;;  %v4863_v60 = vld [vmem:[%s5470_s12 + $0x98] sm:$0xff]  ;;  %v1718_v1 = vld [vmem:[%s5455_s23 + $0xa8] sm:$0xff]  ;;  %vm1783_vm8 = vcmp.gt.f32.partialorder %v1719_v0, 0.0 }
  0x24   : > { %v4815_v61 = vld [vmem:[%s5461_s30 + $0x18] sm:$0xff]  ;;  %vm1782_vm9 = vcmp.gt.f32.partialorder %v1718_v1, 0.0  ;;  %v1847_v4 = vsel %vm1783_vm8, 1, %v7348_v2  ;;  %v1723_v6 = vld [vmem:[%s5455_s23 + $0xd0] sm:$0xff]  ;;  %v1722_v7 = vld [vmem:[%s5455_s23 + $0xc8] sm:$0xff] }
  0x25   : > { %v4831_v62 = vld [vmem:[%s5461_s30 + $0x98] sm:$0xff]  ;;  %v1846_v5 = vsel %vm1782_vm9, 1, %v7348_v2  ;;  %v1721_v8 = vld [vmem:[%s5455_s23 + $0xc0] sm:$0xff]  ;;  %vm1787_vm10 = vcmp.gt.f32.partialorder %v1723_v6, 0.0  ;;  %vm1786_vm11 = vcmp.gt.f32.partialorder %v1722_v7, 0.0  ;;  %v1726_v16 = vld [vmem:[%s5455_s23 + $0xe8] sm:$0xff] }
  0x26   : > { %v1720_v63 = vld [vmem:[%s5455_s23 + $0xb8] sm:$0xff]  ;;  %vm1785_vm12 = vcmp.gt.f32.partialorder %v1721_v8, 0.0  ;;  %v1851_v9 = vsel %vm1787_vm10, 1, %v7348_v2  ;;  %v1850_v10 = vsel %vm1786_vm11, 1, %v7348_v2  ;;  %v4848_v11 = vld [vmem:[%s5470_s12 + $0x20] sm:$0xff]  ;;  %vm1790_vm13 = vcmp.gt.f32.partialorder %v1726_v16, 0.0 }
  0x27   : > { %vm1784_vm7 = vcmp.gt.f32.partialorder %v1720_v63, 0.0  ;;  %v1849_v12 = vsel %vm1785_vm12, 1, %v7348_v2  ;;  %v4864_v13 = vld [vmem:[%s5470_s12 + $0xa0] sm:$0xff]  ;;  %v1724_v18 = vld [vmem:[%s5455_s23 + $0xd8] sm:$0xff]  ;;  %v1854_v19 = vsel %vm1790_vm13, 1, %v7348_v2  ;;  %v4833_v31 = vld [vmem:[%s5461_s30 + $0xa8] sm:$0xff] }
  0x28   : > { %v1848_v3 = vsel %vm1784_vm7, 1, %v7348_v2  ;;  %v4816_v14 = vld [vmem:[%s5461_s30 + $0x20] sm:$0xff]  ;;  %vm1788_vm15 = vcmp.gt.f32.partialorder %v1724_v18, 0.0  ;;  %v1728_v23 = vld [vmem:[%s5455_s23 + $0xf8] sm:$0xff]  ;;  %v1731_v33 = vld [vmem:[%s5455_s23 + $0x110] sm:$0xff] }
  0x29   : > { %1914 = vperm.xlu2 %5204, %v1833_v24   ;;  %1911 = vperm.xlu1 %5203, %v1832_v25   ;;  %v4832_v15 = vld [vmem:[%s5461_s30 + $0xa0] sm:$0xff]  ;;  %v1852_v21 = vsel %vm1788_vm15, 1, %v7348_v2  ;;  %v1727_v24 = vld [vmem:[%s5455_s23 + $0xf0] sm:$0xff]  ;;  %vm1792_vm2 = vcmp.gt.f32.partialorder %v1728_v23, 0.0  ;;  %v1732_v32 = vld [vmem:[%s5455_s23 + $0x118] sm:$0xff]  ;;  %vm1795_vm5 = vcmp.gt.f32.partialorder %v1731_v33, 0.0 }
  0x2a   : > { %1908 = vperm.xlu0 %5202, %v1831_v27   ;;  %4585 = vmatmul.msk.bf16.gmra.mxu0 %vm734_vm0, %v4845_v26  ;;  %v1725_v17 = vld [vmem:[%s5455_s23 + $0xe0] sm:$0xff]  ;;  %vm1791_vm3 = vcmp.gt.f32.partialorder %v1727_v24, 0.0  ;;  %v1856_v26 = vsel %vm1792_vm2, 1, %v7348_v2  ;;  %v4849_v27 = vld [vmem:[%s5470_s12 + $0x28] sm:$0xff]  ;;  %vm1796_vm4 = vcmp.gt.f32.partialorder %v1732_v32, 0.0  ;;  %v1735_v38 = vld [vmem:[%s5455_s23 + $0x130] sm:$0xff] }
  0x2b   : > { %4601 = vmatmul.msk.bf16.gmra.mxu2 %vm734_vm0, %v4861_v28  ;;  %4753 = vmatmul.msk.bf16.gmra.mxu1 %vm734_vm0, %v4813_v29  ;;  %vm1789_vm14 = vcmp.gt.f32.partialorder %v1725_v17, 0.0  ;;  %v1729_v22 = vld [vmem:[%s5455_s23 + $0x100] sm:$0xff]  ;;  %v1855_v28 = vsel %vm1791_vm3, 1, %v7348_v2  ;;  %v4865_v29 = vld [vmem:[%s5470_s12 + $0xa8] sm:$0xff]  ;;  %vm1799_vm7 = vcmp.gt.f32.partialorder %v1735_v38, 0.0  ;;  %v4834_v47 = vld [vmem:[%s5461_s30 + $0xb0] sm:$0xff] }
  0x2c   : > { %4769 = vmatmul.msk.bf16.gmra.mxu3 %vm734_vm0, %v4829_v30  ;;  %v1853_v20 = vsel %vm1789_vm14, 1, %v7348_v2  ;;  %vm1793_vm1 = vcmp.gt.f32.partialorder %v1729_v22, 0.0  ;;  %v4817_v30 = vld [vmem:[%s5461_s30 + $0x28] sm:$0xff]  ;;  %v1737_v49 = vld [vmem:[%s5455_s23 + $0x140] sm:$0xff]  ;;  %v1740_v55 = vld [vmem:[%s5455_s23 + $0x158] sm:$0xff] }
  0x2d   : > { %v1857_v25 = vsel %vm1793_vm1, 1, %v7348_v2  ;;  %v1734_v39 = vld [vmem:[%s5455_s23 + $0x128] sm:$0xff]  ;;  %vm1801_vm11 = vcmp.gt.f32.partialorder %v1737_v49, 0.0  ;;  %v1741_v54 = vld [vmem:[%s5455_s23 + $0x160] sm:$0xff]  ;;  %vm1804_vm14 = vcmp.gt.f32.partialorder %v1740_v55, 0.0  ;;  %v4835_v63 = vld [vmem:[%s5461_s30 + $0xb8] sm:$0xff] }
  0x2e   : > { %vm1798_vm8 = vcmp.gt.f32.partialorder %v1734_v39, 0.0  ;;  %v1738_v48 = vld [vmem:[%s5455_s23 + $0x148] sm:$0xff]  ;;  %vm1805_vm13 = vcmp.gt.f32.partialorder %v1741_v54, 0.0  ;;  %v1744_v0 = vld [vmem:[%s5455_s23 + $0x178] sm:$0xff]  ;;  %v1743_v1 = vld [vmem:[%s5455_s23 + $0x170] sm:$0xff] }
  0x2f   : > { %vm1802_vm10 = vcmp.gt.f32.partialorder %v1738_v48, 0.0  ;;  %vm1808_vm1 = vcmp.gt.f32.partialorder %v1744_v0, 0.0  ;;  %vm1807_vm2 = vcmp.gt.f32.partialorder %v1743_v1, 0.0  ;;  %v1747_v8 = vld [vmem:[%s5455_s23 + $0x190] sm:$0xff]  ;;  %v4868_v18 = vld [vmem:[%s5470_s12 + $0xc0] sm:$0xff]  ;;  %v1750_v22 = vld [vmem:[%s5455_s23 + $0x1a8] sm:$0xff] }
  0x30   : > { %v1871_v6 = vsel %vm1807_vm2, 1, %v7348_v2  ;;  %v1749_v23 = vld [vmem:[%s5455_s23 + $0x1a0] sm:$0xff]  ;;  %v1751_v38 = vld [vmem:[%s5455_s23 + $0x1b0] sm:$0xff]  ;;  %v4869_v48 = vld [vmem:[%s5470_s12 + $0xc8] sm:$0xff] }
  0x31   : > { %1923 = vperm.xlu2 %5204, %v1836_v34   ;;  %1920 = vperm.xlu1 %5203, %v1835_v35   ;;  %v1730_v34 = vld [vmem:[%s5455_s23 + $0x108] sm:$0xff]  ;;  %v1860_v35 = vsel %vm1796_vm4, 1, %v7348_v2  ;;  %vm1811_vm4 = vcmp.gt.f32.partialorder %v1747_v8, 0.0  ;;  %v1756_v54 = vld [vmem:[%s5455_s23 + $0x1d8] sm:$0xff]  ;;  %v1755_v55 = vld [vmem:[%s5455_s23 + $0x1d0] sm:$0xff] }
  0x32   : > { %1917 = vperm.xlu0 %5202, %v1834_v36   ;;  %vm1794_vm6 = vcmp.gt.f32.partialorder %v1730_v34, 0.0  ;;  %v1859_v36 = vsel %vm1795_vm5, 1, %v7348_v2  ;;  %v4821_v49 = vld [vmem:[%s5461_s30 + $0x48] sm:$0xff] }
  0x33   : > { %v1858_v37 = vsel %vm1794_vm6, 1, %v7348_v2 }
  0x39   : > { %1932 = vperm.xlu2 %5204, %v1839_v40   ;;  %1929 = vperm.xlu1 %5203, %v1838_v41   ;;  %v1733_v40 = vld [vmem:[%s5455_s23 + $0x120] sm:$0xff]  ;;  %v1863_v41 = vsel %vm1799_vm7, 1, %v7348_v2  ;;  %vm1814_vm7 = vcmp.gt.f32.partialorder %v1750_v22, 0.0 }
  0x3a   : > { %1926 = vperm.xlu0 %5202, %v1837_v43   ;;  %4586 = vmatmul.msk.bf16.gmra.mxu0 %vm734_vm0, %v4846_v42  ;;  %vm1797_vm9 = vcmp.gt.f32.partialorder %v1733_v40, 0.0  ;;  %v1862_v42 = vsel %vm1798_vm8, 1, %v7348_v2  ;;  %v4850_v43 = vld [vmem:[%s5470_s12 + $0x30] sm:$0xff]  ;;  %vm1813_vm8 = vcmp.gt.f32.partialorder %v1749_v23, 0.0 }
  0x3b   : > { %4602 = vmatmul.msk.bf16.gmra.mxu2 %vm734_vm0, %v4862_v44  ;;  %4754 = vmatmul.msk.bf16.gmra.mxu1 %vm734_vm0, %v4814_v45  ;;  %v1861_v44 = vsel %vm1797_vm9, 1, %v7348_v2  ;;  %v4866_v45 = vld [vmem:[%s5470_s12 + $0xb0] sm:$0xff] }
  0x3c   : > { %4770 = vmatmul.msk.bf16.gmra.mxu3 %vm734_vm0, %v4830_v46  ;;  %v4818_v46 = vld [vmem:[%s5461_s30 + $0x30] sm:$0xff] }
  0x41   : > { %1941 = vperm.xlu2 %5204, %v1842_v50   ;;  %1938 = vperm.xlu1 %5203, %v1841_v51   ;;  %v1736_v50 = vld [vmem:[%s5455_s23 + $0x138] sm:$0xff]  ;;  %v1866_v51 = vsel %vm1802_vm10, 1, %v7348_v2 }
  0x42   : > { %1935 = vperm.xlu0 %5202, %v1840_v52   ;;  %vm1800_vm12 = vcmp.gt.f32.partialorder %v1736_v50, 0.0  ;;  %v1865_v52 = vsel %vm1801_vm11, 1, %v7348_v2 }
  0x43   : > { %v1864_v53 = vsel %vm1800_vm12, 1, %v7348_v2  ;;  %vm1815_vm12 = vcmp.gt.f32.partialorder %v1751_v38, 0.0 }
  0x49   : > { %1950 = vperm.xlu2 %5204, %v1845_v56   ;;  %1947 = vperm.xlu1 %5203, %v1844_v57   ;;  %v1739_v56 = vld [vmem:[%s5455_s23 + $0x150] sm:$0xff]  ;;  %v1869_v57 = vsel %vm1805_vm13, 1, %v7348_v2  ;;  %vm1820_vm13 = vcmp.gt.f32.partialorder %v1756_v54, 0.0  ;;  %v4839_v54 = vld [vmem:[%s5461_s30 + $0xd8] sm:$0xff] }
  0x4a   : > { %1944 = vperm.xlu0 %5202, %v1843_v59   ;;  %4587 = vmatmul.msk.bf16.gmra.mxu0 %vm734_vm0, %v4847_v58  ;;  %vm1803_vm15 = vcmp.gt.f32.partialorder %v1739_v56, 0.0  ;;  %v1868_v58 = vsel %vm1804_vm14, 1, %v7348_v2  ;;  %v4851_v59 = vld [vmem:[%s5470_s12 + $0x38] sm:$0xff]  ;;  %v1754_v56 = vld [vmem:[%s5455_s23 + $0x1c8] sm:$0xff]  ;;  %vm1819_vm14 = vcmp.gt.f32.partialorder %v1755_v55, 0.0 }
  0x4b   : > { %4603 = vmatmul.msk.bf16.gmra.mxu2 %vm734_vm0, %v4863_v60  ;;  %4755 = vmatmul.msk.bf16.gmra.mxu1 %vm734_vm0, %v4815_v61  ;;  %v1867_v60 = vsel %vm1803_vm15, 1, %v7348_v2  ;;  %v4867_v61 = vld [vmem:[%s5470_s12 + $0xb8] sm:$0xff]  ;;  %vm1818_vm15 = vcmp.gt.f32.partialorder %v1754_v56, 0.0 }
  0x4c   : > { %4771 = vmatmul.msk.bf16.gmra.mxu3 %vm734_vm0, %v4831_v62  ;;  %v4819_v62 = vld [vmem:[%s5461_s30 + $0x38] sm:$0xff]  ;;  %v1882_v0 = vsel %vm1818_vm15, 1, %v7348_v2 }
  0x51   : > { %1959 = vperm.xlu2 %5204, %v1848_v3   ;;  %1956 = vperm.xlu1 %5203, %v1847_v4   ;;  %v1742_v3 = vld [vmem:[%s5455_s23 + $0x168] sm:$0xff] }
  0x52   : > { %1953 = vperm.xlu0 %5202, %v1846_v5   ;;  %vm1806_vm3 = vcmp.gt.f32.partialorder %v1742_v3, 0.0  ;;  %v1872_v5 = vsel %vm1808_vm1, 1, %v7348_v2 }
  0x53   : > { %v1870_v7 = vsel %vm1806_vm3, 1, %v7348_v2 }
  0x59   : > { %1968 = vperm.xlu2 %5204, %v1851_v9   ;;  %1965 = vperm.xlu1 %5203, %v1850_v10   ;;  %v1746_v9 = vld [vmem:[%s5455_s23 + $0x188] sm:$0xff]  ;;  %v1745_v10 = vld [vmem:[%s5455_s23 + $0x180] sm:$0xff] }
  0x5a   : > { %1962 = vperm.xlu0 %5202, %v1849_v12   ;;  %4588 = vmatmul.msk.bf16.gmra.mxu0 %vm734_vm0, %v4848_v11  ;;  %vm1810_vm5 = vcmp.gt.f32.partialorder %v1746_v9, 0.0  ;;  %vm1809_vm6 = vcmp.gt.f32.partialorder %v1745_v10, 0.0 }
  0x5b   : > { %4604 = vmatmul.msk.bf16.gmra.mxu2 %vm734_vm0, %v4864_v13  ;;  %4756 = vmatmul.msk.bf16.gmra.mxu1 %vm734_vm0, %v4816_v14  ;;  %v1875_v13 = vsel %vm1811_vm4, 1, %v7348_v2  ;;  %v1874_v14 = vsel %vm1810_vm5, 1, %v7348_v2  ;;  %v1873_v17 = vsel %vm1809_vm6, 1, %v7348_v2 }
  0x5c   : > { %4772 = vmatmul.msk.bf16.gmra.mxu3 %vm734_vm0, %v4832_v15  ;;  %v4852_v15 = vld [vmem:[%s5470_s12 + $0x40] sm:$0xff] }
  0x61   : > { %1977 = vperm.xlu2 %5204, %v1854_v19   ;;  %1974 = vperm.xlu1 %5203, %v1853_v20   ;;  %v4820_v19 = vld [vmem:[%s5461_s30 + $0x40] sm:$0xff] }
  0x62   : > { %1971 = vperm.xlu0 %5202, %v1852_v21   ;;  %v4836_v21 = vld [vmem:[%s5461_s30 + $0xc0] sm:$0xff] }
  0x69   : > { %1986 = vperm.xlu2 %5204, %v1857_v25   ;;  %1983 = vperm.xlu1 %5203, %v1856_v26   ;;  %v1748_v25 = vld [vmem:[%s5455_s23 + $0x198] sm:$0xff] }
  0x6a   : > { %1980 = vperm.xlu0 %5202, %v1855_v28   ;;  %4589 = vmatmul.msk.bf16.gmra.mxu0 %vm734_vm0, %v4849_v27  ;;  %vm1812_vm9 = vcmp.gt.f32.partialorder %v1748_v25, 0.0  ;;  %v4838_v25 = vld [vmem:[%s5461_s30 + $0xd0] sm:$0xff] }
  0x6b   : > { %4605 = vmatmul.msk.bf16.gmra.mxu2 %vm734_vm0, %v4865_v29  ;;  %4757 = vmatmul.msk.bf16.gmra.mxu1 %vm734_vm0, %v4817_v30  ;;  %v1878_v29 = vsel %vm1814_vm7, 1, %v7348_v2  ;;  %v1877_v30 = vsel %vm1813_vm8, 1, %v7348_v2  ;;  %v1876_v33 = vsel %vm1812_vm9, 1, %v7348_v2 }
  0x6c   : > { %4773 = vmatmul.msk.bf16.gmra.mxu3 %vm734_vm0, %v4833_v31 }
  0x71   : > { %1995 = vperm.xlu2 %5204, %v1860_v35   ;;  %1992 = vperm.xlu1 %5203, %v1859_v36   ;;  %v1753_v36 = vld [vmem:[%s5455_s23 + $0x1c0] sm:$0xff] }
  0x72   : > { %1989 = vperm.xlu0 %5202, %v1858_v37   ;;  %v1752_v37 = vld [vmem:[%s5455_s23 + $0x1b8] sm:$0xff]  ;;  %vm1817_vm10 = vcmp.gt.f32.partialorder %v1753_v36, 0.0 }
  0x73   : > { %v5636_v12 = vpop.permute.xlu2 %1902  ;;  %vm1816_vm11 = vcmp.gt.f32.partialorder %v1752_v37, 0.0 }
  0x74   : > { %vm2085_vm9 = vcmp.eq.s32.totalorder %v5636_v12, 1  ;;  %v4857_v12 = vld [vmem:[%s5470_s12 + $0x68] sm:$0xff] }
  0x79   : > { %2004 = vperm.xlu2 %5204, %v1863_v41   ;;  %2001 = vperm.xlu1 %5203, %v1862_v42   ;;  %v1881_v42 = vsel %vm1817_vm10, 1, %v7348_v2 }
  0x7a   : > { %1998 = vperm.xlu0 %5202, %v1861_v44   ;;  %4590 = vmatmul.msk.bf16.gmra.mxu0 %vm734_vm0, %v4850_v43  ;;  %v1880_v43 = vsel %vm1816_vm11, 1, %v7348_v2  ;;  %v4853_v44 = vld [vmem:[%s5470_s12 + $0x48] sm:$0xff] }
  0x7b   : > { %4606 = vmatmul.msk.bf16.gmra.mxu2 %vm734_vm0, %v4866_v45  ;;  %4758 = vmatmul.msk.bf16.gmra.mxu1 %vm734_vm0, %v4818_v46  ;;  %v5656_v27 = vpop.permute.xlu2 %1905 }
  0x7c   : > { %4774 = vmatmul.msk.bf16.gmra.mxu3 %vm734_vm0, %v4834_v47  ;;  %v1879_v47 = vsel %vm1815_vm12, 1, %v7348_v2  ;;  %vm2086_vm10 = vcmp.eq.s32.totalorder %v5656_v27, 1 }
  0x81   : > { %2013 = vperm.xlu2 %5204, %v1866_v51   ;;  %2010 = vperm.xlu1 %5203, %v1865_v52  }
  0x82   : > { %2007 = vperm.xlu0 %5202, %v1864_v53   ;;  %v4837_v53 = vld [vmem:[%s5461_s30 + $0xc8] sm:$0xff] }
  0x83   : > { %v5682_v50 = vpop.permute.xlu2 %1914 }
  0x89   : > { %2022 = vperm.xlu2 %5204, %v1869_v57   ;;  %2019 = vperm.xlu1 %5203, %v1868_v58  }
  0x8a   : > { %2016 = vperm.xlu0 %5202, %v1867_v60   ;;  %4591 = vmatmul.msk.bf16.gmra.mxu0 %vm734_vm0, %v4851_v59  ;;  %v1884_v60 = vsel %vm1820_vm13, 1, %v7348_v2  ;;  %vm2089_vm13 = vcmp.eq.s32.totalorder %v5682_v50, 1 }
  0x8b   : > { %4607 = vmatmul.msk.bf16.gmra.mxu2 %vm734_vm0, %v4867_v61  ;;  %4759 = vmatmul.msk.bf16.gmra.mxu1 %vm734_vm0, %v4819_v62  ;;  %v5625_v4 = vpop.permute.xlu1 %1896  ;;  %v1883_v61 = vsel %vm1819_vm14, 1, %v7348_v2  ;;  %v5712_v8 = vpop.permute.xlu2 %1923 }
  0x8c   : > { %4775 = vmatmul.msk.bf16.gmra.mxu3 %vm734_vm0, %v4835_v63  ;;  %v5670_v39 = vpop.permute.xlu0 %1890  ;;  %vm2083_vm6 = vcmp.eq.s32.totalorder %v5625_v4, 1  ;;  %vm2092_vm15 = vcmp.eq.s32.totalorder %v5712_v8, 1 }
  0x8d   : > { %vm2081_vm4 = vcmp.eq.s32.totalorder %v5670_v39, 1 }
  0x91   : > { %2031 = vperm.xlu2 %5204, %v1872_v5   ;;  %2028 = vperm.xlu1 %5203, %v1871_v6   ;;  %v1759_v5 = vld [vmem:[%s5455_s23 + $0x1f0] sm:$0xff]  ;;  %v1758_v6 = vld [vmem:[%s5455_s23 + $0x1e8] sm:$0xff] }
  0x92   : > { %2025 = vperm.xlu0 %5202, %v1870_v7   ;;  %v1757_v7 = vld [vmem:[%s5455_s23 + $0x1e0] sm:$0xff]  ;;  %vm1823_vm1 = vcmp.gt.f32.partialorder %v1759_v5, 0.0  ;;  %vm1822_vm2 = vcmp.gt.f32.partialorder %v1758_v6, 0.0 }
  0x93   : > { %v5634_v11 = vpop.permute.xlu1 %1899  ;;  %vm1821_vm3 = vcmp.gt.f32.partialorder %v1757_v7, 0.0  ;;  %v5776_v7 = vld [vmem:[%s7346_s6] ss:$0 sm:$0xff] }
  0x94   : > { %v5695_v57 = vpop.permute.xlu0 %1893  ;;  %vm2084_vm7 = vcmp.eq.s32.totalorder %v5634_v11, 1 }
  0x95   : > { %vm2082_vm5 = vcmp.eq.s32.totalorder %v5695_v57, 1 }
  0x97   : > { %v840_v16 = vpop.f32.mrf.mxu0 }
  0x98   : > { %v1277_v20 = vpop.f32.mrf.mxu1 }
  0x99   : > { %v5647_v24 = vadd.f32 %v1277_v20, %v840_v16  ;;  %2040 = vperm.xlu2 %5204, %v1875_v13   ;;  %2037 = vperm.xlu1 %5203, %v1874_v14   ;;  %v1887_v13 = vsel %vm1823_vm1, 1, %v7348_v2  ;;  %v1886_v14 = vsel %vm1822_vm2, 1, %v7348_v2  ;;  %v4822_v20 = vld [vmem:[%s5461_s30 + $0x50] sm:$0xff] }
  0x9a   : > { %2034 = vperm.xlu0 %5202, %v1873_v17   ;;  %4592 = vmatmul.msk.bf16.gmra.mxu0 %vm734_vm0, %v4852_v15  ;;  %v4854_v15 = vld [vmem:[%s5470_s12 + $0x50] sm:$0xff] }
  0x9b   : > { %4608 = vmatmul.msk.bf16.gmra.mxu2 %vm734_vm0, %v4868_v18  ;;  %4760 = vmatmul.msk.bf16.gmra.mxu1 %vm734_vm0, %v4820_v19  ;;  %v5653_v26 = vpop.permute.xlu1 %1911  ;;  %v1885_v18 = vsel %vm1821_vm3, 1, %v7348_v2  ;;  %v4870_v19 = vld [vmem:[%s5470_s12 + $0xd0] sm:$0xff] }
  0x9c   : > { %4776 = vmatmul.msk.bf16.gmra.mxu3 %vm734_vm0, %v4836_v21  ;;  %v5714_v9 = vpop.permute.xlu0 %1908  ;;  %vm2088_vm12 = vcmp.eq.s32.totalorder %v5653_v26, 1 }
  0x9d   : > { %vm2087_vm8 = vcmp.eq.s32.totalorder %v5714_v9, 1 }
  0x9e   : > { %v920_v28 = vpop.f32.mrf.mxu2 }
  0x9f   : > { %v1357_v31 = vpop.f32.mrf.mxu3  ;;  %v5660_v32 = vpop.f32.mrf.mxu0 }
  0xa0   : > { %v5663_v34 = vadd.f32 %v1357_v31, %v920_v28  ;;  %v5665_v35 = vpop.f32.mrf.mxu1  ;;  %v5734_v28 = vpop.permute.xlu2 %1932 }
  0xa1   : > { %2049 = vperm.xlu2 %5204, %v1878_v29   ;;  %2046 = vperm.xlu1 %5203, %v1877_v30   ;;  %v1280_v6 = vadd.f32 %v5665_v35, %v5660_v32  ;;  %vm2095_vm3 = vcmp.eq.s32.totalorder %v5734_v28, 1 }
  0xa2   : > { %2043 = vperm.xlu0 %5202, %v1876_v33  }
  0xa3   : > { %v5672_v40 = vpop.permute.xlu1 %1920  ;;  %v1442_v32 = vadd.f32 %v5776_v7, %v1280_v6 }
  0xa4   : > { %v5739_v33 = vpop.permute.xlu0 %1917  ;;  %vm2091_vm14 = vcmp.eq.s32.totalorder %v5672_v40, 1 }
  0xa5   : > { %vm2090_vm11 = vcmp.eq.s32.totalorder %v5739_v33, 1 }
  0xa6   : > { %v922_v41 = vpop.f32.mrf.mxu2 }
  0xa7   : > { %v1359_v45 = vpop.f32.mrf.mxu3  ;;  %v5677_v46 = vpop.f32.mrf.mxu0 }
  0xa8   : > { %v5684_v51 = vadd.f32 %v1359_v45, %v922_v41  ;;  %v5686_v52 = vpop.f32.mrf.mxu1  ;;  %v5747_v41 = vpop.permute.xlu2 %1941 }
  0xa9   : > { %2058 = vperm.xlu2 %5204, %v1881_v42   ;;  %2055 = vperm.xlu1 %5203, %v1880_v43   ;;  %v4855_v43 = vld [vmem:[%s5470_s12 + $0x58] sm:$0xff] }
  0xaa   : > { %2052 = vperm.xlu0 %5202, %v1879_v47   ;;  %4593 = vmatmul.msk.bf16.gmra.mxu0 %vm734_vm0, %v4853_v44  ;;  %v4871_v47 = vld [vmem:[%s5470_s12 + $0xd8] sm:$0xff] }
  0xab   : > { %4609 = vmatmul.msk.bf16.gmra.mxu2 %vm734_vm0, %v4869_v48  ;;  %4761 = vmatmul.msk.bf16.gmra.mxu1 %vm734_vm0, %v4821_v49  ;;  %v5698_v58 = vpop.permute.xlu1 %1929  ;;  %v4823_v48 = vld [vmem:[%s5461_s30 + $0x58] sm:$0xff] }
  0xac   : > { %4777 = vmatmul.msk.bf16.gmra.mxu3 %vm734_vm0, %v4837_v53  ;;  %v5755_v55 = vpop.permute.xlu0 %1926  ;;  %vm2094_vm2 = vcmp.eq.s32.totalorder %v5698_v58, 1 }
  0xad   : > { %vm2093_vm1 = vcmp.eq.s32.totalorder %v5755_v55, 1 }
  0xae   : > { %v925_v59 = vpop.f32.mrf.mxu2 }
  0xaf   : > { %v1362_v62 = vpop.f32.mrf.mxu3  ;;  %v5702_v63 = vpop.f32.mrf.mxu0 }
  0xb0   : > { %v5705_v1 = vadd.f32 %v1362_v62, %v925_v59  ;;  %v5707_v3 = vpop.f32.mrf.mxu1  ;;  %v5765_v62 = vpop.permute.xlu2 %1950 }
  0xb1   : > { %2067 = vperm.xlu2 %5204, %v1884_v60   ;;  %2064 = vperm.xlu1 %5203, %v1883_v61   ;;  %v1285_v6 = vadd.f32 %v5707_v3, %v5702_v63 }
  0xb2   : > { %2061 = vperm.xlu0 %5202, %v1882_v0  }
  0xb3   : > { %v5724_v21 = vpop.permute.xlu1 %1938  ;;  %v1444_v4 = vadd.f32 %v5776_v7, %v1285_v6  ;;  %v5013_v6 = vld [vmem:[%s5787_s17 + $0x10] sm:$0xff]  }
  0xb6   : > { %v927_v10 = vpop.f32.mrf.mxu2 }
  0xb7   : > { %v1364_v16 = vpop.f32.mrf.mxu3  ;;  %v5719_v17 = vpop.f32.mrf.mxu0 }
  0xb8   : > { %v5726_v22 = vadd.f32 %v1364_v16, %v927_v10  ;;  %v5728_v23 = vpop.f32.mrf.mxu1  ;;  %v427_v10 = vld [vmem:[%s5461_s30 + $0x4] sm:$0xff]  }
  0xb9   : > { %2076 = vperm.xlu2 %5204, %v1887_v13   ;;  %2073 = vperm.xlu1 %5203, %v1886_v14   ;;  %v1283_v13 = vadd.f32 %v5686_v52, %v5677_v46  ;;  %v5781_v14 = vpop.permute.xlu0 %1935  ;;  %v1441_v46 = vadd.f32 %v5776_v7, %v5647_v24  ;;  %v1288_v63 = vadd.f32 %v5728_v23, %v5719_v17 }
  0xba   : > { %2070 = vperm.xlu0 %5202, %v1885_v18   ;;  %4594 = vmatmul.msk.bf16.gmra.mxu0 %vm734_vm0, %v4854_v15  ;;  %v426_v15 = vld [vmem:[%s5461_s30] sm:$0xf] }
  0xbb   : > { %4610 = vmatmul.msk.bf16.gmra.mxu2 %vm734_vm0, %v4870_v19  ;;  %4762 = vmatmul.msk.bf16.gmra.mxu1 %vm734_vm0, %v4822_v20  ;;  %v5745_v38 = vpop.permute.xlu1 %1947  ;;  %v4856_v18 = vld [vmem:[%s5470_s12 + $0x60] sm:$0xff]  ;;  %v1506_v19 = vunpack.c.l.bf16 %v427_v10 }
  0xbc   : > { %4778 = vmatmul.msk.bf16.gmra.mxu3 %vm734_vm0, %v4838_v25  ;;  %v4872_v25 = vld [vmem:[%s5470_s12 + $0xe0] sm:$0xff] }
  0xbe   : > { %v930_v29 = vpop.f32.mrf.mxu2 }
  0xbf   : > { %v1367_v30 = vpop.f32.mrf.mxu3  ;;  %v5737_v31 = vpop.f32.mrf.mxu0 }
  0xc0   : > { %v5741_v36 = vadd.f32 %v1367_v30, %v930_v29  ;;  %v5743_v37 = vpop.f32.mrf.mxu1  ;;  %v4824_v29 = vld [vmem:[%s5461_s30 + $0x60] sm:$0xff] }
  0xc1   : > { %v4885_v30 = vld [vmem:[%s5787_s17] sm:$0xff]   ;;  %v1290_v11 = vadd.f32 %v5743_v37, %v5737_v31 }
  0xc2   : > { %v4887_v24 = vunpack.c.h.bf16 %v4885_v30 }
  0xc3   : > { %v5760_v56 = vpop.permute.xlu1 %1956 }
  0xc6   : > { %v932_v42 = vpop.f32.mrf.mxu2 }
  0xc7   : > { %v1369_v44 = vpop.f32.mrf.mxu3  ;;  %v855_v45 = vpop.f32.mrf.mxu0 }
  0xc8   : > { %v5752_v49 = vadd.f32 %v1369_v44, %v932_v42  ;;  %v1292_v53 = vpop.f32.mrf.mxu1  ;;  %v1505_v42 = vunpack.c.l.bf16 %v426_v15  ;;  %v4886_v15 = vunpack.c.l.bf16 %v4885_v30 }
  0xca   : > { %4595 = vmatmul.msk.bf16.gmra.mxu0 %vm734_vm0, %v4855_v43  ;;  %v1443_v43 = vadd.f32 %v5776_v7, %v1283_v13  ;;  %v2146_v13 = vsel %vm2082_vm5, %v1442_v32, %v1506_v19  ;;  %v2145_v57 = vsel %vm2081_vm4, %v1441_v46, %v1505_v42  ;;  %v5825_v32 = vld [vmem:[%s5461_s30 + $0x18] sm:$0xff]   ;;  %vm2096_vm4 = vcmp.eq.s32.totalorder %v5781_v14, 1 }
  0xcb   : > { %4611 = vmatmul.msk.bf16.gmra.mxu2 %vm734_vm0, %v4871_v47  ;;  %4763 = vmatmul.msk.bf16.gmra.mxu1 %vm734_vm0, %v4823_v48  ;;  %v5791_v35 = vpop.permute.xlu1 %1965  ;;  %v4840_v48 = vld [vmem:[%s5461_s30 + $0xe0] sm:$0xff]  ;;  %v2210_v3 = vmul.f32 %v4887_v24, %v2146_v13  ;;  %v1511_v42 = vunpack.c.l.bf16 %v5825_v32  ;;  %vm2097_vm5 = vcmp.eq.s32.totalorder %v5724_v21, 1 }
  0xcc   : > { %4779 = vmatmul.msk.bf16.gmra.mxu3 %vm734_vm0, %v4839_v54  ;;  %v1507_v54 = vunpack.c.h.bf16 %v427_v10 }
  0xce   : > { %v935_v59 = vpop.f32.mrf.mxu2  ;;  %v2147_v2 = vsel %vm2083_vm6, %v1443_v43, %v1507_v54  ;;  %v5838_v43 = vld [vmem:[%s5787_s17 + $0x18] sm:$0xff]   ;;  %v2276_v54 = vsel %vm734_vm0, %v2210_v3, 0.0  ;;  %vm2098_vm6 = vcmp.eq.s32.totalorder %v5747_v41, 1 }
  0xcf   : > { %v1372_v60 = vpop.f32.mrf.mxu3  ;;  %v5763_v61 = vpop.f32.mrf.mxu0 }
  0xd0   : > { %v5767_v0 = vadd.f32 %v1372_v60, %v935_v59  ;;  %v5769_v5 = vpop.f32.mrf.mxu1  ;;  %v5012_v59 = vld [vmem:[%s5787_s17 + $0x8] sm:$0xff]   ;;  %v5810_v60 = vpop.permute.xlu2 %1959 }
  0xd1   : > { %v4890_v10 = vunpack.c.l.bf16 %v5012_v59  ;;  %v4891_v24 = vunpack.c.h.bf16 %v5012_v59  ;;  %v1295_v9 = vadd.f32 %v5769_v5, %v5763_v61 }
  0xd3   : > { %v5832_v17 = vpop.permute.xlu1 %1974 }
  0xd6   : > { %v937_v16 = vpop.f32.mrf.mxu2 }
  0xd7   : > { %v1374_v52 = vpop.f32.mrf.mxu3  ;;  %v5796_v20 = vpop.f32.mrf.mxu0 }
  0xd8   : > { %v5803_v44 = vadd.f32 %v1374_v52, %v937_v16  ;;  %v5805_v47 = vpop.f32.mrf.mxu1  ;;  %v429_v16 = vld [vmem:[%s5461_s30 + $0xc] sm:$0xff]   ;;  %v1293_v52 = vadd.f32 %v1292_v53, %v855_v45  ;;  %v2211_v53 = vmul.f32 %v4890_v10, %v2147_v2  ;;  %v5851_v59 = vpop.permute.xlu2 %1968 }
  0xd9   : > { %v1508_v39 = vunpack.c.l.bf16 %v429_v16  ;;  %v1509_v2 = vunpack.c.h.bf16 %v429_v16  ;;  %v4894_v16 = vunpack.c.l.bf16 %v5013_v6 }
  0xda   : > { %4596 = vmatmul.msk.bf16.gmra.mxu0 %vm734_vm0, %v4856_v18  ;;  %v5828_v18 = vpop.permute.xlu0 %1944  ;;  %v2279_v10 = vsel %vm734_vm0, %v2211_v53, 0.0  ;;  %v4873_v53 = vld [vmem:[%s5470_s12 + $0xe8] sm:$0xff] }
  0xdb   : > { %4612 = vmatmul.msk.bf16.gmra.mxu2 %vm734_vm0, %v4872_v25  ;;  %4764 = vmatmul.msk.bf16.gmra.mxu1 %vm734_vm0, %v4824_v29  ;;  %v2209_v25 = vmul.f32 %v4886_v15, %v2145_v57  ;;  %v1447_v29 = vadd.f32 %v5776_v7, %v1293_v52  ;;  %v2148_v15 = vsel %vm2084_vm7, %v1444_v4, %v1508_v39  ;;  %v4898_v57 = vunpack.c.l.bf16 %v5838_v43  ;;  %v431_v52 = vld [vmem:[%s5461_s30 + $0x14] sm:$0xf]  ;;  %v5856_v4 = vld [vmem:[%s5461_s30 + $0x24] sm:$0xff]  }
  0xdc   : > { %4780 = vmatmul.msk.bf16.gmra.mxu3 %vm734_vm0, %v4840_v48  ;;  %v1445_v48 = vadd.f32 %v5776_v7, %v1288_v63  ;;  %v2212_v63 = vmul.f32 %v4891_v24, %v2148_v15  ;;  %v1510_v39 = vunpack.c.l.bf16 %v431_v52  ;;  %v4895_v15 = vunpack.c.h.bf16 %v5013_v6  ;;  %v5875_v52 = vpop.permute.xlu1 %1983 }
  0xdd   : > { %v2273_v13 = vsel %vm734_vm0, %v2209_v25, 0.0  ;;  %v2151_v37 = vsel %vm2087_vm8, %v1447_v29, %v1511_v42  ;;  %v4825_v29 = vld [vmem:[%s5461_s30 + $0x68] sm:$0xff]  ;;  %vm2099_vm7 = vcmp.eq.s32.totalorder %v5828_v18, 1  ;;  %vm2100_vm8 = vcmp.eq.s32.totalorder %v5745_v38, 1 }
  0xde   : > { %v940_v19 = vpop.f32.mrf.mxu2  ;;  %v2149_v3 = vsel %vm2085_vm9, %v1445_v48, %v1509_v2  ;;  %v1514_v2 = vunpack.c.l.bf16 %v5856_v4  ;;  %vm2101_vm9 = vcmp.eq.s32.totalorder %v5765_v62, 1 }
  0xdf   : > { %v1377_v46 = vpop.f32.mrf.mxu3  ;;  %v862_v45 = vpop.f32.mrf.mxu0  ;;  %v2213_v24 = vmul.f32 %v4894_v16, %v2149_v3  ;;  %v434_v16 = vld [vmem:[%s5461_s30 + $0x20] sm:$0xf] }
  0xe0   : > { %v5834_v23 = vadd.f32 %v1377_v46, %v940_v19  ;;  %v1299_v30 = vpop.f32.mrf.mxu1  ;;  %v1446_v19 = vadd.f32 %v5776_v7, %v1290_v11  ;;  %v1448_v11 = vadd.f32 %v5776_v7, %v1295_v9  ;;  %v5890_v3 = vpop.permute.xlu2 %1977 }
  0xe1   : > { %v1300_v31 = vadd.f32 %v1299_v30, %v862_v45  ;;  %v2215_v30 = vmul.f32 %v4898_v57, %v2151_v37  ;;  %v1298_v57 = vadd.f32 %v5805_v47, %v5796_v20  ;;  %v5015_v37 = vld [vmem:[%s5787_s17 + $0x20] sm:$0xff]   ;;  %v2285_v20 = vsel %vm734_vm0, %v2213_v24, 0.0 }
  0xe2   : > { %7353 = vst [vmem:[#allocation3_spill] sm:$0xff] %v5834_v23  ;;  %2277 = vadd.xlane.f32.xlu2 %v2276_v54  ;;  %v5863_v42 = vpop.permute.xlu0 %1953  ;;  %v4841_v54 = vld [vmem:[%s5461_s30 + $0xe8] sm:$0xff]  ;;  %v4903_v6 = vunpack.c.h.bf16 %v5015_v37  ;;  %v4899_v47 = vunpack.c.h.bf16 %v5838_v43 }
  0xe3   : > { %2274 = vadd.xlane.f32.xlu1 %v2273_v13  ;;  %v1450_v61 = vadd.f32 %v5776_v7, %v1300_v31  ;;  %v2282_v13 = vsel %vm734_vm0, %v2212_v63, 0.0  ;;  %v2150_v31 = vsel %vm2086_vm10, %v1446_v19, %v1510_v39  ;;  %v1449_v19 = vadd.f32 %v5776_v7, %v1298_v57 }
  0xe4   : > { %2280 = vadd.xlane.f32.xlu0 %v2279_v10  ;;  %v1512_v10 = vunpack.c.h.bf16 %v5825_v32  ;;  %v2291_v32 = vsel %vm734_vm0, %v2215_v30, 0.0  ;;  %v2214_v33 = vmul.f32 %v4895_v15, %v2150_v31  ;;  %v5905_v15 = vpop.permute.xlu1 %1992  ;;  %vm2102_vm10 = vcmp.eq.s32.totalorder %v5863_v42, 1 }
  0xe5   : > { %v2154_v27 = vsel %vm2090_vm11, %v1450_v61, %v1514_v2  ;;  %v4902_v61 = vunpack.c.l.bf16 %v5015_v37  ;;  %vm2103_vm11 = vcmp.eq.s32.totalorder %v5760_v56, 1 }
  0xe6   : > { %v942_v25 = vpop.f32.mrf.mxu2  ;;  %v2152_v63 = vsel %vm2088_vm12, %v1448_v11, %v1512_v10  ;;  %v2288_v30 = vsel %vm734_vm0, %v2214_v33, 0.0  ;;  %v5017_v33 = vld [vmem:[%s5787_s17 + $0x30] sm:$0xff]   ;;  %vm2104_vm12 = vcmp.eq.s32.totalorder %v5810_v60, 1 }
  0xe7   : > { %v1379_v46 = vpop.f32.mrf.mxu3  ;;  %v865_v45 = vpop.f32.mrf.mxu0 }
  0xe8   : > { %v5866_v5 = vadd.f32 %v1379_v46, %v942_v25  ;;  %v1302_v48 = vpop.f32.mrf.mxu1  ;;  %v2218_v46 = vmul.f32 %v4903_v6, %v2154_v27  ;;  %v4858_v6 = vld [vmem:[%s5470_s12 + $0x70] sm:$0xff] }
  0xe9   : > { %v1303_v9 = vadd.f32 %v1302_v48, %v865_v45  ;;  %v2216_v45 = vmul.f32 %v4899_v47, %v2152_v63  ;;  %v1515_v48 = vunpack.c.h.bf16 %v5856_v4  ;;  %v4874_v47 = vld [vmem:[%s5470_s12 + $0xf0] sm:$0xff]  ;;  %v5915_v63 = vpop.permute.xlu2 %1986 }
  0xea   : > { %4597 = vmatmul.msk.bf16.gmra.mxu0 %vm734_vm0, %v4857_v12  ;;  %2283 = vadd.xlane.f32.xlu2 %v2282_v13  ;;  %v1513_v12 = vunpack.c.l.bf16 %v434_v16  ;;  %v5900_v24 = vpop.permute.xlu0 %1962  ;;  %v2300_v50 = vsel %vm734_vm0, %v2218_v46, 0.0  ;;  %v437_v13 = vld [vmem:[%s5461_s30 + $0x2c] sm:$0xf]  ;;  %v438_v16 = vld [vmem:[%s5461_s30 + $0x30] sm:$0xff]  }
  0xeb   : > { %4613 = vmatmul.msk.bf16.gmra.mxu2 %vm734_vm0, %v4873_v53  ;;  %4765 = vmatmul.msk.bf16.gmra.mxu1 %vm734_vm0, %v4825_v29  ;;  %v1451_v29 = vadd.f32 %v5776_v7, %v1303_v9  ;;  %v2294_v4 = vsel %vm734_vm0, %v2216_v45, 0.0  ;;  %v4826_v9 = vld [vmem:[%s5461_s30 + $0x70] sm:$0xff] }
  0xec   : > { %4781 = vmatmul.msk.bf16.gmra.mxu3 %vm734_vm0, %v4841_v54  ;;  %2292 = vadd.xlane.f32.xlu0 %v2291_v32  ;;  %v5016_v54 = vld [vmem:[%s5787_s17 + $0x28] sm:$0xff]   ;;  %v2153_v11 = vsel %vm2089_vm13, %v1449_v19, %v1513_v12  ;;  %v4842_v12 = vld [vmem:[%s5461_s30 + $0xf0] sm:$0xff]  ;;  %vm2105_vm13 = vcmp.eq.s32.totalorder %v5900_v24, 1 }
  0xed   : > { %2286 = vadd.xlane.f32.xlu1 %v2285_v20  ;;  %v4906_v10 = vunpack.c.l.bf16 %v5016_v54  ;;  %v2217_v57 = vmul.f32 %v4902_v61, %v2153_v11  ;;  %v2155_v31 = vsel %vm2091_vm14, %v1451_v29, %v1515_v48  ;;  %v1516_v20 = vunpack.c.l.bf16 %v437_v13  ;;  %v5930_v11 = vpop.permute.xlu1 %2001 }
  0xee   : > { %v945_v25 = vpop.f32.mrf.mxu2  ;;  %v4907_v45 = vunpack.c.h.bf16 %v5016_v54  ;;  %v4910_v29 = vunpack.c.l.bf16 %v5017_v33  ;;  %vm2106_vm14 = vcmp.eq.s32.totalorder %v5791_v35, 1 }
  0xef   : > { %v1382_v26 = vpop.f32.mrf.mxu3  ;;  %v867_v39 = vpop.f32.mrf.mxu0  ;;  %v2297_v46 = vsel %vm734_vm0, %v2217_v57, 0.0 }
  0xf0   : > { %v5894_v53 = vadd.f32 %v1382_v26, %v945_v25  ;;  %v1304_v43 = vpop.f32.mrf.mxu1  ;;  %v2219_v26 = vmul.f32 %v4906_v10, %v2155_v31 }
  0xf1   : > { %v1305_v2 = vadd.f32 %v1304_v43, %v867_v39  ;;  %v1517_v43 = vunpack.c.l.bf16 %v438_v16 }
  0xf2   : > { %7354 = vst [vmem:[#allocation4_spill] sm:$0xff] %v5894_v53  ;;  %2289 = vadd.xlane.f32.xlu2 %v2288_v30  ;;  %v5926_v8 = vpop.permute.xlu0 %1971  ;;  %v2303_v48 = vsel %vm734_vm0, %v2219_v26, 0.0  ;;  %v4859_v26 = vld [vmem:[%s5470_s12 + $0x78] sm:$0xff] }
  0xf3   : > { %v1452_v37 = vadd.f32 %v5776_v7, %v1305_v2 }
  0xf4   : > { %2301 = vadd.xlane.f32.xlu0 %v2300_v50 }
  0xf5   : > { %2295 = vadd.xlane.f32.xlu1 %v2294_v4  ;;  %v2156_v30 = vsel %vm2092_vm15, %v1452_v37, %v1516_v20  ;;  %v5936_v20 = vpop.permute.xlu2 %1995 }
  0xf6   : > { %v947_v32 = vpop.f32.mrf.mxu2  ;;  %v2220_v2 = vmul.f32 %v4907_v45, %v2156_v30  ;;  %v4827_v45 = vld [vmem:[%s5461_s30 + $0x78] sm:$0xff]  ;;  %v5947_v30 = vpop.permute.xlu1 %2010 }
  0xf7   : > { %v1384_v27 = vpop.f32.mrf.mxu3  ;;  %v870_v40 = vpop.f32.mrf.mxu0  ;;  %7356 = vst [vmem:[#allocation6_spill] sm:$0xff] %v5947_v30 }
  0xf8   : > { %v5917_v19 = vadd.f32 %v1384_v27, %v947_v32  ;;  %v1307_v25 = vpop.f32.mrf.mxu1  ;;  %v2306_v32 = vsel %vm734_vm0, %v2220_v2, 0.0  ;;  %v4911_v27 = vunpack.c.h.bf16 %v5017_v33 }
  0xf9   : > { %v1308_v39 = vadd.f32 %v1307_v25, %v870_v40 }
  0xfa   : > { %7355 = vst [vmem:[#allocation5_spill] sm:$0xff] %v5917_v19  ;;  %4598 = vmatmul.msk.bf16.gmra.mxu0 %vm734_vm0, %v4858_v6  ;;  %2298 = vadd.xlane.f32.xlu2 %v2297_v46  ;;  %v1518_v6 = vunpack.c.h.bf16 %v438_v16  ;;  %v4875_v16 = vld [vmem:[%s5470_s12 + $0xf8] sm:$0xff]  ;;  %v446_v19 = vld [vmem:[%s5461_s30 + $0x50] sm:$0xff]  }
  0xfb   : > { %v1453_v61 = vadd.f32 %v5776_v7, %v1308_v39  ;;  %4614 = vmatmul.msk.bf16.gmra.mxu2 %vm734_vm0, %v4874_v47  ;;  %4766 = vmatmul.msk.bf16.gmra.mxu1 %vm734_vm0, %v4826_v9  ;;  %v5940_v9 = vpop.permute.xlu0 %1980  ;;  %v440_v39 = vld [vmem:[%s5461_s30 + $0x38] sm:$0xff]  }
  0xfc   : > { %4782 = vmatmul.msk.bf16.gmra.mxu3 %vm734_vm0, %v4842_v12  ;;  %v1519_v2 = vunpack.c.l.bf16 %v440_v39  ;;  %v1520_v28 = vunpack.c.h.bf16 %v440_v39 }
  0xfd   : > { %2304 = vadd.xlane.f32.xlu1 %v2303_v48  ;;  %v2157_v54 = vsel %vm2093_vm1, %v1453_v61, %v1517_v43  ;;  %v4843_v48 = vld [vmem:[%s5461_s30 + $0xf8] sm:$0xff] }
  0xfe   : > { %v950_v50 = vpop.f32.mrf.mxu2  ;;  %v2221_v13 = vmul.f32 %v4910_v29, %v2157_v54  ;;  %v5018_v29 = vld [vmem:[%s5787_s17 + $0x38] sm:$0xff]  }
  0xff   : > { %v1387_v4 = vpop.f32.mrf.mxu3  ;;  %v872_v10 = vpop.f32.mrf.mxu0 }
 0x100   : > { %v5932_v57 = vadd.f32 %v1387_v4, %v950_v50  ;;  %v1309_v31 = vpop.f32.mrf.mxu1  ;;  %v2309_v55 = vsel %vm734_vm0, %v2221_v13, 0.0  ;;  %v4914_v50 = vunpack.c.l.bf16 %v5018_v29  ;;  %v5958_v4 = vpop.permute.xlu2 %2004 }
 0x101   : > { %v1310_v37 = vadd.f32 %v1309_v31, %v872_v10  ;;  %2310 = vadd.xlane.f32.xlu0 %v2309_v55 }
 0x102   : > { %2307 = vadd.xlane.f32.xlu2 %v2306_v32 }
 0x103   : > { %v1454_v40 = vadd.f32 %v5776_v7, %v1310_v37 }
 0x105   : > { %v2158_v47 = vsel %vm2094_vm2, %v1454_v40, %v1518_v6  ;;  %v5961_v6 = vpop.permute.xlu0 %1989 }
 0x106   : > { %v952_v25 = vpop.f32.mrf.mxu2  ;;  %v2222_v12 = vmul.f32 %v4911_v27, %v2158_v47 }
 0x107   : > { %v1389_v46 = vpop.f32.mrf.mxu3  ;;  %v875_v43 = vpop.f32.mrf.mxu0 }
 0x108   : > { %v5949_v33 = vadd.f32 %v1389_v46, %v952_v25  ;;  %v1312_v61 = vpop.f32.mrf.mxu1  ;;  %v2312_v58 = vsel %vm734_vm0, %v2222_v12, 0.0  ;;  %v5966_v12 = vpop.permute.xlu1 %2019 }
 0x109   : > { %v1313_v54 = vadd.f32 %v1312_v61, %v875_v43  ;;  %2313 = vadd.xlane.f32.xlu1 %v2312_v58  ;;  %7357 = vst [vmem:[#allocation7_spill] sm:$0xff] %v5966_v12  ;;  %v442_v58 = vld [vmem:[%s5461_s30 + $0x40] sm:$0xff]  }
 0x10a   : > { %4599 = vmatmul.msk.bf16.gmra.mxu0 %vm734_vm0, %v4859_v26  ;;  %v4915_v26 = vunpack.c.h.bf16 %v5018_v29  ;;  %v1521_v29 = vunpack.c.l.bf16 %v442_v58 }
 0x10b   : > { %v1455_v13 = vadd.f32 %v5776_v7, %v1313_v54  ;;  %4615 = vmatmul.msk.bf16.gmra.mxu2 %vm734_vm0, %v4875_v16  ;;  %4767 = vmatmul.msk.bf16.gmra.mxu1 %vm734_vm0, %v4827_v45  ;;  %v5970_v16 = vpop.permute.xlu2 %2013 }
 0x10c   : > { %4783 = vmatmul.msk.bf16.gmra.mxu3 %vm734_vm0, %v4843_v48 }
 0x10d   : > { %v2159_v10 = vsel %vm2095_vm3, %v1455_v13, %v1519_v2  ;;  %v5019_v2 = vld [vmem:[%s5787_s17 + $0x40] sm:$0xff]   ;;  %vm2107_vm3 = vcmp.eq.s32.totalorder %v5851_v59, 1 }
 0x10e   : > { %v955_v31 = vpop.f32.mrf.mxu2  ;;  %v2223_v55 = vmul.f32 %v4914_v50, %v2159_v10  ;;  %v4918_v14 = vunpack.c.l.bf16 %v5019_v2  ;;  %v4919_v21 = vunpack.c.h.bf16 %v5019_v2 }
 0x10f   : > { %v1392_v37 = vpop.f32.mrf.mxu3  ;;  %v877_v32 = vpop.f32.mrf.mxu0 }
 0x110   : > { %v5963_v27 = vadd.f32 %v1392_v37, %v955_v31  ;;  %v1314_v40 = vpop.f32.mrf.mxu1  ;;  %v2315_v47 = vsel %vm734_vm0, %v2223_v55, 0.0  ;;  %v5977_v31 = vpop.permute.xlu0 %1998 }
 0x111   : > { %v1315_v25 = vadd.f32 %v1314_v40, %v877_v32  ;;  %2316 = vadd.xlane.f32.xlu2 %v2315_v47  ;;  %v5981_v37 = vpop.permute.xlu1 %2028 }
 0x112   : > { %v1487_v35 = vadd.f32 %v5776_v7, %v5963_v27  ;;  %vm2127_vm2 = vcmp.eq.s32.totalorder %v5981_v37, 1 }
 0x113   : > { %v1456_v46 = vadd.f32 %v5776_v7, %v1315_v25 }
 0x115   : > { %v2160_v43 = vsel %vm2096_vm4, %v1456_v46, %v1520_v28 }
 0x116   : > { %v957_v45 = vpop.f32.mrf.mxu2  ;;  %v2224_v61 = vmul.f32 %v4915_v26, %v2160_v43  ;;  %v5983_v26 = vpop.permute.xlu2 %2022 }
 0x117   : > { %v1394_v48 = vpop.f32.mrf.mxu3  ;;  %v880_v54 = vpop.f32.mrf.mxu0 }
 0x118   : > { %v5974_v50 = vadd.f32 %v1394_v48, %v957_v45  ;;  %v1317_v13 = vpop.f32.mrf.mxu1  ;;  %v2318_v39 = vsel %vm734_vm0, %v2224_v61, 0.0  ;;  %v1522_v48 = vunpack.c.h.bf16 %v442_v58 }
 0x119   : > { %v1318_v10 = vadd.f32 %v1317_v13, %v880_v54  ;;  %2319 = vadd.xlane.f32.xlu0 %v2318_v39  ;;  %v5990_v13 = vpop.permute.xlu0 %2007 }
 0x11b   : > { %v1457_v55 = vadd.f32 %v5776_v7, %v1318_v10  ;;  %v5992_v10 = vpop.permute.xlu1 %2037 }
 0x11d   : > { %v2161_v32 = vsel %vm2097_vm5, %v1457_v55, %v1521_v29  ;;  %v444_v55 = vld [vmem:[%s5461_s30 + $0x48] sm:$0xff]   ;;  %vm2130_vm5 = vcmp.eq.s32.totalorder %v5992_v10, 1 }
 0x11e   : > { %v960_v40 = vpop.f32.mrf.mxu2  ;;  %v2225_v47 = vmul.f32 %v4918_v14, %v2161_v32  ;;  %v5999_v41 = vpop.permute.xlu2 %2031 }
 0x11f   : > { %v1397_v25 = vpop.f32.mrf.mxu3  ;;  %v882_v28 = vpop.f32.mrf.mxu0  ;;  %vm2128_vm1 = vcmp.eq.s32.totalorder %v5999_v41, 1 }
 0x120   : > { %v5985_v46 = vadd.f32 %v1397_v25, %v960_v40  ;;  %v1319_v43 = vpop.f32.mrf.mxu1  ;;  %v2321_v45 = vsel %vm734_vm0, %v2225_v47, 0.0  ;;  %v5020_v25 = vld [vmem:[%s5787_s17 + $0x48] sm:$0xff]  }
 0x121   : > { %v1320_v61 = vadd.f32 %v1319_v43, %v882_v28  ;;  %2322 = vadd.xlane.f32.xlu1 %v2321_v45  ;;  %v1523_v43 = vunpack.c.l.bf16 %v444_v55  ;;  %v4922_v45 = vunpack.c.l.bf16 %v5020_v25  ;;  %v4923_v18 = vunpack.c.h.bf16 %v5020_v25 }
 0x123   : > { %v1458_v54 = vadd.f32 %v5776_v7, %v1320_v61 }
 0x125   : > { %v2162_v39 = vsel %vm2098_vm6, %v1458_v54, %v1522_v48  ;;  %vm2108_vm6 = vcmp.eq.s32.totalorder %v5926_v8, 1 }
 0x126   : > { %v962_v29 = vpop.f32.mrf.mxu2  ;;  %v2226_v14 = vmul.f32 %v4919_v21, %v2162_v39  ;;  %v6003_v21 = vpop.permute.xlu0 %2016 }
 0x127   : > { %v1399_v32 = vpop.f32.mrf.mxu3  ;;  %v885_v40 = vpop.f32.mrf.mxu0  ;;  %7358 = vst [vmem:[#allocation8_spill] sm:$0xff] %v6003_v21 }
 0x128   : > { %v5996_v47 = vadd.f32 %v1399_v32, %v962_v29  ;;  %v1322_v28 = vpop.f32.mrf.mxu1  ;;  %v2324_v58 = vsel %vm734_vm0, %v2226_v14, 0.0  ;;  %v6009_v32 = vpop.permute.xlu1 %2046 }
 0x129   : > { %v1323_v2 = vadd.f32 %v1322_v28, %v885_v40  ;;  %2325 = vadd.xlane.f32.xlu2 %v2324_v58 }
 0x12b   : > { %v1459_v61 = vadd.f32 %v5776_v7, %v1323_v2  ;;  %v1524_v2 = vunpack.c.h.bf16 %v444_v55 }
 0x12d   : > { %v2163_v48 = vsel %vm2099_vm7, %v1459_v61, %v1523_v43  ;;  %v6014_v61 = vpop.permute.xlu2 %2040 }
 0x12e   : > { %v6005_v54 = vpop.f32.mrf.mxu2  ;;  %v2227_v39 = vmul.f32 %v4922_v45, %v2163_v48  ;;  %7361 = vst [vmem:[#allocation11_spill] sm:$0xff] %v6014_v61  ;;  %v6021_v55 = vpop.permute.xlu0 %2025 }
 0x12f   : > { %7359 = vst [vmem:[#allocation9_spill] sm:$0xff] %v6005_v54  ;;  %v6007_v29 = vpop.f32.mrf.mxu3  ;;  %v887_v14 = vpop.f32.mrf.mxu0  ;;  %vm2126_vm15 = vcmp.eq.s32.totalorder %v6021_v55, 1  ;;  %v1488_v55 = vadd.f32 %v5776_v7, %v5974_v50 }
 0x130   : > { %7360 = vst [vmem:[#allocation10_spill] sm:$0xff] %v6007_v29  ;;  %v1324_v40 = vpop.f32.mrf.mxu1  ;;  %v2327_v28 = vsel %vm734_vm0, %v2227_v39, 0.0  ;;  %v5021_v29 = vld [vmem:[%s5787_s17 + $0x50] sm:$0xff]   ;;  %v6023_v38 = vpop.permute.xlu1 %2055 }
 0x131   : > { %v1325_v58 = vadd.f32 %v1324_v40, %v887_v14  ;;  %2328 = vadd.xlane.f32.xlu0 %v2327_v28  ;;  %v1525_v40 = vunpack.c.l.bf16 %v446_v19  ;;  %7362 = vst [vmem:[#allocation12_spill] sm:$0xff] %v6023_v38  ;;  %v4926_v28 = vunpack.c.l.bf16 %v5021_v29  ;;  %v1526_v38 = vunpack.c.h.bf16 %v446_v19 }
 0x133   : > { %v1460_v43 = vadd.f32 %v5776_v7, %v1325_v58 }
 0x135   : > { %v2164_v45 = vsel %vm2100_vm8, %v1460_v43, %v1524_v2  ;;  %vm2109_vm8 = vcmp.eq.s32.totalorder %v5832_v17, 1 }
 0x136   : > { %v967_v48 = vpop.f32.mrf.mxu2  ;;  %v2228_v12 = vmul.f32 %v4923_v18, %v2164_v45  ;;  %v6027_v18 = vpop.permute.xlu2 %2049 }
 0x137   : > { %v1404_v30 = vpop.f32.mrf.mxu3  ;;  %v890_v23 = vpop.f32.mrf.mxu0  ;;  %7363 = vst [vmem:[#allocation13_spill] sm:$0xff] %v6027_v18 }
 0x138   : > { %v6018_v54 = vadd.f32 %v1404_v30, %v967_v48  ;;  %v1327_v39 = vpop.f32.mrf.mxu1  ;;  %v2330_v14 = vsel %vm734_vm0, %v2228_v12, 0.0  ;;  %v6032_v61 = vpop.permute.xlu0 %2034 }
 0x139   : > { %v1328_v25 = vadd.f32 %v1327_v39, %v890_v23  ;;  %2331 = vadd.xlane.f32.xlu1 %v2330_v14  ;;  %vm2129_vm4 = vcmp.eq.s32.totalorder %v6032_v61, 1 }
 0x13b   : > { %v1461_v58 = vadd.f32 %v5776_v7, %v1328_v25  ;;  %v4927_v25 = vunpack.c.h.bf16 %v5021_v29 }
 0x13d   : > { %v2165_v2 = vsel %vm2101_vm9, %v1461_v58, %v1525_v40  ;;  %v6036_v40 = vpop.permute.xlu1 %2064  ;;  %vm2133_vm9 = vcmp.eq.s32.totalorder %v6009_v32, 1 }
 0x13e   : > { %v970_v30 = vpop.f32.mrf.mxu2  ;;  %v2229_v43 = vmul.f32 %v4926_v28, %v2165_v2  ;;  %7364 = vst [vmem:[#allocation14_spill] sm:$0xff] %v6036_v40  ;;  %v448_v2 = vld [vmem:[%s5461_s30 + $0x58] sm:$0xff]   ;;  %v6040_v18 = vpop.permute.xlu2 %2058 }
 0x13f   : > { %v1407_v45 = vpop.f32.mrf.mxu3  ;;  %v892_v12 = vpop.f32.mrf.mxu0  ;;  %7365 = vst [vmem:[#allocation15_spill] sm:$0xff] %v6040_v18  ;;  %v1527_v29 = vunpack.c.l.bf16 %v448_v2 }
 0x140   : > { %v6029_v48 = vadd.f32 %v1407_v45, %v970_v30  ;;  %v1329_v23 = vpop.f32.mrf.mxu1  ;;  %v2333_v39 = vsel %vm734_vm0, %v2229_v43, 0.0  ;;  %v5022_v45 = vld [vmem:[%s5787_s17 + $0x58] sm:$0xff]   ;;  %v6045_v42 = vpop.permute.xlu0 %2043 }
 0x141   : > { %v1330_v14 = vadd.f32 %v1329_v23, %v892_v12  ;;  %2334 = vadd.xlane.f32.xlu2 %v2333_v39  ;;  %v4930_v23 = vunpack.c.l.bf16 %v5022_v45  ;;  %vm2132_vm7 = vcmp.eq.s32.totalorder %v6045_v42, 1 }
 0x143   : > { %v1462_v62 = vadd.f32 %v5776_v7, %v1330_v14 }
 0x145   : > { %v2166_v28 = vsel %vm2102_vm10, %v1462_v62, %v1526_v38  ;;  %v6047_v14 = vpop.permute.xlu1 %2073  ;;  %vm2110_vm10 = vcmp.eq.s32.totalorder %v5890_v3, 1 }
 0x146   : > { %v2230_v58 = vmul.f32 %v4927_v25, %v2166_v28  ;;  %7366 = vst [vmem:[#allocation16_spill] sm:$0xff] %v6047_v14 }
 0x147   : > { %v895_v30 = vpop.f32.mrf.mxu0 }
 0x148   : > { %v1332_v43 = vpop.f32.mrf.mxu1  ;;  %v2336_v12 = vsel %vm734_vm0, %v2230_v58, 0.0  ;;  %v6050_v58 = vpop.permute.xlu2 %2067 }
 0x149   : > { %v1333_v19 = vadd.f32 %v1332_v43, %v895_v30  ;;  %2337 = vadd.xlane.f32.xlu0 %v2336_v12  ;;  %7367 = vst [vmem:[#allocation17_spill] sm:$0xff] %v6050_v58  ;;  %v6053_v56 = vpop.permute.xlu0 %2052 }
 0x14a   : > { %7368 = vst [vmem:[#allocation18_spill] sm:$0xff] %v6053_v56 }
 0x14b   : > { %v1463_v39 = vadd.f32 %v5776_v7, %v1333_v19  ;;  %v1528_v19 = vunpack.c.h.bf16 %v448_v2 }
 0x14d   : > { %v2167_v38 = vsel %vm2103_vm11, %v1463_v39, %v1527_v29  ;;  %vm2113_vm11 = vcmp.eq.s32.totalorder %v5915_v63, 1 }
 0x14e   : > { %v2231_v25 = vmul.f32 %v4930_v23, %v2167_v38  ;;  %v4931_v38 = vunpack.c.h.bf16 %v5022_v45  ;;  %v6064_v45 = vld [vmem:[%s5787_s17 + $0x60] sm:$0xff]  }
 0x14f   : > { %v897_v62 = vpop.f32.mrf.mxu0 }
 0x150   : > { %v1334_v28 = vpop.f32.mrf.mxu1  ;;  %v2339_v40 = vsel %vm734_vm0, %v2231_v25, 0.0 }
 0x151   : > { %2340 = vadd.xlane.f32.xlu1 %v2339_v40  ;;  %v1335_v30 = vadd.f32 %v1334_v28, %v897_v62  ;;  %v6057_v28 = vld [vmem:[%s5461_s30 + $0x60] sm:$0xff]  }
 0x153   : > { %v1464_v43 = vadd.f32 %v5776_v7, %v1335_v30  ;;  %v6059_v30 = vpop.permute.xlu2 %2076 }
 0x155   : > { %v2168_v40 = vsel %vm2104_vm12, %v1464_v43, %v1528_v19  ;;  %v6068_v43 = vpop.permute.xlu0 %2061  ;;  %vm2116_vm12 = vcmp.eq.s32.totalorder %v5936_v20, 1  ;;  %v6200_v20 = vld [vmem:[%s5461_s30 + $0x78] sm:$0xff]  }
 0x156   : > { %v2275_v12 = vpop.xlane.xlu1 %2274  ;;  %v2232_v53 = vmul.f32 %v4931_v38, %v2168_v40 }
 0x157   : > { %v900_v18 = vpop.f32.mrf.mxu0  ;;  %v2529_v39 = vperm.slane %v2275_v12, 0  ;;  %v2530_v14 = vperm.slane %v2275_v12, 1  ;;  %v2531_v23 = vperm.slane %v2275_v12, 2  ;;  %v2532_v62 = vperm.slane %v2275_v12, 3 }
 0x158   : > { %v1337_v29 = vpop.f32.mrf.mxu1  ;;  %v2533_v2 = vperm.slane %v2275_v12, 4  ;;  %v2534_v56 = vperm.slane %v2275_v12, 5  ;;  %v2535_v58 = vperm.slane %v2275_v12, 6  ;;  %v2536_v21 = vperm.slane %v2275_v12, 7 }
 0x159   : > { %v1338_v25 = vadd.f32 %v1337_v29, %v900_v18  ;;  %3041 = vst [vmem:[#allocation1] ss:$9 sm:$0xff] %v2529_v39  ;;  %v1529_v18 = vunpack.c.l.bf16 %v6057_v28  ;;  %v4934_v12 = vunpack.c.l.bf16 %v6064_v45 }
 0x15a   : > { %3043 = vst [vmem:[#allocation1 + $0x1] ss:$9 sm:$0xff] %v2530_v14  ;;  %v2342_v14 = vsel %vm734_vm0, %v2232_v53, 0.0 }
 0x15b   : > { %3045 = vst [vmem:[#allocation1 + $0x2] ss:$9 sm:$0xff] %v2531_v23  ;;  %v1465_v60 = vadd.f32 %v5776_v7, %v1338_v25  ;;  %2343 = vadd.xlane.f32.xlu2 %v2342_v14  ;;  %v2278_v29 = vpop.xlane.xlu2 %2277 }
 0x15c   : > { %3047 = vst [vmem:[#allocation1 + $0x3] ss:$9 sm:$0xff] %v2532_v62  ;;  %v2537_v23 = vperm.slane %v2278_v29, 0  ;;  %v2538_v25 = vperm.slane %v2278_v29, 1  ;;  %v2539_v53 = vperm.slane %v2278_v29, 2  ;;  %v2543_v62 = vperm.slane %v2278_v29, 6 }
 0x15d   : > { %3049 = vst [vmem:[#allocation1 + $0x4] ss:$9 sm:$0xff] %v2533_v2  ;;  %v2169_v19 = vsel %vm2105_vm13, %v1465_v60, %v1529_v18  ;;  %v6074_v24 = vpop.permute.xlu0 %2070  ;;  %v2544_v2 = vperm.slane %v2278_v29, 7  ;;  %vm2111_vm13 = vcmp.eq.s32.totalorder %v5940_v9, 1 }
 0x15e   : > { %3051 = vst [vmem:[#allocation1 + $0x5] ss:$9 sm:$0xff] %v2534_v56  ;;  %v2233_v39 = vmul.f32 %v4934_v12, %v2169_v19  ;;  %v2541_v56 = vperm.slane %v2278_v29, 4 }
 0x15f   : > { %3053 = vst [vmem:[#allocation1 + $0x6] ss:$9 sm:$0xff] %v2535_v58  ;;  %v2540_v58 = vperm.slane %v2278_v29, 3  ;;  %v902_v18 = vpop.f32.mrf.mxu0 }
 0x160   : > { %3055 = vst [vmem:[#allocation1 + $0x7] ss:$9 sm:$0xff] %v2536_v21  ;;  %v2345_v38 = vsel %vm734_vm0, %v2233_v39, 0.0  ;;  %v2542_v21 = vperm.slane %v2278_v29, 5  ;;  %v1339_v14 = vpop.f32.mrf.mxu1  ;;  %v1486_v29 = vadd.f32 %v5776_v7, %v5949_v33 }
 0x161   : > { %2346 = vadd.xlane.f32.xlu0 %v2345_v38 }
 0x165   : > { %v2281_v60 = vpop.xlane.xlu0 %2280 }
 0x166   : > { %v2545_v12 = vperm.slane %v2281_v60, 0  ;;  %v2546_v19 = vperm.slane %v2281_v60, 1  ;;  %v2547_v38 = vperm.slane %v2281_v60, 2 }
 0x167   : > { %v6072_v40 = vld [vmem:[#allocation1] sm:$0xff] }
 0x168   : > { %7369 = vst [vmem:[#allocation19_spill] sm:$0xff] %v6072_v40  ;;  %v6239_v40 = vld [vmem:[%s5787_s17 + $0x90] sm:$0xff]  }
 0x169   : > { %3057 = vst [vmem:[#allocation1] ss:$9 sm:$0xff] %v2537_v23  ;;  %v1340_v23 = vadd.f32 %v1339_v14, %v902_v18  ;;  %v1530_v18 = vunpack.c.h.bf16 %v6057_v28  ;;  %v4935_v14 = vunpack.c.h.bf16 %v6064_v45 }
 0x16a   : > { %3058 = vst [vmem:[#allocation1 + $0x1] ss:$9 sm:$0xff] %v2538_v25  ;;  %v2548_v25 = vperm.slane %v2281_v60, 3 }
 0x16b   : > { %3059 = vst [vmem:[#allocation1 + $0x2] ss:$9 sm:$0xff] %v2539_v53  ;;  %v2549_v53 = vperm.slane %v2281_v60, 4 }
 0x16c   : > { %3060 = vst [vmem:[#allocation1 + $0x3] ss:$9 sm:$0xff] %v2540_v58  ;;  %v2550_v58 = vperm.slane %v2281_v60, 5 }
 0x16d   : > { %3061 = vst [vmem:[#allocation1 + $0x4] ss:$9 sm:$0xff] %v2541_v56  ;;  %v1466_v56 = vadd.f32 %v5776_v7, %v1340_v23 }
 0x16e   : > { %3062 = vst [vmem:[#allocation1 + $0x5] ss:$9 sm:$0xff] %v2542_v21  ;;  %v2551_v21 = vperm.slane %v2281_v60, 6 }
 0x16f   : > { %3063 = vst [vmem:[#allocation1 + $0x6] ss:$9 sm:$0xff] %v2543_v62  ;;  %v6082_v62 = vld [vmem:[%s5461_s30 + $0xb0] sm:$0xff]   ;;  %v2170_v33 = vsel %vm2106_vm14, %v1466_v56, %v1530_v18  ;;  %v473_v56 = vld [vmem:[%s5461_s30 + $0xbc] sm:$0xff]   ;;  %vm2114_vm14 = vcmp.eq.s32.totalorder %v5961_v6, 1 }
 0x170   : > { %3064 = vst [vmem:[#allocation1 + $0x7] ss:$9 sm:$0xff] %v2544_v2  ;;  %v2552_v2 = vperm.slane %v2281_v60, 7  ;;  %v2234_v23 = vmul.f32 %v4935_v14, %v2170_v33  ;;  %v2284_v60 = vpop.xlane.xlu2 %2283  ;;  %v1552_v18 = vunpack.c.l.bf16 %v473_v56 }
 0x171   : > { %v2553_v28 = vperm.slane %v2284_v60, 0  ;;  %v2560_v27 = vperm.slane %v2284_v60, 7 }
 0x172   : > { %v6102_v50 = vsel %vm2128_vm1, %v1488_v55, %v1552_v18  ;;  %vm2117_vm1 = vcmp.eq.s32.totalorder %v5977_v31, 1 }
 0x177   : > { %v6076_v39 = vld [vmem:[#allocation1] sm:$0xff] }
 0x178   : > { %3066 = vst [vmem:[#allocation1] ss:$9 sm:$0xff] %v2545_v12  ;;  %v1550_v12 = vunpack.c.h.bf16 %v6082_v62  ;;  %v2290_v59 = vpop.xlane.xlu2 %2289 }
 0x179   : > { %3067 = vst [vmem:[#allocation1 + $0x1] ss:$9 sm:$0xff] %v2546_v19  ;;  %v2570_v61 = vperm.slane %v2290_v59, 1 }
 0x17a   : > { %3068 = vst [vmem:[#allocation1 + $0x2] ss:$9 sm:$0xff] %v2547_v38  ;;  %v6089_v19 = vsel %vm2126_vm15, %v1486_v29, %v1550_v12  ;;  %v2348_v38 = vsel %vm734_vm0, %v2234_v23, 0.0  ;;  %v2556_v29 = vperm.slane %v2284_v60, 3  ;;  %v2559_v12 = vperm.slane %v2284_v60, 6  ;;  %v905_v23 = vpop.f32.mrf.mxu0 }
 0x17b   : > { %3069 = vst [vmem:[#allocation1 + $0x3] ss:$9 sm:$0xff] %v2548_v25  ;;  %2349 = vadd.xlane.f32.xlu1 %v2348_v38  ;;  %v2554_v25 = vperm.slane %v2284_v60, 1  ;;  %v1342_v38 = vpop.f32.mrf.mxu1  ;;  %vm2119_vm15 = vcmp.eq.s32.totalorder %v5958_v4, 1 }
 0x17c   : > { %3070 = vst [vmem:[#allocation1 + $0x4] ss:$9 sm:$0xff] %v2549_v53  ;;  %v2555_v53 = vperm.slane %v2284_v60, 2 }
 0x17d   : > { %3071 = vst [vmem:[#allocation1 + $0x5] ss:$9 sm:$0xff] %v2550_v58  ;;  %v2557_v58 = vperm.slane %v2284_v60, 4 }
 0x17e   : > { %3072 = vst [vmem:[#allocation1 + $0x6] ss:$9 sm:$0xff] %v2551_v21  ;;  %v472_v21 = vld [vmem:[%s5461_s30 + $0xb8] sm:$0xf] }
 0x17f   : > { %3073 = vst [vmem:[#allocation1 + $0x7] ss:$9 sm:$0xff] %v2552_v2  ;;  %v2558_v2 = vperm.slane %v2284_v60, 5  ;;  %v1551_v14 = vunpack.c.l.bf16 %v472_v21 }
 0x181   : > { %v6104_v33 = vsel %vm2127_vm2, %v1487_v35, %v1551_v14  ;;  %v1489_v35 = vadd.f32 %v5776_v7, %v5985_v46  ;;  %vm2122_vm2 = vcmp.eq.s32.totalorder %v5970_v16, 1 }
 0x186   : > { %v6092_v45 = vld [vmem:[#allocation1] sm:$0xff] }
 0x187   : > { %7370 = vst [vmem:[#allocation20_spill] sm:$0xff] %v6092_v45  ;;  %v6233_v45 = vld [vmem:[%s5461_s30 + $0xa4] sm:$0xff]  }
 0x188   : > { %3075 = vst [vmem:[#allocation1] ss:$9 sm:$0xff] %v2553_v28  ;;  %v2287_v28 = vpop.xlane.xlu1 %2286 }
 0x189   : > { %3076 = vst [vmem:[#allocation1 + $0x1] ss:$9 sm:$0xff] %v2554_v25  ;;  %v1343_v25 = vadd.f32 %v1342_v38, %v905_v23  ;;  %v2562_v37 = vperm.slane %v2287_v28, 1  ;;  %v2563_v21 = vperm.slane %v2287_v28, 2  ;;  %v2564_v55 = vperm.slane %v2287_v28, 3 }
 0x18a   : > { %3077 = vst [vmem:[#allocation1 + $0x2] ss:$9 sm:$0xff] %v2555_v53  ;;  %v2561_v53 = vperm.slane %v2287_v28, 0  ;;  %v2567_v23 = vperm.slane %v2287_v28, 6 }
 0x18b   : > { %3078 = vst [vmem:[#allocation1 + $0x3] ss:$9 sm:$0xff] %v2556_v29  ;;  %v452_v29 = vld [vmem:[%s5461_s30 + $0x68] sm:$0xff]   ;;  %v1467_v60 = vadd.f32 %v5776_v7, %v1343_v25  ;;  %v2568_v25 = vperm.slane %v2287_v28, 7 }
 0x18c   : > { %3079 = vst [vmem:[#allocation1 + $0x4] ss:$9 sm:$0xff] %v2557_v58  ;;  %v5024_v58 = vld [vmem:[%s5787_s17 + $0x68] sm:$0xff]   ;;  %v1531_v18 = vunpack.c.l.bf16 %v452_v29 }
 0x18d   : > { %3080 = vst [vmem:[#allocation1 + $0x5] ss:$9 sm:$0xff] %v2558_v2  ;;  %v2565_v2 = vperm.slane %v2287_v28, 4  ;;  %v4938_v14 = vunpack.c.l.bf16 %v5024_v58 }
 0x18e   : > { %3081 = vst [vmem:[#allocation1 + $0x6] ss:$9 sm:$0xff] %v2559_v12  ;;  %v2566_v12 = vperm.slane %v2287_v28, 5  ;;  %v2171_v38 = vsel %vm2107_vm3, %v1467_v60, %v1531_v18  ;;  %v6123_v28 = vld [vmem:[%s7346_s6] ss:$0 sm:$0xff]  ;;  %vm2112_vm3 = vcmp.eq.s32.totalorder %v5875_v52, 1 }
 0x18f   : > { %3082 = vst [vmem:[#allocation1 + $0x7] ss:$9 sm:$0xff] %v2560_v27  ;;  %v1553_v27 = vunpack.c.h.bf16 %v473_v56  ;;  %v2235_v7 = vmul.f32 %v4938_v14, %v2171_v38  ;;  %v1344_v56 = vpop.f32.mrf.mxu1  ;;  %v1490_v60 = vadd.f32 %v6123_v28, %v5996_v47  ;;  %v2573_v14 = vperm.slane %v2290_v59, 4 }
 0x190   : > { %v2575_v38 = vperm.slane %v2290_v59, 6  ;;  %v1532_v47 = vunpack.c.h.bf16 %v452_v29  ;;  %v1492_v29 = vadd.f32 %v6123_v28, %v6018_v54 }
 0x191   : > { %v6115_v46 = vsel %vm2129_vm4, %v1489_v35, %v1553_v27  ;;  %v2572_v35 = vperm.slane %v2290_v59, 3  ;;  %v2574_v27 = vperm.slane %v2290_v59, 5  ;;  %vm2115_vm4 = vcmp.eq.s32.totalorder %v5905_v15, 1 }
 0x196   : > { %v6106_v41 = vld [vmem:[#allocation1] sm:$0xff] }
 0x197   : > { %7371 = vst [vmem:[#allocation21_spill] sm:$0xff] %v6106_v41 }
 0x198   : > { %3084 = vst [vmem:[#allocation1] ss:$9 sm:$0xff] %v2561_v53  ;;  %v2351_v53 = vsel %vm734_vm0, %v2235_v7, 0.0 }
 0x199   : > { %3085 = vst [vmem:[#allocation1 + $0x1] ss:$9 sm:$0xff] %v2562_v37  ;;  %2352 = vadd.xlane.f32.xlu2 %v2351_v53  ;;  %v2569_v37 = vperm.slane %v2290_v59, 0 }
 0x19a   : > { %3086 = vst [vmem:[#allocation1 + $0x2] ss:$9 sm:$0xff] %v2563_v21  ;;  %v907_v21 = vpop.f32.mrf.mxu0 }
 0x19b   : > { %3087 = vst [vmem:[#allocation1 + $0x3] ss:$9 sm:$0xff] %v2564_v55  ;;  %v1345_v18 = vadd.f32 %v1344_v56, %v907_v21  ;;  %v2293_v56 = vpop.xlane.xlu0 %2292 }
 0x19c   : > { %3088 = vst [vmem:[#allocation1 + $0x4] ss:$9 sm:$0xff] %v2565_v2  ;;  %v2571_v2 = vperm.slane %v2290_v59, 2  ;;  %v2577_v10 = vperm.slane %v2293_v56, 0 }
 0x19d   : > { %3089 = vst [vmem:[#allocation1 + $0x5] ss:$9 sm:$0xff] %v2566_v12  ;;  %v475_v12 = vld [vmem:[%s5461_s30 + $0xc4] sm:$0xf]  ;;  %v1468_v7 = vadd.f32 %v6123_v28, %v1345_v18 }
 0x19e   : > { %3090 = vst [vmem:[#allocation1 + $0x6] ss:$9 sm:$0xff] %v2567_v23  ;;  %v1554_v23 = vunpack.c.l.bf16 %v475_v12  ;;  %v2580_v12 = vperm.slane %v2293_v56, 3 }
 0x19f   : > { %3091 = vst [vmem:[#allocation1 + $0x7] ss:$9 sm:$0xff] %v2568_v25  ;;  %v2576_v25 = vperm.slane %v2290_v59, 7  ;;  %v2172_v21 = vsel %vm2108_vm6, %v1468_v7, %v1532_v47  ;;  %v1347_v59 = vpop.f32.mrf.mxu1  ;;  %v2584_v7 = vperm.slane %v2293_v56, 7  ;;  %vm2125_vm6 = vcmp.eq.s32.totalorder %v5983_v26, 1 }
 0x1a0   : > { %v6130_v53 = vsel %vm2130_vm5, %v1490_v60, %v1554_v23  ;;  %v2579_v60 = vperm.slane %v2293_v56, 2  ;;  %v6139_v23 = vld [vmem:[%s5461_s30 + $0xc8] sm:$0xff]   ;;  %vm2120_vm5 = vcmp.eq.s32.totalorder %v5990_v13, 1  ;;  %v1547_v26 = vunpack.c.h.bf16 %v6233_v45 }
 0x1a6   : > { %v6118_v55 = vld [vmem:[#allocation1] sm:$0xff] }
 0x1a7   : > { %7372 = vst [vmem:[#allocation22_spill] sm:$0xff] %v6118_v55  ;;  %v6219_v55 = vld [vmem:[%s5787_s17 + $0x98] sm:$0xff]  }
 0x1a8   : > { %3093 = vst [vmem:[#allocation1] ss:$9 sm:$0xff] %v2569_v37  ;;  %v4939_v37 = vunpack.c.h.bf16 %v5024_v58  ;;  %v2581_v58 = vperm.slane %v2293_v56, 4  ;;  %v4963_v13 = vunpack.c.h.bf16 %v6219_v55 }
 0x1a9   : > { %3094 = vst [vmem:[#allocation1 + $0x1] ss:$9 sm:$0xff] %v2570_v61 }
 0x1aa   : > { %3095 = vst [vmem:[#allocation1 + $0x2] ss:$9 sm:$0xff] %v2571_v2  ;;  %v2236_v61 = vmul.f32 %v4939_v37, %v2172_v21  ;;  %v454_v37 = vld [vmem:[%s5461_s30 + $0x70] sm:$0xff]  }
 0x1ab   : > { %3096 = vst [vmem:[#allocation1 + $0x3] ss:$9 sm:$0xff] %v2572_v35  ;;  %v910_v35 = vpop.f32.mrf.mxu0  ;;  %v1533_v21 = vunpack.c.l.bf16 %v454_v37 }
 0x1ac   : > { %3097 = vst [vmem:[#allocation1 + $0x4] ss:$9 sm:$0xff] %v2573_v14  ;;  %v2354_v2 = vsel %vm734_vm0, %v2236_v61, 0.0  ;;  %v2578_v14 = vperm.slane %v2293_v56, 1  ;;  %v1348_v8 = vadd.f32 %v1347_v59, %v910_v35  ;;  %v5025_v61 = vld [vmem:[%s5787_s17 + $0x70] sm:$0xff]   ;;  %v2296_v35 = vpop.xlane.xlu1 %2295 }
 0x1ad   : > { %3098 = vst [vmem:[#allocation1 + $0x5] ss:$9 sm:$0xff] %v2574_v27  ;;  %2355 = vadd.xlane.f32.xlu0 %v2354_v2  ;;  %v2582_v27 = vperm.slane %v2293_v56, 5  ;;  %v4942_v2 = vunpack.c.l.bf16 %v5025_v61  ;;  %v2585_v42 = vperm.slane %v2296_v35, 0  ;;  %v2588_v17 = vperm.slane %v2296_v35, 3 }
 0x1ae   : > { %3099 = vst [vmem:[#allocation1 + $0x6] ss:$9 sm:$0xff] %v2575_v38  ;;  %v2583_v38 = vperm.slane %v2293_v56, 6  ;;  %v1469_v47 = vadd.f32 %v6123_v28, %v1348_v8  ;;  %v6152_v8 = vpop.f32.mrf.mxu3 }
 0x1af   : > { %3100 = vst [vmem:[#allocation1 + $0x7] ss:$9 sm:$0xff] %v2576_v25  ;;  %v1556_v25 = vunpack.c.h.bf16 %v6139_v23 }
 0x1b1   : > { %v6145_v54 = vsel %vm2132_vm7, %v1492_v29, %v1556_v25  ;;  %v2589_v25 = vperm.slane %v2296_v35, 4  ;;  %vm2118_vm7 = vcmp.eq.s32.totalorder %v5930_v11, 1 }
 0x1b3   : > { %v912_v56 = vpop.f32.mrf.mxu0 }
 0x1b6   : > { %v6134_v18 = vld [vmem:[#allocation1] sm:$0xff] }
 0x1b7   : > { %3102 = vst [vmem:[#allocation1] ss:$9 sm:$0xff] %v2577_v10  ;;  %v2173_v10 = vsel %vm2109_vm8, %v1469_v47, %v1533_v21  ;;  %v2590_v47 = vperm.slane %v2296_v35, 5  ;;  %v2591_v21 = vperm.slane %v2296_v35, 6 }
 0x1b8   : > { %3103 = vst [vmem:[#allocation1 + $0x1] ss:$9 sm:$0xff] %v2578_v14  ;;  %v2237_v59 = vmul.f32 %v4942_v2, %v2173_v10  ;;  %v478_v2 = vld [vmem:[%s5461_s30 + $0xd0] sm:$0xf]  ;;  %v2592_v10 = vperm.slane %v2296_v35, 7 }
 0x1b9   : > { %3104 = vst [vmem:[#allocation1 + $0x2] ss:$9 sm:$0xff] %v2579_v60  ;;  %v1349_v60 = vpop.f32.mrf.mxu1 }
 0x1ba   : > { %3105 = vst [vmem:[#allocation1 + $0x3] ss:$9 sm:$0xff] %v2580_v12  ;;  %v2357_v14 = vsel %vm734_vm0, %v2237_v59, 0.0  ;;  %v6150_v12 = vpop.f32.mrf.mxu2 }
 0x1bb   : > { %3106 = vst [vmem:[#allocation1 + $0x4] ss:$9 sm:$0xff] %v2581_v58  ;;  %2358 = vadd.xlane.f32.xlu1 %v2357_v14  ;;  %v2586_v58 = vperm.slane %v2296_v35, 1  ;;  %v1557_v14 = vunpack.c.l.bf16 %v478_v2 }
 0x1bc   : > { %3107 = vst [vmem:[#allocation1 + $0x5] ss:$9 sm:$0xff] %v2582_v27  ;;  %v2587_v27 = vperm.slane %v2296_v35, 2  ;;  %v1473_v35 = vadd.f32 %v6123_v28, %v5663_v34  ;;  %v915_v34 = vpop.f32.mrf.mxu0 }
 0x1bd   : > { %3108 = vst [vmem:[#allocation1 + $0x6] ss:$9 sm:$0xff] %v2583_v38  ;;  %v1350_v38 = vadd.f32 %v1349_v60, %v912_v56  ;;  %v1534_v56 = vunpack.c.h.bf16 %v454_v37  ;;  %v2299_v37 = vpop.xlane.xlu2 %2298 }
 0x1be   : > { %3109 = vst [vmem:[#allocation1 + $0x7] ss:$9 sm:$0xff] %v2584_v7  ;;  %v1493_v7 = vadd.f32 %v6123_v28, %v6029_v48  ;;  %v4943_v48 = vunpack.c.h.bf16 %v5025_v61  ;;  %v2596_v63 = vperm.slane %v2299_v37, 3 }
 0x1bf   : > { %v1470_v59 = vadd.f32 %v6123_v28, %v1350_v38  ;;  %v6175_v38 = vld [vmem:[%s5787_s17 + $0x80] sm:$0xff]  }
 0x1c0   : > { %v6164_v60 = vsel %vm2133_vm9, %v1493_v7, %v1557_v14  ;;  %v4950_v61 = vunpack.c.l.bf16 %v6175_v38  ;;  %v2593_v7 = vperm.slane %v2299_v37, 0  ;;  %v2595_v14 = vperm.slane %v2299_v37, 2 }
 0x1c5   : > { %v6154_v29 = vld [vmem:[#allocation1] sm:$0xff] }
 0x1c6   : > { %7373 = vst [vmem:[#allocation23_spill] sm:$0xff] %v6154_v29 }
 0x1c7   : > { %3111 = vst [vmem:[#allocation1] ss:$9 sm:$0xff] %v2585_v42  ;;  %v6162_v42 = vld [vmem:[%s5461_s30 + $0x80] sm:$0xff]  }
 0x1c8   : > { %3112 = vst [vmem:[#allocation1 + $0x1] ss:$9 sm:$0xff] %v2586_v58  ;;  %v6169_v58 = vpop.f32.mrf.mxu2  ;;  %v1537_v32 = vunpack.c.l.bf16 %v6162_v42 }
 0x1c9   : > { %3113 = vst [vmem:[#allocation1 + $0x2] ss:$9 sm:$0xff] %v2587_v27  ;;  %v6171_v27 = vpop.f32.mrf.mxu3 }
 0x1ca   : > { %3114 = vst [vmem:[#allocation1 + $0x3] ss:$9 sm:$0xff] %v2588_v17  ;;  %v2174_v17 = vsel %vm2110_vm10, %v1470_v59, %v1534_v56  ;;  %v6183_v59 = vld [vmem:[%s5461_s30 + $0x8c] sm:$0xff]  }
 0x1cb   : > { %3115 = vst [vmem:[#allocation1 + $0x4] ss:$9 sm:$0xff] %v2589_v25  ;;  %v2238_v25 = vmul.f32 %v4943_v48, %v2174_v17  ;;  %v1476_v17 = vadd.f32 %v6123_v28, %v5726_v22  ;;  %v2600_v22 = vperm.slane %v2299_v37, 7  ;;  %v1541_v41 = vunpack.c.h.bf16 %v6183_v59 }
 0x1cc   : > { %3116 = vst [vmem:[#allocation1 + $0x5] ss:$9 sm:$0xff] %v2590_v47  ;;  %v1352_v47 = vpop.f32.mrf.mxu1 }
 0x1cd   : > { %3117 = vst [vmem:[#allocation1 + $0x6] ss:$9 sm:$0xff] %v2591_v21  ;;  %v2360_v3 = vsel %vm734_vm0, %v2238_v25, 0.0  ;;  %v2177_v21 = vsel %vm2113_vm11, %v1473_v35, %v1537_v32  ;;  %v1353_v56 = vadd.f32 %v1352_v47, %v915_v34  ;;  %v2597_v25 = vperm.slane %v2299_v37, 4  ;;  %v6189_v35 = vld [vmem:[%s5787_s17 + $0x88] sm:$0xff]  }
 0x1ce   : > { %3118 = vst [vmem:[#allocation1 + $0x7] ss:$9 sm:$0xff] %v2592_v10  ;;  %2361 = vadd.xlane.f32.xlu2 %v2360_v3  ;;  %v2594_v10 = vperm.slane %v2299_v37, 1  ;;  %v2241_v48 = vmul.f32 %v4950_v61, %v2177_v21  ;;  %v1540_v3 = vunpack.c.l.bf16 %v6183_v59  ;;  %v2598_v32 = vperm.slane %v2299_v37, 5 }
 0x1cf   : > { %v2599_v61 = vperm.slane %v2299_v37, 6  ;;  %v1471_v47 = vadd.f32 %v6123_v28, %v1353_v56  ;;  %v1474_v56 = vadd.f32 %v6123_v28, %v5684_v51  ;;  %v4951_v51 = vunpack.c.h.bf16 %v6175_v38 }
 0x1d0   : > { %v2369_v21 = vsel %vm734_vm0, %v2241_v48, 0.0  ;;  %v4954_v15 = vunpack.c.l.bf16 %v6189_v35 }
 0x1d1   : > { %v6194_v34 = vpop.f32.mrf.mxu3 }
 0x1d5   : > { %v6180_v2 = vld [vmem:[#allocation1] sm:$0xff] }
 0x1d6   : > { %7374 = vst [vmem:[#allocation24_spill] sm:$0xff] %v6180_v2  ;;  %2370 = vadd.xlane.f32.xlu2 %v2369_v21  ;;  %v6204_v2 = vld [vmem:[%s5787_s17 + $0x78] sm:$0xff]  }
 0x1d7   : > { %3120 = vst [vmem:[#allocation1] ss:$9 sm:$0xff] %v2593_v7  ;;  %v6192_v7 = vpop.f32.mrf.mxu2  ;;  %v4946_v37 = vunpack.c.l.bf16 %v6204_v2  ;;  %v4947_v16 = vunpack.c.h.bf16 %v6204_v2  ;;  %v1485_v2 = vadd.f32 %v6123_v28, %v5932_v57 }
 0x1d8   : > { %3121 = vst [vmem:[#allocation1 + $0x1] ss:$9 sm:$0xff] %v2594_v10  ;;  %v4955_v10 = vunpack.c.h.bf16 %v6189_v35 }
 0x1d9   : > { %3122 = vst [vmem:[#allocation1 + $0x2] ss:$9 sm:$0xff] %v2595_v14  ;;  %v2180_v14 = vsel %vm2116_vm12, %v1476_v17, %v1540_v3  ;;  %v1479_v17 = vadd.f32 %v6123_v28, %v5767_v0  ;;  %v2302_v3 = vpop.xlane.xlu0 %2301 }
 0x1da   : > { %3123 = vst [vmem:[#allocation1 + $0x3] ss:$9 sm:$0xff] %v2596_v63  ;;  %v1535_v63 = vunpack.c.l.bf16 %v6200_v20  ;;  %v2602_v4 = vperm.slane %v2302_v3, 1  ;;  %v2605_v29 = vperm.slane %v2302_v3, 4 }
 0x1db   : > { %3124 = vst [vmem:[#allocation1 + $0x4] ss:$9 sm:$0xff] %v2597_v25  ;;  %v6207_v25 = vld [vmem:[%s5461_s30 + $0x98] sm:$0xff]  }
 0x1dc   : > { %3125 = vst [vmem:[#allocation1 + $0x5] ss:$9 sm:$0xff] %v2598_v32  ;;  %v2175_v48 = vsel %vm2111_vm13, %v1471_v47, %v1535_v63  ;;  %v1538_v32 = vunpack.c.h.bf16 %v6162_v42  ;;  %v1543_v21 = vunpack.c.l.bf16 %v6207_v25  ;;  %v2601_v42 = vperm.slane %v2302_v3, 0  ;;  %v917_v47 = vpop.f32.mrf.mxu0 }
 0x1dd   : > { %3126 = vst [vmem:[#allocation1 + $0x6] ss:$9 sm:$0xff] %v2599_v61  ;;  %v2244_v61 = vmul.f32 %v4955_v10, %v2180_v14  ;;  %v1354_v10 = vpop.f32.mrf.mxu1  ;;  %v4962_v14 = vunpack.c.l.bf16 %v6219_v55  ;;  %v1478_v55 = vadd.f32 %v6123_v28, %v5752_v49 }
 0x1de   : > { %3127 = vst [vmem:[#allocation1 + $0x7] ss:$9 sm:$0xff] %v2600_v22  ;;  %v2239_v22 = vmul.f32 %v4946_v37, %v2175_v48  ;;  %v2178_v0 = vsel %vm2114_vm14, %v1474_v56, %v1538_v32  ;;  %v6228_v37 = vpop.f32.mrf.mxu3  ;;  %v2183_v38 = vsel %vm2119_vm15, %v1479_v17, %v1543_v21  ;;  %v2604_v56 = vperm.slane %v2302_v3, 3 }
 0x1df   : > { %v2378_v6 = vsel %vm734_vm0, %v2244_v61, 0.0  ;;  %v6226_v63 = vpop.f32.mrf.mxu2  ;;  %v1355_v32 = vadd.f32 %v1354_v10, %v917_v47  ;;  %v2242_v61 = vmul.f32 %v4951_v51, %v2178_v0  ;;  %v1482_v17 = vadd.f32 %v6123_v28, %v5866_v5 }
 0x1e0   : > { %v2363_v9 = vsel %vm734_vm0, %v2239_v22, 0.0  ;;  %2379 = vadd.xlane.f32.xlu2 %v2378_v6  ;;  %v2603_v22 = vperm.slane %v2302_v3, 2  ;;  %v2247_v6 = vmul.f32 %v4962_v14, %v2183_v38  ;;  %v2606_v21 = vperm.slane %v2302_v3, 5  ;;  %v460_v14 = vld [vmem:[%s5461_s30 + $0x88] sm:$0xf] }
 0x1e1   : > { %2364 = vadd.xlane.f32.xlu0 %v2363_v9  ;;  %v1477_v9 = vadd.f32 %v6123_v28, %v5741_v36  ;;  %v1546_v51 = vunpack.c.l.bf16 %v6233_v45  ;;  %v2607_v36 = vperm.slane %v2302_v3, 6  ;;  %v2608_v47 = vperm.slane %v2302_v3, 7 }
 0x1e2   : > { %v1472_v59 = vadd.f32 %v6123_v28, %v1355_v32  ;;  %v2372_v10 = vsel %vm734_vm0, %v2242_v61, 0.0  ;;  %v4958_v0 = vunpack.c.l.bf16 %v6239_v40  ;;  %v2387_v31 = vsel %vm734_vm0, %v2247_v6, 0.0 }
 0x1e3   : > { %v2181_v5 = vsel %vm2117_vm1, %v1477_v9, %v1541_v41  ;;  %v2186_v3 = vsel %vm2122_vm2, %v1482_v17, %v1546_v51  ;;  %v1475_v38 = vadd.f32 %v6123_v28, %v5705_v1  ;;  %v1480_v41 = vadd.f32 %v6123_v28, %v5803_v44  ;;  %v2305_v9 = vpop.xlane.xlu1 %2304  ;;  %v6273_v17 = vld [vmem:[%s5787_s17 + $0xb0] sm:$0xff]  }
 0x1e4   : > { %v2245_v61 = vmul.f32 %v4958_v0, %v2181_v5  ;;  %v1544_v1 = vunpack.c.h.bf16 %v6207_v25  ;;  %v1549_v44 = vunpack.c.l.bf16 %v6082_v62  ;;  %v2609_v51 = vperm.slane %v2305_v9, 0 }
 0x1e5   : > { %v6230_v48 = vld [vmem:[#allocation1] sm:$0xff]  ;;  %v2610_v57 = vperm.slane %v2305_v9, 1  ;;  %v4974_v0 = vunpack.c.l.bf16 %v6273_v17  ;;  %v2611_v5 = vperm.slane %v2305_v9, 2  ;;  %vm2138_vm1 = vcmp.eq.s32.totalorder %v6068_v43, 1 }
 0x1e6   : > { %3129 = vst [vmem:[#allocation1] ss:$9 sm:$0xff] %v2601_v42  ;;  %v6246_v42 = vld [vmem:[%s5787_s17 + $0xa0] sm:$0xff]   ;;  %v2381_v25 = vsel %vm734_vm0, %v2245_v61, 0.0  ;;  %v2184_v62 = vsel %vm2120_vm5, %v1480_v41, %v1544_v1  ;;  %v2189_v35 = vsel %vm2125_vm6, %v1485_v2, %v1549_v44  ;;  %v2614_v41 = vperm.slane %v2305_v9, 5  ;;  %v7376_v61 = vld [vmem:[#allocation8_spill] sm:$0xff] }
 0x1e7   : > { %3130 = vst [vmem:[#allocation1 + $0x1] ss:$9 sm:$0xff] %v2602_v4  ;;  %v4967_v4 = vunpack.c.h.bf16 %v6246_v42  ;;  %v2253_v49 = vmul.f32 %v4974_v0, %v2189_v35  ;;  %vm2123_vm8 = vcmp.eq.s32.totalorder %v7376_v61, 1  ;;  %v2615_v1 = vperm.slane %v2305_v9, 6  ;;  %v2308_v0 = vpop.xlane.xlu2 %2307 }
 0x1e8   : > { %3131 = vst [vmem:[#allocation1 + $0x2] ss:$9 sm:$0xff] %v2603_v22  ;;  %2388 = vadd.xlane.f32.xlu2 %v2387_v31  ;;  %v6262_v22 = vpop.f32.mrf.mxu2  ;;  %v2612_v31 = vperm.slane %v2305_v9, 3  ;;  %v4959_v44 = vunpack.c.h.bf16 %v6239_v40  ;;  %v466_v40 = vld [vmem:[%s5461_s30 + $0xa0] sm:$0xf]  ;;  %vm2143_vm2 = vcmp.eq.s32.totalorder %v6059_v30, 1 }
 0x1e9   : > { %3132 = vst [vmem:[#allocation1 + $0x3] ss:$9 sm:$0xff] %v2604_v56  ;;  %2373 = vadd.xlane.f32.xlu0 %v2372_v10  ;;  %v6264_v56 = vpop.f32.mrf.mxu3  ;;  %v2250_v52 = vmul.f32 %v4967_v4, %v2186_v3  ;;  %v463_v10 = vld [vmem:[%s5461_s30 + $0x94] sm:$0xf]  ;;  %v2613_v4 = vperm.slane %v2305_v9, 4  ;;  %v1545_v35 = vunpack.c.l.bf16 %v466_v40 }
 0x1ea   : > { %3133 = vst [vmem:[#allocation1 + $0x4] ss:$9 sm:$0xff] %v2605_v29  ;;  %v1536_v29 = vunpack.c.h.bf16 %v6200_v20  ;;  %v1539_v20 = vunpack.c.l.bf16 %v460_v14  ;;  %v1542_v3 = vunpack.c.l.bf16 %v463_v10  ;;  %v6345_v40 = vld [vmem:[%s5461_s30 + $0xd4] sm:$0xff]  }
 0x1eb   : > { %3134 = vst [vmem:[#allocation1 + $0x5] ss:$9 sm:$0xff] %v2606_v21 }
 0x1ec   : > { %3135 = vst [vmem:[#allocation1 + $0x6] ss:$9 sm:$0xff] %v2607_v36  ;;  %v2176_v32 = vsel %vm2112_vm3, %v1472_v59, %v1536_v29  ;;  %v2179_v36 = vsel %vm2115_vm4, %v1475_v38, %v1539_v20  ;;  %v2396_v59 = vsel %vm734_vm0, %v2250_v52, 0.0  ;;  %v2248_v29 = vmul.f32 %v4963_v13, %v2184_v62  ;;  %v7375_v38 = vld [vmem:[#allocation4_spill] sm:$0xff]  ;;  %v7377_v13 = vld [vmem:[#allocation9_spill] sm:$0xff] }
 0x1ed   : > { %3136 = vst [vmem:[#allocation1 + $0x7] ss:$9 sm:$0xff] %v2608_v47  ;;  %v2240_v6 = vmul.f32 %v4947_v16, %v2176_v32  ;;  %v2243_v14 = vmul.f32 %v4954_v15, %v2179_v36  ;;  %v1483_v16 = vadd.f32 %v6123_v28, %v7375_v38  ;;  %v6294_v32 = vld [vmem:[%s5787_s17 + $0xa8] sm:$0xff]   ;;  %v2616_v52 = vperm.slane %v2305_v9, 7 }
 0x1ee   : > { %v2390_v45 = vsel %vm734_vm0, %v2248_v29, 0.0  ;;  %v4970_v15 = vunpack.c.l.bf16 %v6294_v32  ;;  %v6324_v29 = vld [vmem:[%s5787_s17 + $0xc8] sm:$0xff]   ;;  %v2617_v38 = vperm.slane %v2308_v0, 0  ;;  %vm2141_vm4 = vcmp.eq.s32.totalorder %v6074_v24, 1 }
 0x1ef   : > { %v2366_v21 = vsel %vm734_vm0, %v2240_v6, 0.0  ;;  %v2375_v2 = vsel %vm734_vm0, %v2243_v14, 0.0  ;;  %v2187_v9 = vsel %vm2123_vm8, %v1483_v16, %v1547_v26  ;;  %v2317_v24 = vpop.xlane.xlu2 %2316 }
 0x1f0   : > { %2367 = vadd.xlane.f32.xlu1 %v2366_v21  ;;  %2397 = vadd.xlane.f32.xlu2 %v2396_v59  ;;  %v6297_v20 = vpop.f32.mrf.mxu2  ;;  %v2182_v21 = vsel %vm2118_vm7, %v1478_v55, %v1542_v3  ;;  %v7379_v59 = vld [vmem:[#allocation3_spill] sm:$0xff]  ;;  %v7380_v55 = vld [vmem:[#allocation6_spill] sm:$0xff]  ;;  %v2644_v30 = vperm.slane %v2317_v24, 3 }
 0x1f1   : > { %2382 = vadd.xlane.f32.xlu0 %v2381_v25  ;;  %v6299_v6 = vpop.f32.mrf.mxu3  ;;  %v2405_v25 = vsel %vm734_vm0, %v2253_v49, 0.0  ;;  %v2246_v11 = vmul.f32 %v4959_v44, %v2182_v21  ;;  %v1481_v10 = vadd.f32 %v6123_v28, %v7379_v59  ;;  %vm2121_vm9 = vcmp.eq.s32.totalorder %v7380_v55, 1  ;;  %v7381_v3 = vld [vmem:[#allocation11_spill] sm:$0xff]  ;;  %v6352_v59 = vld [vmem:[%s5787_s17 + $0xc0] sm:$0xff]  }
 0x1f2   : > { %vm2131_vm10 = vcmp.eq.s32.totalorder %v7381_v3, 1  ;;  %v1410_v21 = vadd.f32 %v6152_v8, %v6150_v12  ;;  %v7383_v8 = vld [vmem:[#allocation7_spill] sm:$0xff]  ;;  %v1558_v55 = vunpack.c.l.bf16 %v6345_v40  ;;  %v4982_v3 = vunpack.c.l.bf16 %v6352_v59 }
 0x1f3   : > { %v2384_v16 = vsel %vm734_vm0, %v2246_v11, 0.0  ;;  %vm2124_vm11 = vcmp.eq.s32.totalorder %v7383_v8, 1  ;;  %v2623_v11 = vperm.slane %v2308_v0, 6 }
 0x1f4   : > { %v6280_v47 = vld [vmem:[#allocation1] sm:$0xff] }
 0x1f5   : > { %3138 = vst [vmem:[#allocation1] ss:$9 sm:$0xff] %v2609_v51  ;;  %v6308_v51 = vld [vmem:[%s5787_s17 + $0xb8] sm:$0xff]  }
 0x1f6   : > { %3139 = vst [vmem:[#allocation1 + $0x1] ss:$9 sm:$0xff] %v2610_v57  ;;  %v4979_v36 = vunpack.c.h.bf16 %v6308_v51  ;;  %v7378_v57 = vld [vmem:[#allocation10_spill] sm:$0xff] }
 0x1f7   : > { %3140 = vst [vmem:[#allocation1 + $0x2] ss:$9 sm:$0xff] %v2611_v5  ;;  %v1403_v62 = vadd.f32 %v7378_v57, %v7377_v13  ;;  %v2251_v5 = vmul.f32 %v4970_v15, %v2187_v9  ;;  %v2620_v15 = vperm.slane %v2308_v0, 3  ;;  %v2622_v57 = vperm.slane %v2308_v0, 5 }
 0x1f8   : > { %3141 = vst [vmem:[#allocation1 + $0x3] ss:$9 sm:$0xff] %v2612_v31  ;;  %2376 = vadd.xlane.f32.xlu1 %v2375_v2  ;;  %2406 = vadd.xlane.f32.xlu2 %v2405_v25  ;;  %v2256_v31 = vmul.f32 %v4979_v36, %v6102_v50  ;;  %v6331_v49 = vpop.f32.mrf.mxu2  ;;  %v2618_v50 = vperm.slane %v2308_v0, 1  ;;  %v2619_v2 = vperm.slane %v2308_v0, 2  ;;  %v2621_v25 = vperm.slane %v2308_v0, 4  ;;  %v7382_v36 = vld [vmem:[#allocation5_spill] sm:$0xff] }
 0x1f9   : > { %3142 = vst [vmem:[#allocation1 + $0x4] ss:$9 sm:$0xff] %v2613_v4  ;;  %2391 = vadd.xlane.f32.xlu0 %v2390_v45  ;;  %v1491_v14 = vadd.f32 %v6123_v28, %v1403_v62  ;;  %v1555_v4 = vunpack.c.l.bf16 %v6139_v23  ;;  %v6333_v61 = vpop.f32.mrf.mxu3  ;;  %v2399_v23 = vsel %vm734_vm0, %v2251_v5, 0.0  ;;  %v4986_v45 = vunpack.c.l.bf16 %v6324_v29 }
 0x1fa   : > { %3143 = vst [vmem:[#allocation1 + $0x5] ss:$9 sm:$0xff] %v2614_v41  ;;  %v4966_v41 = vunpack.c.l.bf16 %v6246_v42  ;;  %v2414_v44 = vsel %vm734_vm0, %v2256_v31, 0.0  ;;  %v469_v42 = vld [vmem:[%s5461_s30 + $0xac] sm:$0xf]  ;;  %v1484_v13 = vadd.f32 %v6123_v28, %v7382_v36  ;;  %v1494_v5 = vadd.f32 %v6123_v28, %v1410_v21 }
 0x1fb   : > { %3144 = vst [vmem:[#allocation1 + $0x6] ss:$9 sm:$0xff] %v2615_v1  ;;  %v2185_v1 = vsel %vm2121_vm9, %v1481_v10, %v1545_v35  ;;  %v2195_v9 = vsel %vm2131_vm10, %v1491_v14, %v1555_v4  ;;  %v1548_v12 = vunpack.c.l.bf16 %v469_v42  ;;  %v2624_v35 = vperm.slane %v2308_v0, 7 }
 0x1fc   : > { %3145 = vst [vmem:[#allocation1 + $0x7] ss:$9 sm:$0xff] %v2616_v52  ;;  %v4975_v52 = vunpack.c.h.bf16 %v6273_v17  ;;  %v2249_v17 = vmul.f32 %v4966_v41, %v2185_v1  ;;  %v2259_v10 = vmul.f32 %v4986_v45, %v2195_v9  ;;  %v2257_v42 = vmul.f32 %v4982_v3, %v6115_v46  ;;  %v6408_v3 = vld [vmem:[%s5787_s17 + $0xd8] sm:$0xff]  }
 0x1fd   : > { %v2188_v4 = vsel %vm2124_vm11, %v1484_v13, %v1548_v12  ;;  %v4978_v36 = vunpack.c.l.bf16 %v6308_v51  ;;  %v7385_v13 = vld [vmem:[#allocation15_spill] sm:$0xff]  ;;  %v1413_v12 = vadd.f32 %v6171_v27, %v6169_v58  ;;  %vm3825_vm9 = vcmask 195712  }
 0x1fe   : > { %v2254_v62 = vmul.f32 %v4975_v52, %v6089_v19  ;;  %v2393_v31 = vsel %vm734_vm0, %v2249_v17, 0.0  ;;  %v4971_v19 = vunpack.c.h.bf16 %v6294_v32  ;;  %v2423_v0 = vsel %vm734_vm0, %v2259_v10, 0.0  ;;  %v2311_v52 = vpop.xlane.xlu0 %2310  ;;  %v6398_v27 = vld [vmem:[%s5461_s30 + $0xec] sm:$0xff]  }
 0x1ff   : > { %v1418_v32 = vadd.f32 %v6228_v37, %v6226_v63  ;;  %v2626_v63 = vperm.slane %v2311_v52, 1  ;;  %vm2137_vm13 = vcmp.eq.s32.totalorder %v7385_v13, 1  ;;  %v2417_v46 = vsel %vm734_vm0, %v2257_v42, 0.0 }
 0x200   : > { %2385 = vadd.xlane.f32.xlu1 %v2384_v16  ;;  %2415 = vadd.xlane.f32.xlu2 %v2414_v44  ;;  %v2408_v14 = vsel %vm734_vm0, %v2254_v62, 0.0  ;;  %v7384_v16 = vld [vmem:[#allocation13_spill] sm:$0xff]  ;;  %v4987_v62 = vunpack.c.h.bf16 %v6324_v29  ;;  %v2628_v8 = vperm.slane %v2311_v52, 3  ;;  %v2629_v10 = vperm.slane %v2311_v52, 4 }
 0x201   : > { %2400 = vadd.xlane.f32.xlu0 %v2399_v23  ;;  %vm2134_vm12 = vcmp.eq.s32.totalorder %v7384_v16, 1  ;;  %v6370_v23 = vpop.f32.mrf.mxu3  ;;  %v6373_v44 = vld [vmem:[%s5461_s30 + $0xe0] sm:$0xff]   ;;  %v1497_v21 = vadd.f32 %v6123_v28, %v1418_v32  ;;  %v2255_v58 = vmul.f32 %v4978_v36, %v6104_v33  ;;  %v1420_v42 = vadd.f32 %v6264_v56, %v6262_v22 }
 0x202   : > { %v2198_v1 = vsel %vm2134_vm12, %v1494_v5, %v1558_v55  ;;  %v1561_v9 = vunpack.c.l.bf16 %v6373_v44  ;;  %v1425_v5 = vadd.f32 %v6333_v61, %v6331_v49  ;;  %v2631_v55 = vperm.slane %v2311_v52, 6  ;;  %v7386_v32 = vld [vmem:[#allocation17_spill] sm:$0xff] }
 0x203   : > { %v6329_v26 = vld [vmem:[#allocation1] sm:$0xff]  ;;  %v2260_v49 = vmul.f32 %v4987_v62, %v6145_v54  ;;  %v1495_v61 = vadd.f32 %v6123_v28, %v1413_v12  ;;  %v4983_v54 = vunpack.c.h.bf16 %v6352_v59  ;;  %vm2140_vm14 = vcmp.eq.s32.totalorder %v7386_v32, 1 }
 0x204   : > { %3147 = vst [vmem:[#allocation1] ss:$9 sm:$0xff] %v2617_v38  ;;  %v6361_v38 = vld [vmem:[%s5787_s17 + $0xd0] sm:$0xff]   ;;  %v2201_v29 = vsel %vm2137_vm13, %v1497_v21, %v1561_v9  ;;  %v1500_v16 = vadd.f32 %v6123_v28, %v1425_v5  ;;  %v1498_v36 = vadd.f32 %v6123_v28, %v1420_v42  ;;  %v4995_v32 = vunpack.c.h.bf16 %v6408_v3 }
 0x205   : > { %3148 = vst [vmem:[#allocation1 + $0x1] ss:$9 sm:$0xff] %v2618_v50  ;;  %v4991_v41 = vunpack.c.h.bf16 %v6361_v38  ;;  %v6368_v50 = vpop.f32.mrf.mxu2  ;;  %vm3829_vm10 = vcmask 261312   ;;  %vm3833_vm11 = vcmask 326912   ;;  %vm3837_vm12 = vcmask 392512  }
 0x206   : > { %3149 = vst [vmem:[#allocation1 + $0x2] ss:$9 sm:$0xff] %v2619_v2  ;;  %v2252_v2 = vmul.f32 %v4971_v19, %v2188_v4  ;;  %v1559_v4 = vunpack.c.h.bf16 %v6345_v40  ;;  %v2426_v40 = vsel %vm734_vm0, %v2260_v49, 0.0  ;;  %vm3841_vm13 = vcmask 458112  }
 0x207   : > { %3150 = vst [vmem:[#allocation1 + $0x3] ss:$9 sm:$0xff] %v2620_v15  ;;  %v2262_v45 = vmul.f32 %v4991_v41, %v2198_v1  ;;  %v2625_v15 = vperm.slane %v2311_v52, 0  ;;  %v2411_v41 = vsel %vm734_vm0, %v2255_v58, 0.0  ;;  %v7387_v1 = vld [vmem:[#allocation18_spill] sm:$0xff] }
 0x208   : > { %3151 = vst [vmem:[#allocation1 + $0x4] ss:$9 sm:$0xff] %v2621_v25  ;;  %2394 = vadd.xlane.f32.xlu1 %v2393_v31  ;;  %2424 = vadd.xlane.f32.xlu2 %v2423_v0  ;;  %v6379_v25 = vld [vmem:[%s5787_s17 + $0xe0] sm:$0xff]   ;;  %v2402_v17 = vsel %vm734_vm0, %v2252_v2, 0.0  ;;  %v1564_v0 = vunpack.c.l.bf16 %v6398_v27  ;;  %vm2135_vm15 = vcmp.eq.s32.totalorder %v7387_v1, 1  ;;  %v6419_v2 = vld [vmem:[%s5787_s17 + $0xe8] sm:$0xff]  }
 0x209   : > { %3152 = vst [vmem:[#allocation1 + $0x5] ss:$9 sm:$0xff] %v2622_v57  ;;  %2409 = vadd.xlane.f32.xlu0 %v2408_v14  ;;  %v2627_v57 = vperm.slane %v2311_v52, 2  ;;  %v4998_v51 = vunpack.c.l.bf16 %v6379_v25  ;;  %v6402_v19 = vpop.f32.mrf.mxu3  ;;  %v2632_v14 = vperm.slane %v2311_v52, 7  ;;  %v5003_v59 = vunpack.c.h.bf16 %v6419_v2 }
 0x20a   : > { %3153 = vst [vmem:[#allocation1 + $0x6] ss:$9 sm:$0xff] %v2623_v11  ;;  %v2432_v11 = vsel %vm734_vm0, %v2262_v45, 0.0  ;;  %v2199_v45 = vsel %vm2135_vm15, %v1495_v61, %v1559_v4  ;;  %v2204_v9 = vsel %vm2140_vm14, %v1500_v16, %v1564_v0  ;;  %v6449_v16 = vld [vmem:[%s5787_s17 + $0xf0] sm:$0xff]   ;;  %v7388_v0 = vld [vmem:[#allocation12_spill] sm:$0xff]  ;;  %vm3845_vm14 = vcmask 523712  }
 0x20b   : > { %3154 = vst [vmem:[#allocation1 + $0x7] ss:$9 sm:$0xff] %v2624_v35  ;;  %v2630_v35 = vperm.slane %v2311_v52, 5  ;;  %v2265_v33 = vmul.f32 %v4998_v51, %v2201_v29  ;;  %v4994_v52 = vunpack.c.l.bf16 %v6408_v3  ;;  %v4990_v51 = vunpack.c.l.bf16 %v6361_v38  ;;  %v481_v38 = vld [vmem:[%s5461_s30 + $0xdc] sm:$0xf] }
 0x20c   : > { %v4999_v29 = vunpack.c.h.bf16 %v6379_v25  ;;  %v1560_v43 = vunpack.c.l.bf16 %v481_v38  ;;  %vm2136_vm3 = vcmp.eq.s32.totalorder %v7388_v0, 1  ;;  %v5006_v42 = vunpack.c.l.bf16 %v6449_v16 }
 0x20d   : > { %v6400_v31 = vpop.f32.mrf.mxu2  ;;  %v2441_v21 = vsel %vm734_vm0, %v2265_v33, 0.0  ;;  %v2261_v25 = vmul.f32 %v4990_v51, %v6164_v60  ;;  %v1565_v33 = vunpack.c.h.bf16 %v6398_v27  ;;  %v488_v60 = vld [vmem:[%s5461_s30 + $0xf4] sm:$0xff]   ;;  %v2646_v51 = vperm.slane %v2317_v24, 5 }
 0x20e   : > { %v1567_v1 = vunpack.c.h.bf16 %v488_v60  ;;  %v5042_v27 = vld [vmem:[%s5787_s17 + $0xf8] sm:$0xff]   ;;  %vm3849_vm15 = vcmask 589312  }
 0x210   : > { %2403 = vadd.xlane.f32.xlu1 %v2402_v17  ;;  %2433 = vadd.xlane.f32.xlu2 %v2432_v11  ;;  %v2263_v17 = vmul.f32 %v4994_v52, %v2199_v45  ;;  %v5010_v45 = vunpack.c.l.bf16 %v5042_v27 }
 0x211   : > { %2418 = vadd.xlane.f32.xlu0 %v2417_v46  ;;  %v2268_v46 = vmul.f32 %v5003_v59, %v2204_v9  ;;  %v1432_v12 = vpop.f32.mrf.mxu3  ;;  %v2641_v9 = vperm.slane %v2317_v24, 0 }
 0x212   : > { %v6381_v37 = vld [vmem:[#allocation1] sm:$0xff]  ;;  %v2435_v5 = vsel %vm734_vm0, %v2263_v17, 0.0 }
 0x213   : > { %3156 = vst [vmem:[#allocation1] ss:$9 sm:$0xff] %v2625_v15  ;;  %v2314_v15 = vpop.xlane.xlu1 %2313  ;;  %v2450_v58 = vsel %vm734_vm0, %v2268_v46, 0.0  ;;  %v2643_v46 = vperm.slane %v2317_v24, 2 }
 0x214   : > { %3157 = vst [vmem:[#allocation1 + $0x1] ss:$9 sm:$0xff] %v2626_v63  ;;  %v2258_v63 = vmul.f32 %v4983_v54, %v6130_v53  ;;  %v2633_v13 = vperm.slane %v2314_v15, 0  ;;  %v2634_v56 = vperm.slane %v2314_v15, 1  ;;  %v2635_v11 = vperm.slane %v2314_v15, 2 }
 0x215   : > { %3158 = vst [vmem:[#allocation1 + $0x2] ss:$9 sm:$0xff] %v2627_v57  ;;  %v1562_v57 = vunpack.c.h.bf16 %v6373_v44  ;;  %v995_v62 = vpop.f32.mrf.mxu2  ;;  %v2637_v44 = vperm.slane %v2314_v15, 4  ;;  %v2639_v49 = vperm.slane %v2314_v15, 6  ;;  %v2429_v54 = vsel %vm734_vm0, %v2261_v25, 0.0 }
 0x216   : > { %3159 = vst [vmem:[#allocation1 + $0x3] ss:$9 sm:$0xff] %v2628_v8  ;;  %v1415_v8 = vadd.f32 %v6194_v34, %v6192_v7  ;;  %v2420_v53 = vsel %vm734_vm0, %v2258_v63, 0.0  ;;  %v1433_v7 = vadd.f32 %v1432_v12, %v995_v62  ;;  %v2645_v12 = vperm.slane %v2317_v24, 4 }
 0x217   : > { %3160 = vst [vmem:[#allocation1 + $0x4] ss:$9 sm:$0xff] %v2629_v10  ;;  %v2636_v10 = vperm.slane %v2314_v15, 3  ;;  %v2202_v34 = vsel %vm2138_vm1, %v1498_v36, %v1562_v57  ;;  %v2642_v57 = vperm.slane %v2317_v24, 1  ;;  %vm3853_vm1 = vcmask 654912  }
 0x218   : > { %3161 = vst [vmem:[#allocation1 + $0x5] ss:$9 sm:$0xff] %v2630_v35  ;;  %2412 = vadd.xlane.f32.xlu1 %v2411_v41  ;;  %2442 = vadd.xlane.f32.xlu2 %v2441_v21  ;;  %v1428_v35 = vadd.f32 %v6370_v23, %v6368_v50  ;;  %v1496_v61 = vadd.f32 %v6123_v28, %v1415_v8  ;;  %v2640_v50 = vperm.slane %v2314_v15, 7 }
 0x219   : > { %3162 = vst [vmem:[#allocation1 + $0x6] ss:$9 sm:$0xff] %v2631_v55  ;;  %2427 = vadd.xlane.f32.xlu0 %v2426_v40  ;;  %v2638_v55 = vperm.slane %v2314_v15, 5  ;;  %v2266_v23 = vmul.f32 %v4999_v29, %v2202_v34  ;;  %v1503_v4 = vadd.f32 %v6123_v28, %v1433_v7  ;;  %v1423_v41 = vadd.f32 %v6299_v6, %v6297_v20  ;;  %v484_v20 = vld [vmem:[%s5461_s30 + $0xe8] sm:$0xf]  ;;  %v2320_v34 = vpop.xlane.xlu0 %2319 }
 0x21a   : > { %3163 = vst [vmem:[#allocation1 + $0x7] ss:$9 sm:$0xff] %v2632_v14  ;;  %v1501_v14 = vadd.f32 %v6123_v28, %v1428_v35  ;;  %v2200_v52 = vsel %vm2136_vm3, %v1496_v61, %v1560_v43  ;;  %v1563_v36 = vunpack.c.l.bf16 %v484_v20  ;;  %v1430_v8 = vadd.f32 %v6402_v19, %v6400_v31  ;;  %v7390_v31 = vld [vmem:[#allocation16_spill] sm:$0xff] }
 0x21b   : > { %v2444_v40 = vsel %vm734_vm0, %v2266_v23, 0.0  ;;  %v2207_v59 = vsel %vm2143_vm2, %v1503_v4, %v1567_v1  ;;  %v1499_v15 = vadd.f32 %v6123_v28, %v1423_v41  ;;  %v2264_v3 = vmul.f32 %v4995_v32, %v2200_v52 }
 0x21c   : > { %v2205_v21 = vsel %vm2141_vm4, %v1501_v14, %v1565_v33  ;;  %v2271_v6 = vmul.f32 %v5010_v45, %v2207_v59  ;;  %v5002_v28 = vunpack.c.l.bf16 %v6419_v2  ;;  %v5207_v2 = vld [vmem:[%s7346_s6] ss:$0 sm:$0xff]  ;;  %v1566_v35 = vunpack.c.l.bf16 %v488_v60  ;;  %v7391_v45 = vld [vmem:[#allocation19_spill] sm:$0xff] }
 0x21d   : > { %v2269_v63 = vmul.f32 %v5006_v42, %v2205_v21  ;;  %v2438_v62 = vsel %vm734_vm0, %v2264_v3, 0.0  ;;  %v1502_v29 = vadd.f32 %v5207_v2, %v1430_v8  ;;  %vm2142_vm6 = vcmp.eq.s32.totalorder %v7390_v31, 1  ;;  %v7392_v3 = vld [vmem:[#allocation21_spill] sm:$0xff] }
 0x21e   : > { %v2459_v17 = vsel %vm734_vm0, %v2271_v6, 0.0  ;;  %v5007_v7 = vunpack.c.h.bf16 %v6449_v16  ;;  %v2649_v38 = vperm.slane %v2320_v34, 0  ;;  %v2650_v25 = vperm.slane %v2320_v34, 1  ;;  %v2323_v16 = vpop.xlane.xlu1 %2322 }
 0x21f   : > { %v2651_v61 = vperm.slane %v2320_v34, 2  ;;  %v2653_v23 = vperm.slane %v2320_v34, 4  ;;  %v2654_v14 = vperm.slane %v2320_v34, 5  ;;  %v2655_v4 = vperm.slane %v2320_v34, 6 }
 0x220   : > { %2421 = vadd.xlane.f32.xlu1 %v2420_v53  ;;  %2451 = vadd.xlane.f32.xlu2 %v2450_v58  ;;  %v2206_v58 = vsel %vm2142_vm6, %v1502_v29, %v1566_v35  ;;  %v2656_v33 = vperm.slane %v2320_v34, 7  ;;  %v2657_v0 = vperm.slane %v2323_v16, 0  ;;  %v2658_v41 = vperm.slane %v2323_v16, 1 }
 0x221   : > { %v6429_v22 = vld [vmem:[#allocation1] sm:$0xff]  ;;  %2436 = vadd.xlane.f32.xlu0 %v2435_v5  ;;  %v2660_v32 = vperm.slane %v2323_v16, 3  ;;  %v2661_v1 = vperm.slane %v2323_v16, 4  ;;  %v2662_v27 = vperm.slane %v2323_v16, 5  ;;  %v2664_v52 = vperm.slane %v2323_v16, 7 }
 0x222   : > { %3165 = vst [vmem:[#allocation1] ss:$9 sm:$0xff] %v2633_v13  ;;  %vm3857_vm2 = vcmask 720512   ;;  %vm3861_vm3 = vcmask 786112   ;;  %vm3865_vm4 = vcmask 851712   ;;  %vm3873_vm6 = vcmask 982912  }
 0x223   : > { %3166 = vst [vmem:[#allocation1 + $0x1] ss:$9 sm:$0xff] %v2634_v56  ;;  %v7389_v56 = vld [vmem:[#allocation14_spill] sm:$0xff] }
 0x224   : > { %3167 = vst [vmem:[#allocation1 + $0x2] ss:$9 sm:$0xff] %v2635_v11  ;;  %vm2139_vm5 = vcmp.eq.s32.totalorder %v7389_v56, 1  ;;  %v2453_v11 = vsel %vm734_vm0, %v2269_v63, 0.0 }
 0x225   : > { %3168 = vst [vmem:[#allocation1 + $0x3] ss:$9 sm:$0xff] %v2636_v10  ;;  %v2203_v53 = vsel %vm2139_vm5, %v1499_v15, %v1563_v36  ;;  %v2647_v10 = vperm.slane %v2317_v24, 6  ;;  %vm3869_vm5 = vcmask 917312  }
 0x226   : > { %3169 = vst [vmem:[#allocation1 + $0x4] ss:$9 sm:$0xff] %v2637_v44  ;;  %v2648_v44 = vperm.slane %v2317_v24, 7  ;;  %v2267_v5 = vmul.f32 %v5002_v28, %v2203_v53 }
 0x227   : > { %3170 = vst [vmem:[#allocation1 + $0x5] ss:$9 sm:$0xff] %v2638_v55  ;;  %v2270_v55 = vmul.f32 %v5007_v7, %v2206_v58 }
 0x228   : > { %3171 = vst [vmem:[#allocation1 + $0x6] ss:$9 sm:$0xff] %v2639_v49  ;;  %2430 = vadd.xlane.f32.xlu1 %v2429_v54  ;;  %2460 = vadd.xlane.f32.xlu2 %v2459_v17  ;;  %v2447_v19 = vsel %vm734_vm0, %v2267_v5, 0.0  ;;  %v2659_v54 = vperm.slane %v2323_v16, 2 }
 0x229   : > { %3172 = vst [vmem:[#allocation1 + $0x7] ss:$9 sm:$0xff] %v2640_v50  ;;  %2445 = vadd.xlane.f32.xlu0 %v2444_v40  ;;  %v2652_v50 = vperm.slane %v2320_v34, 3  ;;  %v2456_v43 = vsel %vm734_vm0, %v2270_v55, 0.0  ;;  %v2663_v40 = vperm.slane %v2323_v16, 6 }
 0x230   : > { %v6467_v13 = vld [vmem:[#allocation1] sm:$0xff]  ;;  %2439 = vadd.xlane.f32.xlu1 %v2438_v62 }
 0x231   : > { %3174 = vst [vmem:[#allocation1] ss:$9 sm:$0xff] %v2641_v9  ;;  %2454 = vadd.xlane.f32.xlu0 %v2453_v11  ;;  %v2329_v9 = vpop.xlane.xlu0 %2328 }
 0x232   : > { %3175 = vst [vmem:[#allocation1 + $0x1] ss:$9 sm:$0xff] %v2642_v57  ;;  %v2673_v63 = vperm.slane %v2329_v9, 0  ;;  %v2674_v36 = vperm.slane %v2329_v9, 1  ;;  %v7393_v57 = vld [vmem:[#allocation23_spill] sm:$0xff]  ;;  %v2677_v56 = vperm.slane %v2329_v9, 4 }
 0x233   : > { %3176 = vst [vmem:[#allocation1 + $0x2] ss:$9 sm:$0xff] %v2643_v46  ;;  %v2675_v46 = vperm.slane %v2329_v9, 2  ;;  %v2679_v62 = vperm.slane %v2329_v9, 6  ;;  %v2680_v28 = vperm.slane %v2329_v9, 7 }
 0x234   : > { %3177 = vst [vmem:[#allocation1 + $0x3] ss:$9 sm:$0xff] %v2644_v30  ;;  %v2678_v30 = vperm.slane %v2329_v9, 5 }
 0x235   : > { %3178 = vst [vmem:[#allocation1 + $0x4] ss:$9 sm:$0xff] %v2645_v12  ;;  %v2332_v12 = vpop.xlane.xlu1 %2331 }
 0x236   : > { %3179 = vst [vmem:[#allocation1 + $0x5] ss:$9 sm:$0xff] %v2646_v51  ;;  %v2681_v8 = vperm.slane %v2332_v12, 0  ;;  %v2682_v53 = vperm.slane %v2332_v12, 1  ;;  %v2683_v51 = vperm.slane %v2332_v12, 2  ;;  %v2686_v5 = vperm.slane %v2332_v12, 5 }
 0x237   : > { %3180 = vst [vmem:[#allocation1 + $0x6] ss:$9 sm:$0xff] %v2647_v10  ;;  %v2684_v10 = vperm.slane %v2332_v12, 3  ;;  %v2687_v2 = vperm.slane %v2332_v12, 6  ;;  %v2688_v29 = vperm.slane %v2332_v12, 7 }
 0x238   : > { %3181 = vst [vmem:[#allocation1 + $0x7] ss:$9 sm:$0xff] %v2648_v44  ;;  %2448 = vadd.xlane.f32.xlu1 %v2447_v19  ;;  %v2685_v44 = vperm.slane %v2332_v12, 4 }
 0x23f   : > { %v3182_v49 = vld [vmem:[#allocation1] sm:$0xff] }
 0x240   : > { %3183 = vst [vmem:[#allocation1] ss:$9 sm:$0xff] %v2649_v38  ;;  %2457 = vadd.xlane.f32.xlu1 %v2456_v43  ;;  %3628 = vperm.xlu2 %5204, %v6076_v39   ;;  %v2326_v39 = vpop.xlane.xlu2 %2325 }
 0x241   : > { %3184 = vst [vmem:[#allocation1 + $0x1] ss:$9 sm:$0xff] %v2650_v25  ;;  %v2665_v42 = vperm.slane %v2326_v39, 0  ;;  %v2666_v21 = vperm.slane %v2326_v39, 1  ;;  %v2668_v59 = vperm.slane %v2326_v39, 3  ;;  %v2669_v20 = vperm.slane %v2326_v39, 4 }
 0x242   : > { %3185 = vst [vmem:[#allocation1 + $0x2] ss:$9 sm:$0xff] %v2651_v61  ;;  %v2670_v6 = vperm.slane %v2326_v39, 5  ;;  %v2671_v15 = vperm.slane %v2326_v39, 6 }
 0x243   : > { %3186 = vst [vmem:[#allocation1 + $0x3] ss:$9 sm:$0xff] %v2652_v50 }
 0x244   : > { %3187 = vst [vmem:[#allocation1 + $0x4] ss:$9 sm:$0xff] %v2653_v23 }
 0x245   : > { %3188 = vst [vmem:[#allocation1 + $0x5] ss:$9 sm:$0xff] %v2654_v14 }
 0x246   : > { %3189 = vst [vmem:[#allocation1 + $0x6] ss:$9 sm:$0xff] %v2655_v4 }
 0x247   : > { %3190 = vst [vmem:[#allocation1 + $0x7] ss:$9 sm:$0xff] %v2656_v33 }
 0x248   : > { %3640 = vperm.xlu2 %5204, %v6134_v18   ;;  %v2667_v18 = vperm.slane %v2326_v39, 2 }
 0x24e   : > { %v6483_v60 = vld [vmem:[#allocation1] sm:$0xff] }
 0x24f   : > { %3192 = vst [vmem:[#allocation1] ss:$9 sm:$0xff] %v2657_v0  ;;  %v1760_v0 = vld [vmem:[%s5455_s23 + $0x1f8] sm:$0xff] }
 0x250   : > { %3193 = vst [vmem:[#allocation1 + $0x1] ss:$9 sm:$0xff] %v2658_v41  ;;  %3649 = vperm.xlu2 %5204, %v6230_v48   ;;  %v2672_v48 = vperm.slane %v2326_v39, 7  ;;  %vm1824_vm7 = vcmp.gt.f32.partialorder %v1760_v0, 0.0 }
 0x251   : > { %3194 = vst [vmem:[#allocation1 + $0x2] ss:$9 sm:$0xff] %v2659_v54  ;;  %v2341_v54 = vpop.xlane.xlu1 %2340 }
 0x252   : > { %3195 = vst [vmem:[#allocation1 + $0x3] ss:$9 sm:$0xff] %v2660_v32  ;;  %v2705_v32 = vperm.slane %v2341_v54, 0  ;;  %v2709_v39 = vperm.slane %v2341_v54, 4 }
 0x253   : > { %3196 = vst [vmem:[#allocation1 + $0x4] ss:$9 sm:$0xff] %v2661_v1 }
 0x254   : > { %3197 = vst [vmem:[#allocation1 + $0x5] ss:$9 sm:$0xff] %v2662_v27  ;;  %v2706_v27 = vperm.slane %v2341_v54, 1 }
 0x255   : > { %3198 = vst [vmem:[#allocation1 + $0x6] ss:$9 sm:$0xff] %v2663_v40  ;;  %v2707_v40 = vperm.slane %v2341_v54, 2 }
 0x256   : > { %3199 = vst [vmem:[#allocation1 + $0x7] ss:$9 sm:$0xff] %v2664_v52  ;;  %v2708_v52 = vperm.slane %v2341_v54, 3 }
 0x258   : > { %3658 = vperm.xlu2 %5204, %v6381_v37   ;;  %v2676_v37 = vperm.slane %v2329_v9, 3 }
 0x259   : > { %3625 = vperm.xlu1 %5203, %v7391_v45   ;;  %v2710_v45 = vperm.slane %v2341_v54, 5 }
 0x25d   : > { %v6488_v24 = vld [vmem:[#allocation1] sm:$0xff] }
 0x25e   : > { %3201 = vst [vmem:[#allocation1] ss:$9 sm:$0xff] %v2665_v42  ;;  %v7395_v42 = vld [vmem:[#allocation20_spill] sm:$0xff] }
 0x25f   : > { %3202 = vst [vmem:[#allocation1 + $0x1] ss:$9 sm:$0xff] %v2666_v21  ;;  %v2711_v21 = vperm.slane %v2341_v54, 6 }
 0x260   : > { %3203 = vst [vmem:[#allocation1 + $0x2] ss:$9 sm:$0xff] %v2667_v18  ;;  %3667 = vperm.xlu2 %5204, %v3182_v49   ;;  %v2338_v49 = vpop.xlane.xlu0 %2337  ;;  %v2712_v18 = vperm.slane %v2341_v54, 7 }
 0x261   : > { %3204 = vst [vmem:[#allocation1 + $0x3] ss:$9 sm:$0xff] %v2668_v59  ;;  %3634 = vperm.xlu1 %5203, %v7392_v3   ;;  %v2697_v25 = vperm.slane %v2338_v49, 0  ;;  %v2698_v50 = vperm.slane %v2338_v49, 1  ;;  %v2699_v23 = vperm.slane %v2338_v49, 2  ;;  %v2700_v43 = vperm.slane %v2338_v49, 3 }
 0x262   : > { %3205 = vst [vmem:[#allocation1 + $0x4] ss:$9 sm:$0xff] %v2669_v20  ;;  %v2701_v14 = vperm.slane %v2338_v49, 4  ;;  %v2702_v4 = vperm.slane %v2338_v49, 5  ;;  %v2703_v33 = vperm.slane %v2338_v49, 6  ;;  %v2704_v16 = vperm.slane %v2338_v49, 7 }
 0x263   : > { %3206 = vst [vmem:[#allocation1 + $0x5] ss:$9 sm:$0xff] %v2670_v6  ;;  %v7396_v20 = vld [vmem:[#allocation22_spill] sm:$0xff] }
 0x264   : > { %3207 = vst [vmem:[#allocation1 + $0x6] ss:$9 sm:$0xff] %v2671_v15 }
 0x265   : > { %3208 = vst [vmem:[#allocation1 + $0x7] ss:$9 sm:$0xff] %v2672_v48 }
 0x269   : > { %3643 = vperm.xlu1 %5203, %v7393_v57  }
 0x26c   : > { %v3209_v17 = vld [vmem:[#allocation1] sm:$0xff] }
 0x26d   : > { %3210 = vst [vmem:[#allocation1] ss:$9 sm:$0xff] %v2673_v63  ;;  %3676 = vperm.xlu2 %5204, %v3209_v17  }
 0x26e   : > { %3211 = vst [vmem:[#allocation1 + $0x1] ss:$9 sm:$0xff] %v2674_v36 }
 0x26f   : > { %3212 = vst [vmem:[#allocation1 + $0x2] ss:$9 sm:$0xff] %v2675_v46  ;;  %v2347_v46 = vpop.xlane.xlu0 %2346 }
 0x270   : > { %3213 = vst [vmem:[#allocation1 + $0x3] ss:$9 sm:$0xff] %v2676_v37  ;;  %v2721_v37 = vperm.slane %v2347_v46, 0  ;;  %v2725_v12 = vperm.slane %v2347_v46, 4 }
 0x271   : > { %3214 = vst [vmem:[#allocation1 + $0x4] ss:$9 sm:$0xff] %v2677_v56  ;;  %3652 = vperm.xlu1 %5203, %v6280_v47   ;;  %v2335_v47 = vpop.xlane.xlu2 %2334 }
 0x272   : > { %3215 = vst [vmem:[#allocation1 + $0x5] ss:$9 sm:$0xff] %v2678_v30  ;;  %v2689_v35 = vperm.slane %v2335_v47, 0  ;;  %v2690_v19 = vperm.slane %v2335_v47, 1  ;;  %v2692_v7 = vperm.slane %v2335_v47, 3  ;;  %v2693_v34 = vperm.slane %v2335_v47, 4 }
 0x273   : > { %3216 = vst [vmem:[#allocation1 + $0x6] ss:$9 sm:$0xff] %v2679_v62  ;;  %v2694_v58 = vperm.slane %v2335_v47, 5  ;;  %v2695_v38 = vperm.slane %v2335_v47, 6  ;;  %v2696_v55 = vperm.slane %v2335_v47, 7  ;;  %v2722_v30 = vperm.slane %v2347_v46, 1 }
 0x274   : > { %3217 = vst [vmem:[#allocation1 + $0x7] ss:$9 sm:$0xff] %v2680_v28  ;;  %v2723_v62 = vperm.slane %v2347_v46, 2  ;;  %v2724_v28 = vperm.slane %v2347_v46, 3 }
 0x279   : > { %3661 = vperm.xlu1 %5203, %v6429_v22   ;;  %v2691_v22 = vperm.slane %v2335_v47, 2  ;;  %v2344_v59 = vpop.xlane.xlu2 %2343 }
 0x27a   : > { %v2713_v6 = vperm.slane %v2344_v59, 0  ;;  %v2714_v48 = vperm.slane %v2344_v59, 1  ;;  %v2715_v3 = vperm.slane %v2344_v59, 2  ;;  %v2716_v9 = vperm.slane %v2344_v59, 3 }
 0x27b   : > { %v3218_v11 = vld [vmem:[#allocation1] sm:$0xff]  ;;  %v2717_v63 = vperm.slane %v2344_v59, 4  ;;  %v2718_v17 = vperm.slane %v2344_v59, 5  ;;  %v2719_v36 = vperm.slane %v2344_v59, 6  ;;  %v2720_v57 = vperm.slane %v2344_v59, 7 }
 0x27c   : > { %3219 = vst [vmem:[#allocation1] ss:$9 sm:$0xff] %v2681_v8  ;;  %v2726_v8 = vperm.slane %v2347_v46, 5 }
 0x27d   : > { %3220 = vst [vmem:[#allocation1 + $0x1] ss:$9 sm:$0xff] %v2682_v53  ;;  %v2728_v53 = vperm.slane %v2347_v46, 7 }
 0x27e   : > { %3221 = vst [vmem:[#allocation1 + $0x2] ss:$9 sm:$0xff] %v2683_v51  ;;  %v2350_v51 = vpop.xlane.xlu1 %2349 }
 0x27f   : > { %3222 = vst [vmem:[#allocation1 + $0x3] ss:$9 sm:$0xff] %v2684_v10  ;;  %v2729_v10 = vperm.slane %v2350_v51, 0  ;;  %v2733_v47 = vperm.slane %v2350_v51, 4 }
 0x280   : > { %3223 = vst [vmem:[#allocation1 + $0x4] ss:$9 sm:$0xff] %v2685_v44 }
 0x281   : > { %3224 = vst [vmem:[#allocation1 + $0x5] ss:$9 sm:$0xff] %v2686_v5  ;;  %3670 = vperm.xlu1 %5203, %v6483_v60   ;;  %v7394_v60 = vmov 0   ;;  %v2730_v5 = vperm.slane %v2350_v51, 1 }
 0x282   : > { %3225 = vst [vmem:[#allocation1 + $0x6] ss:$9 sm:$0xff] %v2687_v2  ;;  %v1888_v41 = vsel %vm1824_vm7, 1, %v7394_v60  ;;  %v2731_v2 = vperm.slane %v2350_v51, 2  ;;  %vm3877_vm7 = vcmask 1048512  }
 0x283   : > { %3226 = vst [vmem:[#allocation1 + $0x7] ss:$9 sm:$0xff] %v2688_v29  ;;  %2079 = vperm.xlu0 %5202, %v1888_v41   ;;  %v2732_v29 = vperm.slane %v2350_v51, 3 }
 0x289   : > { %3679 = vperm.xlu1 %5203, %v3218_v11   ;;  %v2727_v11 = vperm.slane %v2347_v46, 6 }
 0x28a   : > { %v6496_v31 = vld [vmem:[#allocation1] sm:$0xff] }
 0x28b   : > { %3228 = vst [vmem:[#allocation1] ss:$9 sm:$0xff] %v2689_v35  ;;  %3631 = vperm.xlu0 %5202, %v7395_v42   ;;  %v2734_v35 = vperm.slane %v2350_v51, 5 }
 0x28c   : > { %3229 = vst [vmem:[#allocation1 + $0x1] ss:$9 sm:$0xff] %v2690_v19  ;;  %v2735_v19 = vperm.slane %v2350_v51, 6 }
 0x28d   : > { %3230 = vst [vmem:[#allocation1 + $0x2] ss:$9 sm:$0xff] %v2691_v22  ;;  %v2736_v22 = vperm.slane %v2350_v51, 7 }
 0x28e   : > { %3231 = vst [vmem:[#allocation1 + $0x3] ss:$9 sm:$0xff] %v2692_v7  ;;  %v2353_v7 = vpop.xlane.xlu2 %2352 }
 0x28f   : > { %3232 = vst [vmem:[#allocation1 + $0x4] ss:$9 sm:$0xff] %v2693_v34  ;;  %v2737_v34 = vperm.slane %v2353_v7, 0  ;;  %v2740_v49 = vperm.slane %v2353_v7, 3 }
 0x290   : > { %3233 = vst [vmem:[#allocation1 + $0x5] ss:$9 sm:$0xff] %v2694_v58 }
 0x291   : > { %3234 = vst [vmem:[#allocation1 + $0x6] ss:$9 sm:$0xff] %v2695_v38  ;;  %v2738_v38 = vperm.slane %v2353_v7, 1 }
 0x292   : > { %3235 = vst [vmem:[#allocation1 + $0x7] ss:$9 sm:$0xff] %v2696_v55  ;;  %v2739_v55 = vperm.slane %v2353_v7, 2 }
 0x293   : > { %3637 = vperm.xlu0 %5202, %v7396_v20  }
 0x296   : > { %v2362_v20 = vpop.xlane.xlu2 %2361 }
 0x297   : > { %v2768_v46 = vperm.slane %v2362_v20, 7 }
 0x299   : > { %v3236_v61 = vld [vmem:[#allocation1] sm:$0xff] }
 0x29a   : > { %3237 = vst [vmem:[#allocation1] ss:$9 sm:$0xff] %v2697_v25  ;;  %3685 = vperm.xlu2 %5204, %v3236_v61   ;;  %v2741_v25 = vperm.slane %v2353_v7, 4  ;;  %v2742_v61 = vperm.slane %v2353_v7, 5 }
 0x29b   : > { %3238 = vst [vmem:[#allocation1 + $0x1] ss:$9 sm:$0xff] %v2698_v50  ;;  %v2743_v50 = vperm.slane %v2353_v7, 6 }
 0x29c   : > { %3239 = vst [vmem:[#allocation1 + $0x2] ss:$9 sm:$0xff] %v2699_v23  ;;  %v2744_v23 = vperm.slane %v2353_v7, 7 }
 0x29d   : > { %3240 = vst [vmem:[#allocation1 + $0x3] ss:$9 sm:$0xff] %v2700_v43  ;;  %v2356_v43 = vpop.xlane.xlu0 %2355 }
 0x29e   : > { %3241 = vst [vmem:[#allocation1 + $0x4] ss:$9 sm:$0xff] %v2701_v14  ;;  %v2745_v14 = vperm.slane %v2356_v43, 0  ;;  %v2748_v0 = vperm.slane %v2356_v43, 3  ;;  %v2749_v60 = vperm.slane %v2356_v43, 4  ;;  %v2750_v41 = vperm.slane %v2356_v43, 5 }
 0x29f   : > { %3242 = vst [vmem:[#allocation1 + $0x5] ss:$9 sm:$0xff] %v2702_v4  ;;  %v2751_v54 = vperm.slane %v2356_v43, 6 }
 0x2a0   : > { %3243 = vst [vmem:[#allocation1 + $0x6] ss:$9 sm:$0xff] %v2703_v33  ;;  %v2746_v33 = vperm.slane %v2356_v43, 1 }
 0x2a1   : > { %3244 = vst [vmem:[#allocation1 + $0x7] ss:$9 sm:$0xff] %v2704_v16  ;;  %v2747_v16 = vperm.slane %v2356_v43, 2 }
 0x2a8   : > { %v3245_v1 = vld [vmem:[#allocation1] sm:$0xff] }
 0x2a9   : > { %3246 = vst [vmem:[#allocation1] ss:$9 sm:$0xff] %v2705_v32  ;;  %3688 = vperm.xlu1 %5203, %v3245_v1   ;;  %v2752_v32 = vperm.slane %v2356_v43, 7  ;;  %v2359_v1 = vpop.xlane.xlu1 %2358 }
 0x2aa   : > { %3247 = vst [vmem:[#allocation1 + $0x1] ss:$9 sm:$0xff] %v2706_v27  ;;  %v2753_v27 = vperm.slane %v2359_v1, 0  ;;  %v2756_v42 = vperm.slane %v2359_v1, 3  ;;  %v2760_v59 = vperm.slane %v2359_v1, 7 }
 0x2ab   : > { %3248 = vst [vmem:[#allocation1 + $0x2] ss:$9 sm:$0xff] %v2707_v40 }
 0x2ac   : > { %3249 = vst [vmem:[#allocation1 + $0x3] ss:$9 sm:$0xff] %v2708_v52  ;;  %v2754_v52 = vperm.slane %v2359_v1, 1 }
 0x2ad   : > { %3250 = vst [vmem:[#allocation1 + $0x4] ss:$9 sm:$0xff] %v2709_v39  ;;  %v2755_v39 = vperm.slane %v2359_v1, 2 }
 0x2ae   : > { %3251 = vst [vmem:[#allocation1 + $0x5] ss:$9 sm:$0xff] %v2710_v45  ;;  %v2757_v45 = vperm.slane %v2359_v1, 4 }
 0x2af   : > { %3252 = vst [vmem:[#allocation1 + $0x6] ss:$9 sm:$0xff] %v2711_v21  ;;  %v2758_v21 = vperm.slane %v2359_v1, 5 }
 0x2b0   : > { %3253 = vst [vmem:[#allocation1 + $0x7] ss:$9 sm:$0xff] %v2712_v18  ;;  %v2759_v18 = vperm.slane %v2359_v1, 6 }
 0x2b7   : > { %v6502_v15 = vld [vmem:[#allocation1] sm:$0xff] }
 0x2b8   : > { %3255 = vst [vmem:[#allocation1] ss:$9 sm:$0xff] %v2713_v6  ;;  %v2761_v6 = vperm.slane %v2362_v20, 0 }
 0x2b9   : > { %3256 = vst [vmem:[#allocation1 + $0x1] ss:$9 sm:$0xff] %v2714_v48 }
 0x2ba   : > { %3257 = vst [vmem:[#allocation1 + $0x2] ss:$9 sm:$0xff] %v2715_v3  ;;  %v2762_v3 = vperm.slane %v2362_v20, 1 }
 0x2bb   : > { %3258 = vst [vmem:[#allocation1 + $0x3] ss:$9 sm:$0xff] %v2716_v9  ;;  %v2763_v9 = vperm.slane %v2362_v20, 2 }
 0x2bc   : > { %3259 = vst [vmem:[#allocation1 + $0x4] ss:$9 sm:$0xff] %v2717_v63  ;;  %v2764_v63 = vperm.slane %v2362_v20, 3 }
 0x2bd   : > { %3260 = vst [vmem:[#allocation1 + $0x5] ss:$9 sm:$0xff] %v2718_v17  ;;  %v2765_v17 = vperm.slane %v2362_v20, 4 }
 0x2be   : > { %3261 = vst [vmem:[#allocation1 + $0x6] ss:$9 sm:$0xff] %v2719_v36  ;;  %v2766_v36 = vperm.slane %v2362_v20, 5 }
 0x2bf   : > { %3262 = vst [vmem:[#allocation1 + $0x7] ss:$9 sm:$0xff] %v2720_v57  ;;  %v2767_v57 = vperm.slane %v2362_v20, 6 }
 0x2c6   : > { %v3263_v56 = vld [vmem:[#allocation1] sm:$0xff] }
 0x2c7   : > { %3264 = vst [vmem:[#allocation1] ss:$9 sm:$0xff] %v2721_v37  ;;  %3694 = vperm.xlu2 %5204, %v3263_v56   ;;  %v2365_v37 = vpop.xlane.xlu0 %2364 }
 0x2c8   : > { %3265 = vst [vmem:[#allocation1 + $0x1] ss:$9 sm:$0xff] %v2722_v30  ;;  %v2769_v56 = vperm.slane %v2365_v37, 0  ;;  %v2776_v51 = vperm.slane %v2365_v37, 7 }
 0x2c9   : > { %3266 = vst [vmem:[#allocation1 + $0x2] ss:$9 sm:$0xff] %v2723_v62  ;;  %v2770_v62 = vperm.slane %v2365_v37, 1 }
 0x2ca   : > { %3267 = vst [vmem:[#allocation1 + $0x3] ss:$9 sm:$0xff] %v2724_v28  ;;  %v2771_v28 = vperm.slane %v2365_v37, 2 }
 0x2cb   : > { %3268 = vst [vmem:[#allocation1 + $0x4] ss:$9 sm:$0xff] %v2725_v12  ;;  %v2772_v12 = vperm.slane %v2365_v37, 3 }
 0x2cc   : > { %3269 = vst [vmem:[#allocation1 + $0x5] ss:$9 sm:$0xff] %v2726_v8  ;;  %v2773_v8 = vperm.slane %v2365_v37, 4 }
 0x2cd   : > { %3270 = vst [vmem:[#allocation1 + $0x6] ss:$9 sm:$0xff] %v2727_v11  ;;  %v2774_v11 = vperm.slane %v2365_v37, 5 }
 0x2ce   : > { %3271 = vst [vmem:[#allocation1 + $0x7] ss:$9 sm:$0xff] %v2728_v53  ;;  %v2775_v53 = vperm.slane %v2365_v37, 6 }
 0x2d5   : > { %v3272_v44 = vld [vmem:[#allocation1] sm:$0xff] }
 0x2d6   : > { %3273 = vst [vmem:[#allocation1] ss:$9 sm:$0xff] %v2729_v10  ;;  %3697 = vperm.xlu1 %5203, %v3272_v44   ;;  %v2368_v10 = vpop.xlane.xlu1 %2367 }
 0x2d7   : > { %3274 = vst [vmem:[#allocation1 + $0x1] ss:$9 sm:$0xff] %v2730_v5  ;;  %v2777_v44 = vperm.slane %v2368_v10, 0  ;;  %v2784_v7 = vperm.slane %v2368_v10, 7 }
 0x2d8   : > { %3275 = vst [vmem:[#allocation1 + $0x2] ss:$9 sm:$0xff] %v2731_v2  ;;  %v2778_v2 = vperm.slane %v2368_v10, 1 }
 0x2d9   : > { %3276 = vst [vmem:[#allocation1 + $0x3] ss:$9 sm:$0xff] %v2732_v29  ;;  %v2779_v29 = vperm.slane %v2368_v10, 2 }
 0x2da   : > { %3277 = vst [vmem:[#allocation1 + $0x4] ss:$9 sm:$0xff] %v2733_v47  ;;  %v2780_v47 = vperm.slane %v2368_v10, 3 }
 0x2db   : > { %3278 = vst [vmem:[#allocation1 + $0x5] ss:$9 sm:$0xff] %v2734_v35  ;;  %v2781_v35 = vperm.slane %v2368_v10, 4 }
 0x2dc   : > { %3279 = vst [vmem:[#allocation1 + $0x6] ss:$9 sm:$0xff] %v2735_v19  ;;  %v2782_v19 = vperm.slane %v2368_v10, 5 }
 0x2dd   : > { %3280 = vst [vmem:[#allocation1 + $0x7] ss:$9 sm:$0xff] %v2736_v22  ;;  %v2783_v22 = vperm.slane %v2368_v10, 6 }
 0x2e4   : > { %v6504_v58 = vld [vmem:[#allocation1] sm:$0xff] }
 0x2e5   : > { %3282 = vst [vmem:[#allocation1] ss:$9 sm:$0xff] %v2737_v34  ;;  %v2371_v34 = vpop.xlane.xlu2 %2370 }
 0x2e6   : > { %3283 = vst [vmem:[#allocation1 + $0x1] ss:$9 sm:$0xff] %v2738_v38  ;;  %v2785_v38 = vperm.slane %v2371_v34, 0  ;;  %v2791_v43 = vperm.slane %v2371_v34, 6 }
 0x2e7   : > { %3284 = vst [vmem:[#allocation1 + $0x2] ss:$9 sm:$0xff] %v2739_v55  ;;  %v2786_v55 = vperm.slane %v2371_v34, 1 }
 0x2e8   : > { %3285 = vst [vmem:[#allocation1 + $0x3] ss:$9 sm:$0xff] %v2740_v49 }
 0x2e9   : > { %3286 = vst [vmem:[#allocation1 + $0x4] ss:$9 sm:$0xff] %v2741_v25  ;;  %v2787_v25 = vperm.slane %v2371_v34, 2 }
 0x2ea   : > { %3287 = vst [vmem:[#allocation1 + $0x5] ss:$9 sm:$0xff] %v2742_v61  ;;  %v2788_v61 = vperm.slane %v2371_v34, 3 }
 0x2eb   : > { %3288 = vst [vmem:[#allocation1 + $0x6] ss:$9 sm:$0xff] %v2743_v50  ;;  %v2789_v50 = vperm.slane %v2371_v34, 4 }
 0x2ec   : > { %3289 = vst [vmem:[#allocation1 + $0x7] ss:$9 sm:$0xff] %v2744_v23  ;;  %v2790_v23 = vperm.slane %v2371_v34, 5 }
 0x2f3   : > { %v3290_v4 = vld [vmem:[#allocation1] sm:$0xff] }
 0x2f4   : > { %3291 = vst [vmem:[#allocation1] ss:$9 sm:$0xff] %v2745_v14  ;;  %3703 = vperm.xlu2 %5204, %v3290_v4   ;;  %v2792_v14 = vperm.slane %v2371_v34, 7  ;;  %v2374_v4 = vpop.xlane.xlu0 %2373 }
 0x2f5   : > { %3292 = vst [vmem:[#allocation1 + $0x1] ss:$9 sm:$0xff] %v2746_v33  ;;  %v2793_v33 = vperm.slane %v2374_v4, 0  ;;  %v2799_v1 = vperm.slane %v2374_v4, 6 }
 0x2f6   : > { %3293 = vst [vmem:[#allocation1 + $0x2] ss:$9 sm:$0xff] %v2747_v16  ;;  %v2794_v16 = vperm.slane %v2374_v4, 1 }
 0x2f7   : > { %3294 = vst [vmem:[#allocation1 + $0x3] ss:$9 sm:$0xff] %v2748_v0 }
 0x2f8   : > { %3295 = vst [vmem:[#allocation1 + $0x4] ss:$9 sm:$0xff] %v2749_v60  ;;  %v2795_v60 = vperm.slane %v2374_v4, 2 }
 0x2f9   : > { %3296 = vst [vmem:[#allocation1 + $0x5] ss:$9 sm:$0xff] %v2750_v41  ;;  %v2796_v41 = vperm.slane %v2374_v4, 3 }
 0x2fa   : > { %3297 = vst [vmem:[#allocation1 + $0x6] ss:$9 sm:$0xff] %v2751_v54  ;;  %v2797_v54 = vperm.slane %v2374_v4, 4 }
 0x2fb   : > { %3298 = vst [vmem:[#allocation1 + $0x7] ss:$9 sm:$0xff] %v2752_v32  ;;  %v2798_v32 = vperm.slane %v2374_v4, 5 }
 0x302   : > { %v3299_v40 = vld [vmem:[#allocation1] sm:$0xff] }
 0x303   : > { %3300 = vst [vmem:[#allocation1] ss:$9 sm:$0xff] %v2753_v27  ;;  %3706 = vperm.xlu1 %5203, %v3299_v40   ;;  %v2800_v27 = vperm.slane %v2374_v4, 7  ;;  %v2377_v40 = vpop.xlane.xlu1 %2376 }
 0x304   : > { %3301 = vst [vmem:[#allocation1 + $0x1] ss:$9 sm:$0xff] %v2754_v52  ;;  %v2801_v52 = vperm.slane %v2377_v40, 0  ;;  %v2807_v20 = vperm.slane %v2377_v40, 6 }
 0x305   : > { %3302 = vst [vmem:[#allocation1 + $0x2] ss:$9 sm:$0xff] %v2755_v39 }
 0x306   : > { %3303 = vst [vmem:[#allocation1 + $0x3] ss:$9 sm:$0xff] %v2756_v42  ;;  %v2802_v42 = vperm.slane %v2377_v40, 1 }
 0x307   : > { %3304 = vst [vmem:[#allocation1 + $0x4] ss:$9 sm:$0xff] %v2757_v45  ;;  %v2803_v45 = vperm.slane %v2377_v40, 2 }
 0x308   : > { %3305 = vst [vmem:[#allocation1 + $0x5] ss:$9 sm:$0xff] %v2758_v21  ;;  %v2804_v21 = vperm.slane %v2377_v40, 3 }
 0x309   : > { %3306 = vst [vmem:[#allocation1 + $0x6] ss:$9 sm:$0xff] %v2759_v18  ;;  %v2805_v18 = vperm.slane %v2377_v40, 4 }
 0x30a   : > { %3307 = vst [vmem:[#allocation1 + $0x7] ss:$9 sm:$0xff] %v2760_v59  ;;  %v2806_v59 = vperm.slane %v2377_v40, 5 }
 0x311   : > { %v6506_v48 = vld [vmem:[#allocation1] sm:$0xff] }
 0x312   : > { %3309 = vst [vmem:[#allocation1] ss:$9 sm:$0xff] %v2761_v6  ;;  %v2808_v6 = vperm.slane %v2377_v40, 7 }
 0x313   : > { %3310 = vst [vmem:[#allocation1 + $0x1] ss:$9 sm:$0xff] %v2762_v3  ;;  %v2380_v3 = vpop.xlane.xlu2 %2379 }
 0x314   : > { %3311 = vst [vmem:[#allocation1 + $0x2] ss:$9 sm:$0xff] %v2763_v9  ;;  %v2809_v9 = vperm.slane %v2380_v3, 0  ;;  %v2813_v37 = vperm.slane %v2380_v3, 4 }
 0x315   : > { %3312 = vst [vmem:[#allocation1 + $0x3] ss:$9 sm:$0xff] %v2764_v63  ;;  %v2810_v63 = vperm.slane %v2380_v3, 1 }
 0x316   : > { %3313 = vst [vmem:[#allocation1 + $0x4] ss:$9 sm:$0xff] %v2765_v17 }
 0x317   : > { %3314 = vst [vmem:[#allocation1 + $0x5] ss:$9 sm:$0xff] %v2766_v36  ;;  %v2811_v36 = vperm.slane %v2380_v3, 2 }
 0x318   : > { %3315 = vst [vmem:[#allocation1 + $0x6] ss:$9 sm:$0xff] %v2767_v57  ;;  %v2383_v57 = vpop.xlane.xlu0 %2382 }
 0x319   : > { %3316 = vst [vmem:[#allocation1 + $0x7] ss:$9 sm:$0xff] %v2768_v46  ;;  %v2812_v46 = vperm.slane %v2380_v3, 3  ;;  %v2819_v10 = vperm.slane %v2383_v57, 2 }
 0x320   : > { %v3317_v30 = vld [vmem:[#allocation1] sm:$0xff] }
 0x321   : > { %3318 = vst [vmem:[#allocation1] ss:$9 sm:$0xff] %v2769_v56  ;;  %3712 = vperm.xlu2 %5204, %v3317_v30   ;;  %v2814_v56 = vperm.slane %v2380_v3, 5  ;;  %v2815_v30 = vperm.slane %v2380_v3, 6 }
 0x322   : > { %3319 = vst [vmem:[#allocation1 + $0x1] ss:$9 sm:$0xff] %v2770_v62  ;;  %v2816_v62 = vperm.slane %v2380_v3, 7 }
 0x323   : > { %3320 = vst [vmem:[#allocation1 + $0x2] ss:$9 sm:$0xff] %v2771_v28  ;;  %v6512_v28 = vpop.xlane.xlu2 %2388 }
 0x324   : > { %3321 = vst [vmem:[#allocation1 + $0x3] ss:$9 sm:$0xff] %v2772_v12  ;;  %v6514_v12 = vpop.xlane.xlu0 %2391  ;;  %v2837_v40 = vperm.slane %v6512_v28, 4 }
 0x325   : > { %3322 = vst [vmem:[#allocation1 + $0x4] ss:$9 sm:$0xff] %v2773_v8  ;;  %v2817_v8 = vperm.slane %v2383_v57, 0 }
 0x326   : > { %3323 = vst [vmem:[#allocation1 + $0x5] ss:$9 sm:$0xff] %v2774_v11  ;;  %v2386_v11 = vpop.xlane.xlu1 %2385 }
 0x327   : > { %3324 = vst [vmem:[#allocation1 + $0x6] ss:$9 sm:$0xff] %v2775_v53  ;;  %v2818_v53 = vperm.slane %v2383_v57, 1  ;;  %v2831_v4 = vperm.slane %v2386_v11, 6 }
 0x328   : > { %3325 = vst [vmem:[#allocation1 + $0x7] ss:$9 sm:$0xff] %v2776_v51 }
 0x32f   : > { %v3326_v5 = vld [vmem:[#allocation1] sm:$0xff] }
 0x330   : > { %3327 = vst [vmem:[#allocation1] ss:$9 sm:$0xff] %v2777_v44  ;;  %3715 = vperm.xlu1 %5203, %v3326_v5   ;;  %v2820_v44 = vperm.slane %v2383_v57, 3  ;;  %v2821_v5 = vperm.slane %v2383_v57, 4 }
 0x331   : > { %3328 = vst [vmem:[#allocation1 + $0x1] ss:$9 sm:$0xff] %v2778_v2  ;;  %v2822_v2 = vperm.slane %v2383_v57, 5 }
 0x332   : > { %3329 = vst [vmem:[#allocation1 + $0x2] ss:$9 sm:$0xff] %v2779_v29  ;;  %v2823_v29 = vperm.slane %v2383_v57, 6 }
 0x333   : > { %3330 = vst [vmem:[#allocation1 + $0x3] ss:$9 sm:$0xff] %v2780_v47  ;;  %v6516_v47 = vpop.xlane.xlu2 %2397 }
 0x334   : > { %3331 = vst [vmem:[#allocation1 + $0x4] ss:$9 sm:$0xff] %v2781_v35  ;;  %v2824_v35 = vperm.slane %v2383_v57, 7  ;;  %v2845_v57 = vperm.slane %v6514_v12, 4 }
 0x335   : > { %3332 = vst [vmem:[#allocation1 + $0x5] ss:$9 sm:$0xff] %v2782_v19  ;;  %v6518_v19 = vpop.xlane.xlu0 %2400 }
 0x336   : > { %3333 = vst [vmem:[#allocation1 + $0x6] ss:$9 sm:$0xff] %v2783_v22  ;;  %v6520_v22 = vpop.xlane.xlu1 %2394 }
 0x337   : > { %3334 = vst [vmem:[#allocation1 + $0x7] ss:$9 sm:$0xff] %v2784_v7  ;;  %v2825_v7 = vperm.slane %v2386_v11, 0 }
 0x33e   : > { %v6508_v49 = vld [vmem:[#allocation1] sm:$0xff] }
 0x33f   : > { %3336 = vst [vmem:[#allocation1] ss:$9 sm:$0xff] %v2785_v38  ;;  %v2826_v38 = vperm.slane %v2386_v11, 1 }
 0x340   : > { %3337 = vst [vmem:[#allocation1 + $0x1] ss:$9 sm:$0xff] %v2786_v55  ;;  %v6522_v55 = vpop.xlane.xlu2 %2406 }
 0x341   : > { %3338 = vst [vmem:[#allocation1 + $0x2] ss:$9 sm:$0xff] %v2787_v25  ;;  %v2827_v25 = vperm.slane %v2386_v11, 2 }
 0x342   : > { %3339 = vst [vmem:[#allocation1 + $0x3] ss:$9 sm:$0xff] %v2788_v61  ;;  %v6524_v61 = vpop.xlane.xlu0 %2409 }
 0x343   : > { %3340 = vst [vmem:[#allocation1 + $0x4] ss:$9 sm:$0xff] %v2789_v50  ;;  %v2828_v50 = vperm.slane %v2386_v11, 3 }
 0x344   : > { %3341 = vst [vmem:[#allocation1 + $0x5] ss:$9 sm:$0xff] %v2790_v23  ;;  %v2829_v23 = vperm.slane %v2386_v11, 4 }
 0x345   : > { %3342 = vst [vmem:[#allocation1 + $0x6] ss:$9 sm:$0xff] %v2791_v43  ;;  %v2830_v43 = vperm.slane %v2386_v11, 5 }
 0x346   : > { %3343 = vst [vmem:[#allocation1 + $0x7] ss:$9 sm:$0xff] %v2792_v14  ;;  %v6526_v14 = vpop.xlane.xlu1 %2403 }
 0x34d   : > { %v3344_v0 = vld [vmem:[#allocation1] sm:$0xff] }
 0x34e   : > { %3345 = vst [vmem:[#allocation1] ss:$9 sm:$0xff] %v2793_v33  ;;  %3721 = vperm.xlu2 %5204, %v3344_v0   ;;  %v2832_v33 = vperm.slane %v2386_v11, 7  ;;  %v6530_v0 = vpop.xlane.xlu0 %2418 }
 0x34f   : > { %3346 = vst [vmem:[#allocation1 + $0x1] ss:$9 sm:$0xff] %v2794_v16  ;;  %v6528_v16 = vpop.xlane.xlu2 %2415 }
 0x350   : > { %3347 = vst [vmem:[#allocation1 + $0x2] ss:$9 sm:$0xff] %v2795_v60  ;;  %v2833_v60 = vperm.slane %v6512_v28, 0 }
 0x351   : > { %3348 = vst [vmem:[#allocation1 + $0x3] ss:$9 sm:$0xff] %v2796_v41  ;;  %v6533_v41 = vpop.xlane.xlu1 %2412 }
 0x352   : > { %3349 = vst [vmem:[#allocation1 + $0x4] ss:$9 sm:$0xff] %v2797_v54  ;;  %v2834_v54 = vperm.slane %v6512_v28, 1 }
 0x353   : > { %3350 = vst [vmem:[#allocation1 + $0x5] ss:$9 sm:$0xff] %v2798_v32 }
 0x354   : > { %3351 = vst [vmem:[#allocation1 + $0x6] ss:$9 sm:$0xff] %v2799_v1  ;;  %v2835_v1 = vperm.slane %v6512_v28, 2 }
 0x355   : > { %3352 = vst [vmem:[#allocation1 + $0x7] ss:$9 sm:$0xff] %v2800_v27  ;;  %v2836_v27 = vperm.slane %v6512_v28, 3 }
 0x35c   : > { %v3353_v39 = vld [vmem:[#allocation1] sm:$0xff] }
 0x35d   : > { %3354 = vst [vmem:[#allocation1] ss:$9 sm:$0xff] %v2801_v52  ;;  %3724 = vperm.xlu1 %5203, %v3353_v39   ;;  %v2838_v52 = vperm.slane %v6512_v28, 5  ;;  %v2839_v39 = vperm.slane %v6512_v28, 6 }
 0x35e   : > { %3355 = vst [vmem:[#allocation1 + $0x1] ss:$9 sm:$0xff] %v2802_v42  ;;  %v6543_v42 = vpop.xlane.xlu2 %2424 }
 0x35f   : > { %3356 = vst [vmem:[#allocation1 + $0x2] ss:$9 sm:$0xff] %v2803_v45  ;;  %v2840_v45 = vperm.slane %v6512_v28, 7 }
 0x360   : > { %3357 = vst [vmem:[#allocation1 + $0x3] ss:$9 sm:$0xff] %v2804_v21  ;;  %v6546_v21 = vpop.xlane.xlu0 %2427 }
 0x361   : > { %3358 = vst [vmem:[#allocation1 + $0x4] ss:$9 sm:$0xff] %v2805_v18  ;;  %v6548_v18 = vpop.xlane.xlu1 %2421 }
 0x362   : > { %3359 = vst [vmem:[#allocation1 + $0x5] ss:$9 sm:$0xff] %v2806_v59  ;;  %v2841_v59 = vperm.slane %v6514_v12, 0 }
 0x363   : > { %3360 = vst [vmem:[#allocation1 + $0x6] ss:$9 sm:$0xff] %v2807_v20  ;;  %v2842_v20 = vperm.slane %v6514_v12, 1 }
 0x364   : > { %3361 = vst [vmem:[#allocation1 + $0x7] ss:$9 sm:$0xff] %v2808_v6 }
 0x366   : > { %v6552_v3 = vpop.xlane.xlu2 %2433 }
 0x36b   : > { %v6510_v17 = vld [vmem:[#allocation1] sm:$0xff] }
 0x36c   : > { %3363 = vst [vmem:[#allocation1] ss:$9 sm:$0xff] %v2809_v9  ;;  %v2843_v9 = vperm.slane %v6514_v12, 2 }
 0x36d   : > { %3364 = vst [vmem:[#allocation1 + $0x1] ss:$9 sm:$0xff] %v2810_v63  ;;  %v6555_v63 = vpop.xlane.xlu0 %2436 }
 0x36e   : > { %3365 = vst [vmem:[#allocation1 + $0x2] ss:$9 sm:$0xff] %v2811_v36  ;;  %v2844_v36 = vperm.slane %v6514_v12, 3 }
 0x36f   : > { %3366 = vst [vmem:[#allocation1 + $0x3] ss:$9 sm:$0xff] %v2812_v46  ;;  %v2846_v46 = vperm.slane %v6514_v12, 5 }
 0x370   : > { %3367 = vst [vmem:[#allocation1 + $0x4] ss:$9 sm:$0xff] %v2813_v37  ;;  %v6560_v37 = vpop.xlane.xlu1 %2430 }
 0x371   : > { %3368 = vst [vmem:[#allocation1 + $0x5] ss:$9 sm:$0xff] %v2814_v56  ;;  %v2847_v56 = vperm.slane %v6514_v12, 6 }
 0x372   : > { %3369 = vst [vmem:[#allocation1 + $0x6] ss:$9 sm:$0xff] %v2815_v30  ;;  %v2848_v30 = vperm.slane %v6514_v12, 7  ;;  %v2852_v12 = vperm.slane %v6520_v22, 3 }
 0x373   : > { %3370 = vst [vmem:[#allocation1 + $0x7] ss:$9 sm:$0xff] %v2816_v62  ;;  %v6564_v62 = vpop.xlane.xlu2 %2442 }
 0x375   : > { %v6566_v28 = vpop.xlane.xlu0 %2445 }
 0x378   : > { %v6569_v11 = vpop.xlane.xlu1 %2439 }
 0x37a   : > { %v3371_v51 = vld [vmem:[#allocation1] sm:$0xff] }
 0x37b   : > { %3372 = vst [vmem:[#allocation1] ss:$9 sm:$0xff] %v2817_v8  ;;  %3730 = vperm.xlu2 %5204, %v3371_v51   ;;  %v2849_v8 = vperm.slane %v6520_v22, 0  ;;  %v2850_v51 = vperm.slane %v6520_v22, 1 }
 0x37c   : > { %3373 = vst [vmem:[#allocation1 + $0x1] ss:$9 sm:$0xff] %v2818_v53 }
 0x37d   : > { %3374 = vst [vmem:[#allocation1 + $0x2] ss:$9 sm:$0xff] %v2819_v10  ;;  %v2851_v10 = vperm.slane %v6520_v22, 2 }
 0x37e   : > { %3375 = vst [vmem:[#allocation1 + $0x3] ss:$9 sm:$0xff] %v2820_v44  ;;  %v2853_v44 = vperm.slane %v6520_v22, 4 }
 0x37f   : > { %3376 = vst [vmem:[#allocation1 + $0x4] ss:$9 sm:$0xff] %v2821_v5  ;;  %v2854_v5 = vperm.slane %v6520_v22, 5 }
 0x380   : > { %3377 = vst [vmem:[#allocation1 + $0x5] ss:$9 sm:$0xff] %v2822_v2  ;;  %v2855_v2 = vperm.slane %v6520_v22, 6 }
 0x381   : > { %3378 = vst [vmem:[#allocation1 + $0x6] ss:$9 sm:$0xff] %v2823_v29  ;;  %v6577_v29 = vpop.xlane.xlu2 %2451 }
 0x382   : > { %3379 = vst [vmem:[#allocation1 + $0x7] ss:$9 sm:$0xff] %v2824_v35  ;;  %v2856_v35 = vperm.slane %v6520_v22, 7 }
 0x389   : > { %v3380_v34 = vld [vmem:[#allocation1] sm:$0xff] }
 0x38a   : > { %3381 = vst [vmem:[#allocation1] ss:$9 sm:$0xff] %v2825_v7  ;;  %3733 = vperm.xlu1 %5203, %v3380_v34   ;;  %v6580_v7 = vpop.xlane.xlu0 %2454  ;;  %v6582_v34 = vpop.xlane.xlu1 %2448 }
 0x38b   : > { %3382 = vst [vmem:[#allocation1 + $0x1] ss:$9 sm:$0xff] %v2826_v38  ;;  %v997_v38 = vpop.f32.mrf.mxu2 }
 0x38c   : > { %3383 = vst [vmem:[#allocation1 + $0x2] ss:$9 sm:$0xff] %v2827_v25  ;;  %v1434_v25 = vpop.f32.mrf.mxu3 }
 0x38d   : > { %3384 = vst [vmem:[#allocation1 + $0x3] ss:$9 sm:$0xff] %v2828_v50  ;;  %v1435_v50 = vadd.f32 %v1434_v25, %v997_v38  ;;  %v2866_v38 = vperm.slane %v6518_v19, 1 }
 0x38e   : > { %3385 = vst [vmem:[#allocation1 + $0x4] ss:$9 sm:$0xff] %v2829_v23  ;;  %v489_v23 = vld [vmem:[%s5461_s30 + $0xfc] sm:$0xf]  ;;  %s4785_s30 = sshll.u32 (%p5430_p4), %s5418_s27, 2 }
 0x38f   : > { %3386 = vst [vmem:[#allocation1 + $0x5] ss:$9 sm:$0xff] %v2830_v43  ;;  %v2857_v43 = vperm.slane %v6516_v47, 0  ;;  %v1568_v22 = vunpack.c.l.bf16 %v489_v23  ;;  %v2867_v23 = vperm.slane %v6518_v19, 2  ;;  %s3995_s10 = ssub.s32 (%p5430_p4), 9, %s4785_s30  ;;  %s7052_s13 = scalar_lea.vmem (%p5430_p4), %s7347_s7, %s4785_s30  }
 0x390   : > { %3387 = vst [vmem:[#allocation1 + $0x6] ss:$9 sm:$0xff] %v2831_v4  ;;  %v5208_v4 = vld [vmem:[%s7346_s6] ss:$0 sm:$0xff]  ;;  %p3996_p8 = scmp.lt.s32.totalorder (%p5430_p4), %s3995_s10, 4 }
 0x391   : > { %3388 = vst [vmem:[#allocation1 + $0x7] ss:$9 sm:$0xff] %v2832_v33  ;;  %v1504_v33 = vadd.f32 %v5208_v4, %v1435_v50  ;;  %v2868_v4 = vperm.slane %v6518_v19, 3 }
 0x398   : > { %v6536_v32 = vld [vmem:[#allocation1] sm:$0xff] }
 0x399   : > { %3390 = vst [vmem:[#allocation1] ss:$9 sm:$0xff] %v2833_v60  ;;  %v2080_v60 = vpop.permute.xlu0 %2079 }
 0x39a   : > { %3391 = vst [vmem:[#allocation1 + $0x1] ss:$9 sm:$0xff] %v2834_v54  ;;  %v2858_v54 = vperm.slane %v6516_v47, 1  ;;  %vm2144_vm8 = vcmp.eq.s32.totalorder %v2080_v60, 1  ;;  %v2870_v60 = vperm.slane %v6518_v19, 5 }
 0x39b   : > { %3392 = vst [vmem:[#allocation1 + $0x2] ss:$9 sm:$0xff] %v2835_v1 }
 0x39c   : > { %3393 = vst [vmem:[#allocation1 + $0x3] ss:$9 sm:$0xff] %v2836_v27  ;;  %v6592_v27 = vpop.xlane.xlu2 %2460 }
 0x39d   : > { %3394 = vst [vmem:[#allocation1 + $0x4] ss:$9 sm:$0xff] %v2837_v40  ;;  %v5209_v40 = vld [vmem:[%s5787_s17 + $0xf8] sm:$0xff]  }
 0x39e   : > { %3395 = vst [vmem:[#allocation1 + $0x5] ss:$9 sm:$0xff] %v2838_v52  ;;  %v5011_v52 = vunpack.c.h.bf16 %v5209_v40 }
 0x39f   : > { %3396 = vst [vmem:[#allocation1 + $0x6] ss:$9 sm:$0xff] %v2839_v39  ;;  %v2859_v39 = vperm.slane %v6516_v47, 2 }
 0x3a0   : > { %3397 = vst [vmem:[#allocation1 + $0x7] ss:$9 sm:$0xff] %v2840_v45  ;;  %v3816_v45 = vlaneseq }
 0x3a7   : > { %v3398_v6 = vld [vmem:[#allocation1] sm:$0xff] }
 0x3a8   : > { %3399 = vst [vmem:[#allocation1] ss:$9 sm:$0xff] %v2841_v59  ;;  %3739 = vperm.xlu2 %5204, %v3398_v6   ;;  %v2208_v59 = vsel %vm2144_vm8, %v1504_v33, %v1568_v22  ;;  %v2869_v33 = vperm.slane %v6518_v19, 4  ;;  %vm3975_vm8 = vcmask 1040384  }
 0x3a9   : > { %3400 = vst [vmem:[#allocation1 + $0x1] ss:$9 sm:$0xff] %v2842_v20  ;;  %v2860_v20 = vperm.slane %v6516_v47, 3  ;;  %v2272_v6 = vmul.f32 %v5011_v52, %v2208_v59 }
 0x3aa   : > { %3401 = vst [vmem:[#allocation1 + $0x2] ss:$9 sm:$0xff] %v2843_v9  ;;  %v2861_v9 = vperm.slane %v6516_v47, 4 }
 0x3ab   : > { %3402 = vst [vmem:[#allocation1 + $0x3] ss:$9 sm:$0xff] %v2844_v36  ;;  %v2862_v36 = vperm.slane %v6516_v47, 5 }
 0x3ac   : > { %3403 = vst [vmem:[#allocation1 + $0x4] ss:$9 sm:$0xff] %v2845_v57  ;;  %v6599_v57 = vpop.xlane.xlu1 %2457 }
 0x3ad   : > { %3404 = vst [vmem:[#allocation1 + $0x5] ss:$9 sm:$0xff] %v2846_v46  ;;  %v2462_v46 = vsel %vm734_vm0, %v2272_v6, 0.0  ;;  %vm3821_vm0 = vcmask 130112   ;;  %v2872_v6 = vperm.slane %v6518_v19, 7 }
 0x3ae   : > { %3405 = vst [vmem:[#allocation1 + $0x6] ss:$9 sm:$0xff] %v2847_v56  ;;  %v2863_v56 = vperm.slane %v6516_v47, 6  ;;  %2463 = vadd.xlane.f32.xlu0 %v2462_v46 }
 0x3af   : > { %3406 = vst [vmem:[#allocation1 + $0x7] ss:$9 sm:$0xff] %v2848_v30  ;;  %v6604_v30 = vand.u32 127, %v3816_v45 }
 0x3b1   : > { %v6624_v22 = vadd.s32 4294967264, %v6604_v30  ;;  %v6631_v52 = vadd.s32 4294967272, %v6604_v30 }
 0x3b6   : > { %v3407_v53 = vld [vmem:[#allocation1] sm:$0xff] }
 0x3b7   : > { %3408 = vst [vmem:[#allocation1] ss:$9 sm:$0xff] %v2849_v8  ;;  %3742 = vperm.xlu1 %5203, %v3407_v53   ;;  %v2864_v8 = vperm.slane %v6516_v47, 7  ;;  %v6608_v53 = vadd.s32 4294967288, %v6604_v30 }
 0x3b8   : > { %3409 = vst [vmem:[#allocation1 + $0x1] ss:$9 sm:$0xff] %v2850_v51  ;;  %v3632_v51 = vpop.permute.xlu0 %3631 }
 0x3b9   : > { %3410 = vst [vmem:[#allocation1 + $0x2] ss:$9 sm:$0xff] %v2851_v10  ;;  %v3629_v10 = vpop.permute.xlu2 %3628 }
 0x3ba   : > { %3411 = vst [vmem:[#allocation1 + $0x3] ss:$9 sm:$0xff] %v2852_v12  ;;  %v6611_v12 = vadd.s32 4294967280, %v6604_v30 }
 0x3bb   : > { %3412 = vst [vmem:[#allocation1 + $0x4] ss:$9 sm:$0xff] %v2853_v44  ;;  %v3626_v44 = vpop.permute.xlu1 %3625 }
 0x3bc   : > { %3413 = vst [vmem:[#allocation1 + $0x5] ss:$9 sm:$0xff] %v2854_v5  ;;  %v3820_v5 = vperm.slane %v3629_v10, %v6608_v53  ;;  %v3824_v47 = vperm.slane %v3632_v51, %v6611_v12  ;;  %v7397_v51 = vld [vmem:[#allocation24_spill] sm:$0xff]  ;;  %v6643_v10 = vadd.s32 4294967248, %v6604_v30 }
 0x3bd   : > { %3414 = vst [vmem:[#allocation1 + $0x6] ss:$9 sm:$0xff] %v2855_v2  ;;  %v3818_v2 = vperm.slane %v3626_v44, %v6604_v30 }
 0x3be   : > { %3415 = vst [vmem:[#allocation1 + $0x7] ss:$9 sm:$0xff] %v2856_v35  ;;  %v2865_v35 = vperm.slane %v6518_v19, 0 }
 0x3bf   : > { %v3822_v50 = vsel %vm3821_vm0, %v3820_v5, %v3818_v2  ;;  %v2873_v5 = vperm.slane %v6526_v14, 0 }
 0x3c0   : > { %v3638_v40 = vpop.permute.xlu0 %3637 }
 0x3c1   : > { %v3641_v59 = vpop.permute.xlu2 %3640 }
 0x3c2   : > { %3646 = vperm.xlu0 %5202, %v7397_v51   ;;  %v2890_v51 = vperm.slane %v6524_v61, 1 }
 0x3c5   : > { %v6590_v1 = vld [vmem:[#allocation1] sm:$0xff] }
 0x3c6   : > { %3417 = vst [vmem:[#allocation1] ss:$9 sm:$0xff] %v2857_v43  ;;  %v3826_v43 = vsel %vm3825_vm9, %v3824_v47, %v3822_v50  ;;  %v2874_v47 = vperm.slane %v6526_v14, 1  ;;  %v2876_v50 = vperm.slane %v6526_v14, 3 }
 0x3c7   : > { %3418 = vst [vmem:[#allocation1 + $0x1] ss:$9 sm:$0xff] %v2858_v54  ;;  %v6628_v54 = vadd.s32 4294967256, %v6604_v30 }
 0x3c8   : > { %3419 = vst [vmem:[#allocation1 + $0x2] ss:$9 sm:$0xff] %v2859_v39  ;;  %v2871_v39 = vperm.slane %v6518_v19, 6 }
 0x3c9   : > { %3420 = vst [vmem:[#allocation1 + $0x3] ss:$9 sm:$0xff] %v2860_v20  ;;  %v3635_v20 = vpop.permute.xlu1 %3634  ;;  %v3836_v46 = vperm.slane %v3641_v59, %v6628_v54 }
 0x3ca   : > { %3421 = vst [vmem:[#allocation1 + $0x4] ss:$9 sm:$0xff] %v2861_v9  ;;  %v3828_v9 = vperm.slane %v3635_v20, %v6631_v52  ;;  %3655 = vperm.xlu0 %5202, %v6329_v26   ;;  %v2882_v26 = vperm.slane %v6522_v55, 1  ;;  %v2883_v20 = vperm.slane %v6522_v55, 2 }
 0x3cb   : > { %3422 = vst [vmem:[#allocation1 + $0x5] ss:$9 sm:$0xff] %v2862_v36  ;;  %v3832_v36 = vperm.slane %v3638_v40, %v6624_v22 }
 0x3cc   : > { %3423 = vst [vmem:[#allocation1 + $0x6] ss:$9 sm:$0xff] %v2863_v56  ;;  %v3830_v56 = vsel %vm3829_vm10, %v3828_v9, %v3826_v43  ;;  %v2878_v43 = vperm.slane %v6526_v14, 5  ;;  %v2886_v9 = vperm.slane %v6522_v55, 5 }
 0x3cd   : > { %3424 = vst [vmem:[#allocation1 + $0x7] ss:$9 sm:$0xff] %v2864_v8  ;;  %v3834_v8 = vsel %vm3833_vm11, %v3832_v36, %v3830_v56 }
 0x3ce   : > { %v3838_v19 = vsel %vm3837_vm12, %v3836_v46, %v3834_v8  ;;  %v2888_v46 = vperm.slane %v6522_v55, 7  ;;  %v2889_v8 = vperm.slane %v6524_v61, 0 }
 0x3d1   : > { %v3644_v44 = vpop.permute.xlu1 %3643 }
 0x3d2   : > { %v3840_v2 = vperm.slane %v3644_v44, %v6643_v10  ;;  %3664 = vperm.xlu0 %5202, %v6467_v13   ;;  %v2887_v13 = vperm.slane %v6522_v55, 6  ;;  %v2891_v44 = vperm.slane %v6524_v61, 2 }
 0x3d4   : > { %v3425_v25 = vld [vmem:[#allocation1] sm:$0xff] }
 0x3d5   : > { %3426 = vst [vmem:[#allocation1] ss:$9 sm:$0xff] %v2865_v35  ;;  %3748 = vperm.xlu2 %5204, %v3425_v25   ;;  %v6650_v25 = vsel %vm3841_vm13, %v3840_v2, %v3838_v19  ;;  %v2893_v2 = vperm.slane %v6524_v61, 4 }
 0x3d6   : > { %3427 = vst [vmem:[#allocation1 + $0x1] ss:$9 sm:$0xff] %v2866_v38  ;;  %v2875_v38 = vperm.slane %v6526_v14, 2 }
 0x3d7   : > { %3428 = vst [vmem:[#allocation1 + $0x2] ss:$9 sm:$0xff] %v2867_v23  ;;  %v2877_v23 = vperm.slane %v6526_v14, 4 }
 0x3d8   : > { %3429 = vst [vmem:[#allocation1 + $0x3] ss:$9 sm:$0xff] %v2868_v4  ;;  %v2879_v4 = vperm.slane %v6526_v14, 6 }
 0x3d9   : > { %3430 = vst [vmem:[#allocation1 + $0x4] ss:$9 sm:$0xff] %v2869_v33  ;;  %v2880_v33 = vperm.slane %v6526_v14, 7  ;;  %v6661_v40 = vpop.permute.xlu1 %3652  ;;  %v2884_v14 = vperm.slane %v6522_v55, 3 }
 0x3da   : > { %3431 = vst [vmem:[#allocation1 + $0x5] ss:$9 sm:$0xff] %v2870_v60  ;;  %v6658_v60 = vpop.permute.xlu2 %3649  ;;  %3673 = vperm.xlu0 %5202, %v6488_v24  }
 0x3db   : > { %3432 = vst [vmem:[#allocation1 + $0x6] ss:$9 sm:$0xff] %v2871_v39  ;;  %v2881_v39 = vperm.slane %v6522_v55, 0 }
 0x3dc   : > { %3433 = vst [vmem:[#allocation1 + $0x7] ss:$9 sm:$0xff] %v2872_v6  ;;  %v2885_v6 = vperm.slane %v6522_v55, 4  ;;  %v2892_v55 = vperm.slane %v6524_v61, 3 }
 0x3e1   : > { %v6676_v56 = vpop.permute.xlu1 %3661 }
 0x3e2   : > { %v6673_v36 = vpop.permute.xlu2 %3658  ;;  %3682 = vperm.xlu0 %5202, %v6496_v31   ;;  %v2894_v31 = vperm.slane %v6524_v61, 5 }
 0x3e3   : > { %v3434_v35 = vld [vmem:[#allocation1] sm:$0xff] }
 0x3e4   : > { %3435 = vst [vmem:[#allocation1] ss:$9 sm:$0xff] %v2873_v5  ;;  %3751 = vperm.xlu1 %5203, %v3434_v35   ;;  %v2895_v35 = vperm.slane %v6524_v61, 6 }
 0x3e5   : > { %3436 = vst [vmem:[#allocation1 + $0x1] ss:$9 sm:$0xff] %v2874_v47  ;;  %v2896_v47 = vperm.slane %v6524_v61, 7  ;;  %v2901_v61 = vperm.slane %v6533_v41, 4 }
 0x3e6   : > { %3437 = vst [vmem:[#allocation1 + $0x2] ss:$9 sm:$0xff] %v2875_v38 }
 0x3e7   : > { %3438 = vst [vmem:[#allocation1 + $0x3] ss:$9 sm:$0xff] %v2876_v50 }
 0x3e8   : > { %3439 = vst [vmem:[#allocation1 + $0x4] ss:$9 sm:$0xff] %v2877_v23  ;;  %v2897_v23 = vperm.slane %v6533_v41, 0 }
 0x3e9   : > { %3440 = vst [vmem:[#allocation1 + $0x5] ss:$9 sm:$0xff] %v2878_v43  ;;  %v6685_v5 = vpop.permute.xlu1 %3670 }
 0x3ea   : > { %3441 = vst [vmem:[#allocation1 + $0x6] ss:$9 sm:$0xff] %v2879_v4  ;;  %v6681_v24 = vpop.permute.xlu2 %3667  ;;  %3691 = vperm.xlu0 %5202, %v6502_v15   ;;  %v2898_v4 = vperm.slane %v6533_v41, 1  ;;  %v2900_v15 = vperm.slane %v6533_v41, 3 }
 0x3eb   : > { %3442 = vst [vmem:[#allocation1 + $0x7] ss:$9 sm:$0xff] %v2880_v33  ;;  %v2899_v33 = vperm.slane %v6533_v41, 2 }
 0x3f1   : > { %v6694_v50 = vpop.permute.xlu1 %3679 }
 0x3f2   : > { %v6665_v59 = vld [vmem:[#allocation1] sm:$0xff]  ;;  %v6692_v38 = vpop.permute.xlu2 %3676  ;;  %3700 = vperm.xlu0 %5202, %v6504_v58   ;;  %v2903_v58 = vperm.slane %v6533_v41, 6 }
 0x3f3   : > { %3444 = vst [vmem:[#allocation1] ss:$9 sm:$0xff] %v2881_v39  ;;  %v2902_v39 = vperm.slane %v6533_v41, 5 }
 0x3f4   : > { %3445 = vst [vmem:[#allocation1 + $0x1] ss:$9 sm:$0xff] %v2882_v26 }
 0x3f5   : > { %3446 = vst [vmem:[#allocation1 + $0x2] ss:$9 sm:$0xff] %v2883_v20  ;;  %v2904_v20 = vperm.slane %v6533_v41, 7  ;;  %v2908_v41 = vperm.slane %v6528_v16, 3 }
 0x3f6   : > { %3447 = vst [vmem:[#allocation1 + $0x3] ss:$9 sm:$0xff] %v2884_v14 }
 0x3f7   : > { %3448 = vst [vmem:[#allocation1 + $0x4] ss:$9 sm:$0xff] %v2885_v6  ;;  %v2905_v6 = vperm.slane %v6528_v16, 0 }
 0x3f8   : > { %3449 = vst [vmem:[#allocation1 + $0x5] ss:$9 sm:$0xff] %v2886_v9  ;;  %v2906_v9 = vperm.slane %v6528_v16, 1 }
 0x3f9   : > { %3450 = vst [vmem:[#allocation1 + $0x6] ss:$9 sm:$0xff] %v2887_v13  ;;  %v6708_v14 = vpop.permute.xlu1 %3688 }
 0x3fa   : > { %3451 = vst [vmem:[#allocation1 + $0x7] ss:$9 sm:$0xff] %v2888_v46  ;;  %v6704_v26 = vpop.permute.xlu2 %3685  ;;  %3709 = vperm.xlu0 %5202, %v6506_v48  }
 0x401   : > { %v3452_v19 = vld [vmem:[#allocation1] sm:$0xff]  ;;  %v6719_v48 = vpop.permute.xlu1 %3697 }
 0x402   : > { %3453 = vst [vmem:[#allocation1] ss:$9 sm:$0xff] %v2889_v8  ;;  %3757 = vperm.xlu2 %5204, %v3452_v19   ;;  %3718 = vperm.xlu0 %5202, %v6508_v49   ;;  %v6715_v46 = vpop.permute.xlu2 %3694  ;;  %v2907_v8 = vperm.slane %v6528_v16, 2  ;;  %v2910_v19 = vperm.slane %v6528_v16, 5  ;;  %v2911_v49 = vperm.slane %v6528_v16, 6 }
 0x403   : > { %3454 = vst [vmem:[#allocation1 + $0x1] ss:$9 sm:$0xff] %v2890_v51  ;;  %v2909_v51 = vperm.slane %v6528_v16, 4 }
 0x404   : > { %3455 = vst [vmem:[#allocation1 + $0x2] ss:$9 sm:$0xff] %v2891_v44  ;;  %v2912_v44 = vperm.slane %v6528_v16, 7  ;;  %v2916_v16 = vperm.slane %v6530_v0, 3 }
 0x405   : > { %3456 = vst [vmem:[#allocation1 + $0x3] ss:$9 sm:$0xff] %v2892_v55 }
 0x406   : > { %3457 = vst [vmem:[#allocation1 + $0x4] ss:$9 sm:$0xff] %v2893_v2 }
 0x407   : > { %3458 = vst [vmem:[#allocation1 + $0x5] ss:$9 sm:$0xff] %v2894_v31  ;;  %v2913_v31 = vperm.slane %v6530_v0, 0 }
 0x408   : > { %3459 = vst [vmem:[#allocation1 + $0x6] ss:$9 sm:$0xff] %v2895_v35  ;;  %v2914_v35 = vperm.slane %v6530_v0, 1 }
 0x409   : > { %3460 = vst [vmem:[#allocation1 + $0x7] ss:$9 sm:$0xff] %v2896_v47  ;;  %v6728_v2 = vpop.permute.xlu1 %3706 }
 0x40a   : > { %3727 = vperm.xlu0 %5202, %v6510_v17   ;;  %v6726_v55 = vpop.permute.xlu2 %3703  ;;  %v2917_v17 = vperm.slane %v6530_v0, 4 }
 0x410   : > { %v3461_v43 = vld [vmem:[#allocation1] sm:$0xff] }
 0x411   : > { %3462 = vst [vmem:[#allocation1] ss:$9 sm:$0xff] %v2897_v23  ;;  %3760 = vperm.xlu1 %5203, %v3461_v43   ;;  %v2915_v23 = vperm.slane %v6530_v0, 2 }
 0x412   : > { %3463 = vst [vmem:[#allocation1 + $0x1] ss:$9 sm:$0xff] %v2898_v4  ;;  %3736 = vperm.xlu0 %5202, %v6536_v32   ;;  %v6736_v43 = vpop.permute.xlu2 %3712  ;;  %v2918_v4 = vperm.slane %v6530_v0, 5  ;;  %v2920_v32 = vperm.slane %v6530_v0, 7 }
 0x413   : > { %3464 = vst [vmem:[#allocation1 + $0x2] ss:$9 sm:$0xff] %v2899_v33  ;;  %v2919_v33 = vperm.slane %v6530_v0, 6 }
 0x414   : > { %3465 = vst [vmem:[#allocation1 + $0x3] ss:$9 sm:$0xff] %v2900_v15  ;;  %v6740_v15 = vpop.permute.xlu1 %3715 }
 0x415   : > { %3466 = vst [vmem:[#allocation1 + $0x4] ss:$9 sm:$0xff] %v2901_v61 }
 0x416   : > { %3467 = vst [vmem:[#allocation1 + $0x5] ss:$9 sm:$0xff] %v2902_v39 }
 0x417   : > { %3468 = vst [vmem:[#allocation1 + $0x6] ss:$9 sm:$0xff] %v2903_v58  ;;  %v2921_v58 = vperm.slane %v6548_v18, 0 }
 0x418   : > { %3469 = vst [vmem:[#allocation1 + $0x7] ss:$9 sm:$0xff] %v2904_v20 }
 0x41a   : > { %3745 = vperm.xlu0 %5202, %v6590_v1   ;;  %v3722_v61 = vpop.permute.xlu2 %3721  ;;  %v2924_v1 = vperm.slane %v6548_v18, 3 }
 0x41b   : > { %v3910_v20 = vperm.slane %v3722_v61, %v6604_v30  ;;  %v2935_v61 = vperm.slane %v6543_v42, 6 }
 0x41c   : > { %v3725_v39 = vpop.permute.xlu1 %3724 }
 0x41f   : > { %v6713_v13 = vld [vmem:[#allocation1] sm:$0xff] }
 0x420   : > { %3471 = vst [vmem:[#allocation1] ss:$9 sm:$0xff] %v2905_v6  ;;  %v3911_v6 = vperm.slane %v3725_v39, %v6608_v53 }
 0x421   : > { %3472 = vst [vmem:[#allocation1 + $0x1] ss:$9 sm:$0xff] %v2906_v9 }
 0x422   : > { %3473 = vst [vmem:[#allocation1 + $0x2] ss:$9 sm:$0xff] %v2907_v8  ;;  %v2922_v8 = vperm.slane %v6548_v18, 1  ;;  %v6750_v0 = vsel %vm3821_vm0, %v3911_v6, %v3910_v20  ;;  %3754 = vperm.xlu0 %5202, %v6665_v59   ;;  %v6759_v59 = vpop.xlane.xlu0 %2463 }
 0x423   : > { %3474 = vst [vmem:[#allocation1 + $0x3] ss:$9 sm:$0xff] %v2908_v41  ;;  %v2923_v41 = vperm.slane %v6548_v18, 2 }
 0x424   : > { %3475 = vst [vmem:[#allocation1 + $0x4] ss:$9 sm:$0xff] %v2909_v51  ;;  %v2925_v51 = vperm.slane %v6548_v18, 4 }
 0x425   : > { %3476 = vst [vmem:[#allocation1 + $0x5] ss:$9 sm:$0xff] %v2910_v19  ;;  %v2926_v19 = vperm.slane %v6548_v18, 5 }
 0x426   : > { %3477 = vst [vmem:[#allocation1 + $0x6] ss:$9 sm:$0xff] %v2911_v49  ;;  %v2927_v49 = vperm.slane %v6548_v18, 6 }
 0x427   : > { %3478 = vst [vmem:[#allocation1 + $0x7] ss:$9 sm:$0xff] %v2912_v44  ;;  %v2928_v44 = vperm.slane %v6548_v18, 7  ;;  %v6766_v18 = vadd.s32 4294967232, %v6604_v30 }
 0x429   : > { %v3848_v20 = vperm.slane %v6658_v60, %v6766_v18  ;;  %v6791_v60 = vadd.s32 4294967200, %v6604_v30 }
 0x42a   : > { %3763 = vperm.xlu0 %5202, %v6713_v13   ;;  %v6770_v13 = vadd.s32 4294967224, %v6604_v30 }
 0x42c   : > { %v3852_v6 = vperm.slane %v6661_v40, %v6770_v13 }
 0x42e   : > { %v3479_v47 = vld [vmem:[#allocation1] sm:$0xff] }
 0x42f   : > { %3480 = vst [vmem:[#allocation1] ss:$9 sm:$0xff] %v2913_v31  ;;  %3766 = vperm.xlu2 %5204, %v3479_v47   ;;  %v2929_v31 = vperm.slane %v6543_v42, 0 }
 0x430   : > { %3481 = vst [vmem:[#allocation1 + $0x1] ss:$9 sm:$0xff] %v2914_v35  ;;  %v2930_v35 = vperm.slane %v6543_v42, 1 }
 0x431   : > { %3482 = vst [vmem:[#allocation1 + $0x2] ss:$9 sm:$0xff] %v2915_v23  ;;  %v2931_v23 = vperm.slane %v6543_v42, 2 }
 0x432   : > { %3483 = vst [vmem:[#allocation1 + $0x3] ss:$9 sm:$0xff] %v2916_v16  ;;  %v2932_v16 = vperm.slane %v6543_v42, 3 }
 0x433   : > { %3484 = vst [vmem:[#allocation1 + $0x4] ss:$9 sm:$0xff] %v2917_v17  ;;  %v2933_v17 = vperm.slane %v6543_v42, 4 }
 0x434   : > { %3485 = vst [vmem:[#allocation1 + $0x5] ss:$9 sm:$0xff] %v2918_v4  ;;  %v6773_v4 = vadd.s32 4294967240, %v6604_v30 }
 0x435   : > { %3486 = vst [vmem:[#allocation1 + $0x6] ss:$9 sm:$0xff] %v2919_v33  ;;  %v2934_v33 = vperm.slane %v6543_v42, 5 }
 0x436   : > { %3487 = vst [vmem:[#allocation1 + $0x7] ss:$9 sm:$0xff] %v2920_v32  ;;  %v3647_v32 = vpop.permute.xlu0 %3646 }
 0x437   : > { %v3844_v39 = vperm.slane %v3647_v32, %v6773_v4  ;;  %v6814_v32 = vadd.s32 4294967192, %v6604_v30 }
 0x43d   : > { %v3488_v9 = vld [vmem:[#allocation1] sm:$0xff] }
 0x43e   : > { %3489 = vst [vmem:[#allocation1] ss:$9 sm:$0xff] %v2921_v58  ;;  %3769 = vperm.xlu1 %5203, %v3488_v9   ;;  %v2936_v58 = vperm.slane %v6543_v42, 7  ;;  %v3846_v9 = vsel %vm3845_vm14, %v3844_v39, %v6650_v25  ;;  %v6788_v42 = vadd.s32 4294967208, %v6604_v30  ;;  %v3656_v40 = vpop.permute.xlu0 %3655  ;;  %v2937_v25 = vperm.slane %v6546_v21, 0 }
 0x43f   : > { %3490 = vst [vmem:[#allocation1 + $0x1] ss:$9 sm:$0xff] %v2922_v8  ;;  %v3850_v8 = vsel %vm3849_vm15, %v3848_v20, %v3846_v9 }
 0x440   : > { %3491 = vst [vmem:[#allocation1 + $0x2] ss:$9 sm:$0xff] %v2923_v41  ;;  %v3854_v41 = vsel %vm3853_vm1, %v3852_v6, %v3850_v8 }
 0x441   : > { %3492 = vst [vmem:[#allocation1 + $0x3] ss:$9 sm:$0xff] %v2924_v1  ;;  %v6794_v1 = vadd.s32 4294967216, %v6604_v30 }
 0x442   : > { %3493 = vst [vmem:[#allocation1 + $0x4] ss:$9 sm:$0xff] %v2925_v51 }
 0x443   : > { %3494 = vst [vmem:[#allocation1 + $0x5] ss:$9 sm:$0xff] %v2926_v19  ;;  %v3856_v51 = vperm.slane %v3656_v40, %v6794_v1  ;;  %v3860_v19 = vperm.slane %v6673_v36, %v6788_v42  ;;  %v2945_v40 = vperm.slane %v6560_v37, 0 }
 0x444   : > { %3495 = vst [vmem:[#allocation1 + $0x6] ss:$9 sm:$0xff] %v2927_v49  ;;  %v2938_v49 = vperm.slane %v6546_v21, 1 }
 0x445   : > { %3496 = vst [vmem:[#allocation1 + $0x7] ss:$9 sm:$0xff] %v2928_v44 }
 0x446   : > { %v3665_v39 = vpop.permute.xlu0 %3664 }
 0x447   : > { %v3868_v20 = vperm.slane %v3665_v39, %v6814_v32  ;;  %v2953_v39 = vperm.slane %v6552_v3, 0 }
 0x44c   : > { %v3497_v47 = vld [vmem:[#allocation1] sm:$0xff] }
 0x44d   : > { %3498 = vst [vmem:[#allocation1] ss:$9 sm:$0xff] %v2929_v31  ;;  %3772 = vperm.xlu0 %5202, %v3497_v47   ;;  %v3864_v31 = vperm.slane %v6676_v56, %v6791_v60  ;;  %v2939_v47 = vperm.slane %v6546_v21, 2  ;;  %v6810_v56 = vadd.s32 4294967184, %v6604_v30 }
 0x44e   : > { %3499 = vst [vmem:[#allocation1 + $0x1] ss:$9 sm:$0xff] %v2930_v35  ;;  %v3858_v35 = vsel %vm3857_vm2, %v3856_v51, %v3854_v41  ;;  %v3674_v41 = vpop.permute.xlu0 %3673 }
 0x44f   : > { %3500 = vst [vmem:[#allocation1 + $0x2] ss:$9 sm:$0xff] %v2931_v23  ;;  %v3862_v23 = vsel %vm3861_vm3, %v3860_v19, %v3858_v35  ;;  %v3872_v6 = vperm.slane %v6681_v24, %v6810_v56  ;;  %v3879_v51 = vperm.slane %v3674_v41, %v6604_v30  ;;  %v2946_v19 = vperm.slane %v6560_v37, 1 }
 0x450   : > { %3501 = vst [vmem:[#allocation1 + $0x3] ss:$9 sm:$0xff] %v2932_v16  ;;  %v2940_v16 = vperm.slane %v6546_v21, 3  ;;  %v3866_v36 = vsel %vm3865_vm4, %v3864_v31, %v3862_v23  ;;  %v2949_v31 = vperm.slane %v6560_v37, 4  ;;  %v2950_v35 = vperm.slane %v6560_v37, 5 }
 0x451   : > { %3502 = vst [vmem:[#allocation1 + $0x4] ss:$9 sm:$0xff] %v2933_v17  ;;  %v2941_v17 = vperm.slane %v6546_v21, 4  ;;  %v3870_v9 = vsel %vm3869_vm5, %v3868_v20, %v3866_v36  ;;  %v2952_v23 = vperm.slane %v6560_v37, 7  ;;  %v2955_v20 = vperm.slane %v6552_v3, 2 }
 0x452   : > { %3503 = vst [vmem:[#allocation1 + $0x5] ss:$9 sm:$0xff] %v2934_v33  ;;  %v2942_v33 = vperm.slane %v6546_v21, 5  ;;  %v3874_v8 = vsel %vm3873_vm6, %v3872_v6, %v3870_v9  ;;  %v2956_v6 = vperm.slane %v6552_v3, 3  ;;  %v2957_v9 = vperm.slane %v6552_v3, 4 }
 0x453   : > { %3504 = vst [vmem:[#allocation1 + $0x6] ss:$9 sm:$0xff] %v2935_v61  ;;  %v2943_v61 = vperm.slane %v6546_v21, 6  ;;  %v3888_v41 = vperm.slane %v6708_v14, %v6628_v54 }
 0x454   : > { %3505 = vst [vmem:[#allocation1 + $0x7] ss:$9 sm:$0xff] %v2936_v58  ;;  %v2944_v58 = vperm.slane %v6546_v21, 7  ;;  %v3880_v21 = vperm.slane %v6692_v38, %v6608_v53  ;;  %v3882_v38 = vperm.slane %v6694_v50, %v6611_v12 }
 0x456   : > { %v3881_v24 = vsel %vm3821_vm0, %v3880_v21, %v3879_v51  ;;  %v2960_v21 = vperm.slane %v6552_v3, 7 }
 0x457   : > { %v3883_v36 = vsel %vm3825_vm9, %v3882_v38, %v3881_v24  ;;  %v6858_v24 = vadd.s32 4294967176, %v6604_v30 }
 0x45b   : > { %v3506_v44 = vld [vmem:[#allocation1] sm:$0xff] }
 0x45c   : > { %3507 = vst [vmem:[#allocation1] ss:$9 sm:$0xff] %v2937_v25  ;;  %3775 = vperm.xlu2 %5204, %v3506_v44   ;;  %v2948_v44 = vperm.slane %v6560_v37, 3 }
 0x45d   : > { %3508 = vst [vmem:[#allocation1 + $0x1] ss:$9 sm:$0xff] %v2938_v49  ;;  %v2947_v49 = vperm.slane %v6560_v37, 2 }
 0x45e   : > { %3509 = vst [vmem:[#allocation1 + $0x2] ss:$9 sm:$0xff] %v2939_v47  ;;  %v2951_v47 = vperm.slane %v6560_v37, 6 }
 0x45f   : > { %3510 = vst [vmem:[#allocation1 + $0x3] ss:$9 sm:$0xff] %v2940_v16  ;;  %v3683_v16 = vpop.permute.xlu0 %3682 }
 0x460   : > { %3511 = vst [vmem:[#allocation1 + $0x4] ss:$9 sm:$0xff] %v2941_v17  ;;  %v3884_v17 = vperm.slane %v3683_v16, %v6631_v52  ;;  %v2965_v16 = vperm.slane %v6555_v63, 4 }
 0x461   : > { %3512 = vst [vmem:[#allocation1 + $0x5] ss:$9 sm:$0xff] %v2942_v33  ;;  %v3886_v33 = vperm.slane %v6704_v26, %v6624_v22  ;;  %v2958_v26 = vperm.slane %v6552_v3, 5 }
 0x462   : > { %3513 = vst [vmem:[#allocation1 + $0x6] ss:$9 sm:$0xff] %v2943_v61  ;;  %v3885_v61 = vsel %vm3829_vm10, %v3884_v17, %v3883_v36  ;;  %v3894_v36 = vperm.slane %v6719_v48, %v6766_v18  ;;  %v2967_v17 = vperm.slane %v6555_v63, 6 }
 0x463   : > { %3514 = vst [vmem:[#allocation1 + $0x7] ss:$9 sm:$0xff] %v2944_v58  ;;  %v3887_v50 = vsel %vm3833_vm11, %v3886_v33, %v3885_v61  ;;  %v2954_v58 = vperm.slane %v6552_v3, 1 }
 0x467   : > { %v3692_v51 = vpop.permute.xlu0 %3691 }
 0x46a   : > { %v3515_v25 = vld [vmem:[#allocation1] sm:$0xff] }
 0x46b   : > { %3516 = vst [vmem:[#allocation1] ss:$9 sm:$0xff] %v2945_v40  ;;  %3778 = vperm.xlu1 %5203, %v3515_v25   ;;  %v2959_v40 = vperm.slane %v6552_v3, 6  ;;  %v3889_v25 = vsel %vm3837_vm12, %v3888_v41, %v3887_v50  ;;  %v3876_v3 = vperm.slane %v6685_v5, %v6858_v24  ;;  %v2966_v5 = vperm.slane %v6555_v63, 5 }
 0x46c   : > { %3517 = vst [vmem:[#allocation1 + $0x1] ss:$9 sm:$0xff] %v2946_v19  ;;  %v3890_v19 = vperm.slane %v3692_v51, %v6643_v10  ;;  %v3900_v41 = vperm.slane %v6728_v2, %v6788_v42 }
 0x46d   : > { %3518 = vst [vmem:[#allocation1 + $0x2] ss:$9 sm:$0xff] %v2947_v49  ;;  %v3892_v49 = vperm.slane %v6715_v46, %v6773_v4  ;;  %v2963_v46 = vperm.slane %v6555_v63, 2 }
 0x46e   : > { %3519 = vst [vmem:[#allocation1 + $0x3] ss:$9 sm:$0xff] %v2948_v44  ;;  %v3891_v14 = vsel %vm3841_vm13, %v3890_v19, %v3889_v25 }
 0x46f   : > { %3520 = vst [vmem:[#allocation1 + $0x4] ss:$9 sm:$0xff] %v2949_v31  ;;  %v3893_v44 = vsel %vm3845_vm14, %v3892_v49, %v3891_v14  ;;  %v2961_v31 = vperm.slane %v6555_v63, 0  ;;  %v3701_v33 = vpop.permute.xlu0 %3700  ;;  %v3904_v49 = vperm.slane %v6736_v43, %v6814_v32  ;;  %v2982_v43 = vperm.slane %v6564_v62, 5 }
 0x470   : > { %3521 = vst [vmem:[#allocation1 + $0x5] ss:$9 sm:$0xff] %v2950_v35  ;;  %v2962_v35 = vperm.slane %v6555_v63, 1  ;;  %v3895_v61 = vsel %vm3849_vm15, %v3894_v36, %v3893_v44  ;;  %v3896_v50 = vperm.slane %v3701_v33, %v6770_v13  ;;  %v2977_v44 = vperm.slane %v6564_v62, 0 }
 0x471   : > { %3522 = vst [vmem:[#allocation1 + $0x6] ss:$9 sm:$0xff] %v2951_v47  ;;  %v6867_v47 = vsel %vm3877_vm7, %v3876_v3, %v3874_v8  ;;  %v2968_v8 = vperm.slane %v6555_v63, 7  ;;  %v2978_v3 = vperm.slane %v6564_v62, 1 }
 0x472   : > { %3523 = vst [vmem:[#allocation1 + $0x7] ss:$9 sm:$0xff] %v2952_v23  ;;  %v2964_v23 = vperm.slane %v6555_v63, 3 }
 0x477   : > { %v3710_v51 = vpop.permute.xlu0 %3709 }
 0x478   : > { %v3902_v19 = vperm.slane %v3710_v51, %v6791_v60  ;;  %v3001_v51 = vperm.slane %v6577_v29, 0 }
 0x479   : > { %v3524_v37 = vld [vmem:[#allocation1] sm:$0xff] }
 0x47a   : > { %3525 = vst [vmem:[#allocation1] ss:$9 sm:$0xff] %v2953_v39  ;;  %3781 = vperm.xlu0 %5202, %v3524_v37   ;;  %v3898_v39 = vperm.slane %v6726_v55, %v6794_v1  ;;  %v2969_v37 = vperm.slane %v6569_v11, 0  ;;  %v2974_v55 = vperm.slane %v6569_v11, 5 }
 0x47b   : > { %3526 = vst [vmem:[#allocation1 + $0x1] ss:$9 sm:$0xff] %v2954_v58  ;;  %v3897_v58 = vsel %vm3853_vm1, %v3896_v50, %v3895_v61  ;;  %v2985_v61 = vperm.slane %v6566_v28, 0  ;;  %v2986_v50 = vperm.slane %v6566_v28, 1 }
 0x47c   : > { %3527 = vst [vmem:[#allocation1 + $0x2] ss:$9 sm:$0xff] %v2955_v20  ;;  %v3899_v48 = vsel %vm3857_vm2, %v3898_v39, %v3897_v58  ;;  %v2970_v20 = vperm.slane %v6569_v11, 1  ;;  %v2987_v39 = vperm.slane %v6566_v28, 2  ;;  %v2988_v58 = vperm.slane %v6566_v28, 3 }
 0x47d   : > { %3528 = vst [vmem:[#allocation1 + $0x3] ss:$9 sm:$0xff] %v2956_v6  ;;  %v2971_v6 = vperm.slane %v6569_v11, 2  ;;  %v3901_v25 = vsel %vm3861_vm3, %v3900_v41, %v3899_v48  ;;  %v2989_v48 = vperm.slane %v6566_v28, 4  ;;  %v2997_v41 = vperm.slane %v6582_v34, 4 }
 0x47e   : > { %3529 = vst [vmem:[#allocation1 + $0x4] ss:$9 sm:$0xff] %v2957_v9  ;;  %v2972_v9 = vperm.slane %v6569_v11, 3  ;;  %v3903_v14 = vsel %vm3865_vm4, %v3902_v19, %v3901_v25  ;;  %v3002_v25 = vperm.slane %v6577_v29, 1 }
 0x47f   : > { %3530 = vst [vmem:[#allocation1 + $0x5] ss:$9 sm:$0xff] %v2958_v26  ;;  %v2973_v26 = vperm.slane %v6569_v11, 4  ;;  %v3905_v2 = vsel %vm3869_vm5, %v3904_v49, %v3903_v14  ;;  %v3003_v49 = vperm.slane %v6577_v29, 2  ;;  %v3004_v14 = vperm.slane %v6577_v29, 3 }
 0x480   : > { %3531 = vst [vmem:[#allocation1 + $0x6] ss:$9 sm:$0xff] %v2959_v40  ;;  %v2975_v40 = vperm.slane %v6569_v11, 6 }
 0x481   : > { %3532 = vst [vmem:[#allocation1 + $0x7] ss:$9 sm:$0xff] %v2960_v21  ;;  %v2976_v21 = vperm.slane %v6569_v11, 7 }
 0x488   : > { %v3533_v38 = vld [vmem:[#allocation1] sm:$0xff] }
 0x489   : > { %3784 = vperm.xlu2 %5204, %v3533_v38   ;;  %3534 = vst [vmem:[#allocation1] ss:$9 sm:$0xff] %v2961_v31  ;;  %v2979_v31 = vperm.slane %v6564_v62, 2  ;;  %v2981_v38 = vperm.slane %v6564_v62, 4 }
 0x48a   : > { %3535 = vst [vmem:[#allocation1 + $0x1] ss:$9 sm:$0xff] %v2962_v35  ;;  %v2980_v35 = vperm.slane %v6564_v62, 3 }
 0x48b   : > { %3536 = vst [vmem:[#allocation1 + $0x2] ss:$9 sm:$0xff] %v2963_v46  ;;  %v3906_v46 = vperm.slane %v6740_v15, %v6810_v56 }
 0x48c   : > { %3537 = vst [vmem:[#allocation1 + $0x3] ss:$9 sm:$0xff] %v2964_v23  ;;  %v2983_v23 = vperm.slane %v6564_v62, 6 }
 0x48d   : > { %3538 = vst [vmem:[#allocation1 + $0x4] ss:$9 sm:$0xff] %v2965_v16  ;;  %v2984_v16 = vperm.slane %v6564_v62, 7  ;;  %v3907_v36 = vsel %vm3873_vm6, %v3906_v46, %v3905_v2  ;;  %v3005_v2 = vperm.slane %v6577_v29, 4  ;;  %v3013_v46 = vperm.slane %v6580_v7, 4 }
 0x48e   : > { %3539 = vst [vmem:[#allocation1 + $0x5] ss:$9 sm:$0xff] %v2966_v5  ;;  %v3719_v5 = vpop.permute.xlu0 %3718 }
 0x48f   : > { %3540 = vst [vmem:[#allocation1 + $0x6] ss:$9 sm:$0xff] %v2967_v17  ;;  %v3908_v17 = vperm.slane %v3719_v5, %v6858_v24  ;;  %v3017_v5 = vperm.slane %v6599_v57, 0 }
 0x490   : > { %3541 = vst [vmem:[#allocation1 + $0x7] ss:$9 sm:$0xff] %v2968_v8 }
 0x491   : > { %v3909_v8 = vsel %vm3877_vm7, %v3908_v17, %v3907_v36  ;;  %v3018_v36 = vperm.slane %v6599_v57, 1 }
 0x492   : > { %v3972_v33 = vrot.slane %v3909_v8, 7  ;;  %v3019_v8 = vperm.slane %v6599_v57, 2 }
 0x494   : > { %v6913_v15 = vsel %vm3975_vm8, %v6867_v47, %v3972_v33  ;;  %v2991_v47 = vperm.slane %v6566_v28, 6  ;;  %v3020_v33 = vperm.slane %v6599_v57, 3 }
 0x497   : > { %v3542_v63 = vld [vmem:[#allocation1] sm:$0xff] }
 0x498   : > { %3787 = vperm.xlu1 %5203, %v3542_v63   ;;  %3543 = vst [vmem:[#allocation1] ss:$9 sm:$0xff] %v2969_v37  ;;  %v2990_v37 = vperm.slane %v6566_v28, 5  ;;  %v2993_v63 = vperm.slane %v6582_v34, 0 }
 0x499   : > { %3544 = vst [vmem:[#allocation1 + $0x1] ss:$9 sm:$0xff] %v2970_v20  ;;  %v2992_v20 = vperm.slane %v6566_v28, 7  ;;  %v2998_v28 = vperm.slane %v6582_v34, 5 }
 0x49a   : > { %3545 = vst [vmem:[#allocation1 + $0x2] ss:$9 sm:$0xff] %v2971_v6  ;;  %v2994_v6 = vperm.slane %v6582_v34, 1 }
 0x49b   : > { %3546 = vst [vmem:[#allocation1 + $0x3] ss:$9 sm:$0xff] %v2972_v9 }
 0x49c   : > { %3547 = vst [vmem:[#allocation1 + $0x4] ss:$9 sm:$0xff] %v2973_v26  ;;  %v2995_v26 = vperm.slane %v6582_v34, 2 }
 0x49d   : > { %3548 = vst [vmem:[#allocation1 + $0x5] ss:$9 sm:$0xff] %v2974_v55  ;;  %v2996_v55 = vperm.slane %v6582_v34, 3 }
 0x49e   : > { %3549 = vst [vmem:[#allocation1 + $0x6] ss:$9 sm:$0xff] %v2975_v40  ;;  %v2999_v40 = vperm.slane %v6582_v34, 6 }
 0x49f   : > { %3550 = vst [vmem:[#allocation1 + $0x7] ss:$9 sm:$0xff] %v2976_v21  ;;  %v3000_v21 = vperm.slane %v6582_v34, 7  ;;  %v3006_v34 = vperm.slane %v6577_v29, 5 }
 0x4a6   : > { %v3551_v11 = vld [vmem:[#allocation1] sm:$0xff] }
 0x4a7   : > { %3790 = vperm.xlu0 %5202, %v3551_v11   ;;  %3552 = vst [vmem:[#allocation1] ss:$9 sm:$0xff] %v2977_v44  ;;  %v3007_v44 = vperm.slane %v6577_v29, 6  ;;  %v3009_v11 = vperm.slane %v6580_v7, 0 }
 0x4a8   : > { %3553 = vst [vmem:[#allocation1 + $0x1] ss:$9 sm:$0xff] %v2978_v3  ;;  %v3008_v3 = vperm.slane %v6577_v29, 7  ;;  %v3014_v29 = vperm.slane %v6580_v7, 5 }
 0x4a9   : > { %3554 = vst [vmem:[#allocation1 + $0x2] ss:$9 sm:$0xff] %v2979_v31  ;;  %v3010_v31 = vperm.slane %v6580_v7, 1 }
 0x4aa   : > { %3555 = vst [vmem:[#allocation1 + $0x3] ss:$9 sm:$0xff] %v2980_v35 }
 0x4ab   : > { %3556 = vst [vmem:[#allocation1 + $0x4] ss:$9 sm:$0xff] %v2981_v38  ;;  %v3011_v38 = vperm.slane %v6580_v7, 2 }
 0x4ac   : > { %3557 = vst [vmem:[#allocation1 + $0x5] ss:$9 sm:$0xff] %v2982_v43  ;;  %v3012_v43 = vperm.slane %v6580_v7, 3 }
 0x4ad   : > { %3558 = vst [vmem:[#allocation1 + $0x6] ss:$9 sm:$0xff] %v2983_v23  ;;  %v3015_v23 = vperm.slane %v6580_v7, 6 }
 0x4ae   : > { %3559 = vst [vmem:[#allocation1 + $0x7] ss:$9 sm:$0xff] %v2984_v16  ;;  %v3016_v16 = vperm.slane %v6580_v7, 7  ;;  %v3022_v7 = vperm.slane %v6599_v57, 5 }
 0x4b5   : > { %v3560_v62 = vld [vmem:[#allocation1] sm:$0xff] }
 0x4b6   : > { %3793 = vperm.xlu2 %5204, %v3560_v62   ;;  %3561 = vst [vmem:[#allocation1] ss:$9 sm:$0xff] %v2985_v61  ;;  %v3021_v61 = vperm.slane %v6599_v57, 4  ;;  %v3024_v62 = vperm.slane %v6599_v57, 7 }
 0x4b7   : > { %3562 = vst [vmem:[#allocation1 + $0x1] ss:$9 sm:$0xff] %v2986_v50  ;;  %v3023_v50 = vperm.slane %v6599_v57, 6  ;;  %v3030_v57 = vperm.slane %v6592_v27, 5 }
 0x4b8   : > { %3563 = vst [vmem:[#allocation1 + $0x2] ss:$9 sm:$0xff] %v2987_v39  ;;  %v3025_v39 = vperm.slane %v6592_v27, 0 }
 0x4b9   : > { %3564 = vst [vmem:[#allocation1 + $0x3] ss:$9 sm:$0xff] %v2988_v58  ;;  %v3026_v58 = vperm.slane %v6592_v27, 1 }
 0x4ba   : > { %3565 = vst [vmem:[#allocation1 + $0x4] ss:$9 sm:$0xff] %v2989_v48 }
 0x4bb   : > { %3566 = vst [vmem:[#allocation1 + $0x5] ss:$9 sm:$0xff] %v2990_v37  ;;  %v3027_v37 = vperm.slane %v6592_v27, 2 }
 0x4bc   : > { %3567 = vst [vmem:[#allocation1 + $0x6] ss:$9 sm:$0xff] %v2991_v47  ;;  %v3028_v47 = vperm.slane %v6592_v27, 3 }
 0x4bd   : > { %3568 = vst [vmem:[#allocation1 + $0x7] ss:$9 sm:$0xff] %v2992_v20  ;;  %v3029_v20 = vperm.slane %v6592_v27, 4 }
 0x4c4   : > { %v3569_v9 = vld [vmem:[#allocation1] sm:$0xff] }
 0x4c5   : > { %3796 = vperm.xlu1 %5203, %v3569_v9   ;;  %3570 = vst [vmem:[#allocation1] ss:$9 sm:$0xff] %v2993_v63  ;;  %v3031_v63 = vperm.slane %v6592_v27, 6  ;;  %v3033_v9 = vperm.slane %v6759_v59, 0 }
 0x4c6   : > { %3571 = vst [vmem:[#allocation1 + $0x1] ss:$9 sm:$0xff] %v2994_v6  ;;  %v3032_v6 = vperm.slane %v6592_v27, 7  ;;  %v3038_v27 = vperm.slane %v6759_v59, 5 }
 0x4c7   : > { %3572 = vst [vmem:[#allocation1 + $0x2] ss:$9 sm:$0xff] %v2995_v26  ;;  %v3034_v26 = vperm.slane %v6759_v59, 1 }
 0x4c8   : > { %3573 = vst [vmem:[#allocation1 + $0x3] ss:$9 sm:$0xff] %v2996_v55 }
 0x4c9   : > { %3574 = vst [vmem:[#allocation1 + $0x4] ss:$9 sm:$0xff] %v2997_v41  ;;  %v3035_v41 = vperm.slane %v6759_v59, 2 }
 0x4ca   : > { %3575 = vst [vmem:[#allocation1 + $0x5] ss:$9 sm:$0xff] %v2998_v28  ;;  %v3036_v28 = vperm.slane %v6759_v59, 3 }
 0x4cb   : > { %3576 = vst [vmem:[#allocation1 + $0x6] ss:$9 sm:$0xff] %v2999_v40  ;;  %v3037_v40 = vperm.slane %v6759_v59, 4 }
 0x4cc   : > { %3577 = vst [vmem:[#allocation1 + $0x7] ss:$9 sm:$0xff] %v3000_v21  ;;  %v3039_v21 = vperm.slane %v6759_v59, 6 }
 0x4d3   : > { %v3578_v19 = vld [vmem:[#allocation1] sm:$0xff] }
 0x4d4   : > { %3799 = vperm.xlu0 %5202, %v3578_v19   ;;  %3579 = vst [vmem:[#allocation1] ss:$9 sm:$0xff] %v3001_v51  ;;  %v3040_v51 = vperm.slane %v6759_v59, 7  ;;  %v3728_v19 = vpop.permute.xlu0 %3727 }
 0x4d5   : > { %3580 = vst [vmem:[#allocation1 + $0x1] ss:$9 sm:$0xff] %v3002_v25 }
 0x4d6   : > { %3581 = vst [vmem:[#allocation1 + $0x2] ss:$9 sm:$0xff] %v3003_v49 }
 0x4d7   : > { %3582 = vst [vmem:[#allocation1 + $0x3] ss:$9 sm:$0xff] %v3004_v14  ;;  %v3731_v14 = vpop.permute.xlu2 %3730 }
 0x4d8   : > { %3583 = vst [vmem:[#allocation1 + $0x4] ss:$9 sm:$0xff] %v3005_v2  ;;  %v3734_v2 = vpop.permute.xlu1 %3733 }
 0x4d9   : > { %3584 = vst [vmem:[#allocation1 + $0x5] ss:$9 sm:$0xff] %v3006_v34 }
 0x4da   : > { %3585 = vst [vmem:[#allocation1 + $0x6] ss:$9 sm:$0xff] %v3007_v44 }
 0x4db   : > { %3586 = vst [vmem:[#allocation1 + $0x7] ss:$9 sm:$0xff] %v3008_v3 }
 0x4dc   : > { %v3737_v49 = vpop.permute.xlu0 %3736 }
 0x4df   : > { %v3740_v44 = vpop.permute.xlu2 %3739 }
 0x4e0   : > { %v3743_v3 = vpop.permute.xlu1 %3742 }
 0x4e2   : > { %v3587_v35 = vld [vmem:[#allocation1] sm:$0xff] }
 0x4e3   : > { %3802 = vperm.xlu2 %5204, %v3587_v35   ;;  %3588 = vst [vmem:[#allocation1] ss:$9 sm:$0xff] %v3009_v11 }
 0x4e4   : > { %3589 = vst [vmem:[#allocation1 + $0x1] ss:$9 sm:$0xff] %v3010_v31  ;;  %v3746_v34 = vpop.permute.xlu0 %3745 }
 0x4e5   : > { %3590 = vst [vmem:[#allocation1 + $0x2] ss:$9 sm:$0xff] %v3011_v38 }
 0x4e6   : > { %3591 = vst [vmem:[#allocation1 + $0x3] ss:$9 sm:$0xff] %v3012_v43 }
 0x4e7   : > { %3592 = vst [vmem:[#allocation1 + $0x4] ss:$9 sm:$0xff] %v3013_v46  ;;  %v3749_v31 = vpop.permute.xlu2 %3748 }
 0x4e8   : > { %3593 = vst [vmem:[#allocation1 + $0x5] ss:$9 sm:$0xff] %v3014_v29  ;;  %v3752_v35 = vpop.permute.xlu1 %3751 }
 0x4e9   : > { %3594 = vst [vmem:[#allocation1 + $0x6] ss:$9 sm:$0xff] %v3015_v23 }
 0x4ea   : > { %3595 = vst [vmem:[#allocation1 + $0x7] ss:$9 sm:$0xff] %v3016_v16 }
 0x4ec   : > { %v3755_v11 = vpop.permute.xlu0 %3754 }
 0x4ef   : > { %v3758_v38 = vpop.permute.xlu2 %3757 }
 0x4f0   : > { %v6973_v46 = vpop.permute.xlu1 %3760 }
 0x4f1   : > { %v3596_v17 = vld [vmem:[#allocation1] sm:$0xff] }
 0x4f2   : > { %3805 = vperm.xlu1 %5203, %v3596_v17   ;;  %3597 = vst [vmem:[#allocation1] ss:$9 sm:$0xff] %v3017_v5  ;;  %v3913_v5 = vperm.slane %v3728_v19, %v6611_v12 }
 0x4f3   : > { %3598 = vst [vmem:[#allocation1 + $0x1] ss:$9 sm:$0xff] %v3018_v36 }
 0x4f4   : > { %3599 = vst [vmem:[#allocation1 + $0x2] ss:$9 sm:$0xff] %v3019_v8  ;;  %v6971_v43 = vpop.permute.xlu0 %3763  ;;  %v3914_v8 = vsel %vm3825_vm9, %v3913_v5, %v6750_v0  ;;  %v3921_v0 = vperm.slane %v3740_v44, %v6643_v10 }
 0x4f5   : > { %3600 = vst [vmem:[#allocation1 + $0x3] ss:$9 sm:$0xff] %v3020_v33  ;;  %v3915_v33 = vperm.slane %v3731_v14, %v6631_v52  ;;  %v3931_v14 = vperm.slane %v3755_v11, %v6788_v42 }
 0x4f6   : > { %3601 = vst [vmem:[#allocation1 + $0x4] ss:$9 sm:$0xff] %v3021_v61 }
 0x4f7   : > { %3602 = vst [vmem:[#allocation1 + $0x5] ss:$9 sm:$0xff] %v3022_v7  ;;  %v6975_v59 = vpop.permute.xlu2 %3766  ;;  %v3916_v61 = vsel %vm3829_vm10, %v3915_v33, %v3914_v8  ;;  %v3919_v7 = vperm.slane %v3737_v49, %v6628_v54  ;;  %v3935_v8 = vperm.slane %v6973_v46, %v6814_v32 }
 0x4f8   : > { %3603 = vst [vmem:[#allocation1 + $0x6] ss:$9 sm:$0xff] %v3023_v50  ;;  %v3770_v29 = vpop.permute.xlu1 %3769 }
 0x4f9   : > { %3604 = vst [vmem:[#allocation1 + $0x7] ss:$9 sm:$0xff] %v3024_v62  ;;  %v3917_v62 = vperm.slane %v3734_v2, %v6624_v22 }
 0x4fc   : > { %v3773_v23 = vpop.permute.xlu0 %3772 }
 0x4ff   : > { %v3776_v16 = vpop.permute.xlu2 %3775 }
 0x500   : > { %v3605_v48 = vld [vmem:[#allocation1] sm:$0xff]  ;;  %v3779_v36 = vpop.permute.xlu1 %3778 }
 0x501   : > { %3808 = vperm.xlu0 %5202, %v3605_v48   ;;  %3606 = vst [vmem:[#allocation1] ss:$9 sm:$0xff] %v3025_v39  ;;  %v3942_v39 = vperm.slane %v3773_v23, %v6608_v53  ;;  %v3918_v48 = vsel %vm3833_vm11, %v3917_v62, %v3916_v61  ;;  %v3944_v53 = vperm.slane %v3776_v16, %v6611_v12 }
 0x502   : > { %3607 = vst [vmem:[#allocation1 + $0x1] ss:$9 sm:$0xff] %v3026_v58  ;;  %v3927_v12 = vperm.slane %v3749_v31, %v6770_v13  ;;  %v3933_v16 = vperm.slane %v3758_v38, %v6791_v60 }
 0x503   : > { %3608 = vst [vmem:[#allocation1 + $0x2] ss:$9 sm:$0xff] %v3027_v37 }
 0x504   : > { %3609 = vst [vmem:[#allocation1 + $0x3] ss:$9 sm:$0xff] %v3028_v47  ;;  %v3782_v17 = vpop.permute.xlu0 %3781  ;;  %v3920_v47 = vsel %vm3837_vm12, %v3919_v7, %v3918_v48 }
 0x505   : > { %3610 = vst [vmem:[#allocation1 + $0x4] ss:$9 sm:$0xff] %v3029_v20  ;;  %v3941_v20 = vperm.slane %v3770_v29, %v6604_v30 }
 0x506   : > { %3611 = vst [vmem:[#allocation1 + $0x5] ss:$9 sm:$0xff] %v3030_v57 }
 0x507   : > { %3612 = vst [vmem:[#allocation1 + $0x6] ss:$9 sm:$0xff] %v3031_v63  ;;  %v3785_v50 = vpop.permute.xlu2 %3784  ;;  %v3943_v57 = vsel %vm3821_vm0, %v3942_v39, %v3941_v20  ;;  %v3946_v63 = vperm.slane %v3779_v36, %v6631_v52  ;;  %v3939_v39 = vperm.slane %v6975_v59, %v6858_v24  ;;  %vm3977_vm0 = vcmask 1042434  }
 0x508   : > { %3613 = vst [vmem:[#allocation1 + $0x7] ss:$9 sm:$0xff] %v3032_v6  ;;  %v3922_v6 = vsel %vm3841_vm13, %v3921_v0, %v3920_v47 }
 0x50a   : > { %v3788_v58 = vpop.permute.xlu1 %3787 }
 0x50f   : > { %v3614_v55 = vld [vmem:[#allocation1] sm:$0xff] }
 0x510   : > { %3811 = vperm.xlu2 %5204, %v3614_v55   ;;  %3615 = vst [vmem:[#allocation1] ss:$9 sm:$0xff] %v3033_v9  ;;  %v3925_v9 = vperm.slane %v3746_v34, %v6766_v18  ;;  %v3923_v55 = vperm.slane %v3743_v3, %v6773_v4  ;;  %v3929_v34 = vperm.slane %v3752_v35, %v6794_v1 }
 0x511   : > { %3616 = vst [vmem:[#allocation1 + $0x1] ss:$9 sm:$0xff] %v3034_v26  ;;  %v3948_v26 = vperm.slane %v3782_v17, %v6624_v22  ;;  %v3950_v22 = vperm.slane %v3785_v50, %v6628_v54 }
 0x512   : > { %3617 = vst [vmem:[#allocation1 + $0x2] ss:$9 sm:$0xff] %v3035_v41  ;;  %v3794_v41 = vpop.permute.xlu2 %3793  ;;  %v3924_v30 = vsel %vm3845_vm14, %v3923_v55, %v3922_v6 }
 0x513   : > { %3618 = vst [vmem:[#allocation1 + $0x3] ss:$9 sm:$0xff] %v3036_v28  ;;  %v3945_v28 = vsel %vm3825_vm9, %v3944_v53, %v3943_v57  ;;  %v3926_v52 = vsel %vm3849_vm15, %v3925_v9, %v3924_v30  ;;  %v3956_v54 = vperm.slane %v3794_v41, %v6766_v18  ;;  %vm3979_vm9 = vcmask 1041408  }
 0x514   : > { %3619 = vst [vmem:[#allocation1 + $0x4] ss:$9 sm:$0xff] %v3037_v40  ;;  %v3947_v40 = vsel %vm3829_vm10, %v3946_v63, %v3945_v28  ;;  %v3928_v49 = vsel %vm3853_vm1, %v3927_v12, %v3926_v52  ;;  %vm3984_vm10 = vcmp.lt.s32.totalorder %v3816_v45, 512 }
 0x515   : > { %3620 = vst [vmem:[#allocation1 + $0x5] ss:$9 sm:$0xff] %v3038_v27  ;;  %v3930_v31 = vsel %vm3857_vm2, %v3929_v34, %v3928_v49 }
 0x516   : > { %3621 = vst [vmem:[#allocation1 + $0x6] ss:$9 sm:$0xff] %v3039_v21  ;;  %v3949_v21 = vsel %vm3833_vm11, %v3948_v26, %v3947_v40  ;;  %v3932_v23 = vsel %vm3861_vm3, %v3931_v14, %v3930_v31 }
 0x517   : > { %3622 = vst [vmem:[#allocation1 + $0x7] ss:$9 sm:$0xff] %v3040_v51  ;;  %v3952_v51 = vperm.slane %v3788_v58, %v6643_v10  ;;  %v3951_v2 = vsel %vm3837_vm12, %v3950_v22, %v3949_v21  ;;  %v3934_v17 = vsel %vm3865_vm4, %v3933_v16, %v3932_v23 }
 0x518   : > { %v3936_v61 = vsel %vm3869_vm5, %v3935_v8, %v3934_v17 }
 0x519   : > { %v3791_v37 = vpop.permute.xlu0 %3790  ;;  %v3953_v44 = vsel %vm3841_vm13, %v3952_v51, %v3951_v2 }
 0x51a   : > { %v3954_v19 = vperm.slane %v3791_v37, %v6773_v4 }
 0x51c   : > { %v3955_v3 = vsel %vm3845_vm14, %v3954_v19, %v3953_v44 }
 0x51d   : > { %v3957_v35 = vsel %vm3849_vm15, %v3956_v54, %v3955_v3 }
 0x51e   : > { %v3623_v25 = vld [vmem:[#allocation1] sm:$0xff] }
 0x51f   : > { %3814 = vperm.xlu1 %5203, %v3623_v25  }
 0x537   : > { %v3797_v27 = vpop.permute.xlu1 %3796 }
 0x538   : > { %v3958_v29 = vperm.slane %v3797_v27, %v6770_v13  ;;  %v3937_v13 = vperm.slane %v6971_v43, %v6810_v56 }
 0x53a   : > { %v3959_v36 = vsel %vm3853_vm1, %v3958_v29, %v3957_v35  ;;  %v3938_v62 = vsel %vm3873_vm6, %v3937_v13, %v3936_v61 }
 0x53d   : > { %v3803_v10 = vpop.permute.xlu2 %3802 }
 0x53e   : > { %v3962_v38 = vperm.slane %v3803_v10, %v6788_v42 }
 0x546   : > { %v3800_v25 = vpop.permute.xlu0 %3799 }
 0x547   : > { %v3960_v4 = vperm.slane %v3800_v25, %v6794_v1 }
 0x549   : > { %v3961_v18 = vsel %vm3857_vm2, %v3960_v4, %v3959_v36 }
 0x54a   : > { %v3963_v50 = vsel %vm3861_vm3, %v3962_v38, %v3961_v18 }
 0x564   : > { %v3806_v11 = vpop.permute.xlu1 %3805 }
 0x565   : > { %v3964_v1 = vperm.slane %v3806_v11, %v6791_v60 }
 0x567   : > { %v3965_v43 = vsel %vm3865_vm4, %v3964_v1, %v3963_v50 }
 0x56a   : > { %v3812_v7 = vpop.permute.xlu2 %3811 }
 0x56b   : > { %v3968_v46 = vperm.slane %v3812_v7, %v6810_v56 }
 0x573   : > { %v3809_v5 = vpop.permute.xlu0 %3808 }
 0x574   : > { %v3966_v33 = vperm.slane %v3809_v5, %v6814_v32  ;;  %v3940_v32 = vsel %vm3877_vm7, %v3939_v39, %v3938_v62 }
 0x575   : > { %v3973_v47 = vrot.slane %v3940_v32, 6 }
 0x576   : > { %v3967_v60 = vsel %vm3869_vm5, %v3966_v33, %v3965_v43 }
 0x577   : > { %v3969_v48 = vsel %vm3873_vm6, %v3968_v46, %v3967_v60 }
 0x591   : > { %v3815_v42 = vpop.permute.xlu1 %3814 }
 0x592   : > { %v3970_v58 = vperm.slane %v3815_v42, %v6858_v24 }
 0x594   : > { %v3971_v37 = vsel %vm3877_vm7, %v3970_v58, %v3969_v48 }
 0x595   : > { %v3974_v20 = vrot.slane %v3971_v37, 5  ;;  %3993 = sbr.rel (!%p5430_p4) target bundleno = 1581 (0x62d), region = 52 }
 0x597   : > { %v3978_v59 = vsel %vm3977_vm0, %v3973_v47, %v3974_v20 }
 0x598   : > { %v3980_v0 = vsel %vm3979_vm9, %v6913_v15, %v3978_v59 }
 0x599   : > { %3986 = vst.msk [vmem:[%s7043_s24] sm:$0xf] %vm3984_vm10, %v3980_v0 }
 0x59a   : > { %s7415_s10 = smov (!%p3996_p8, %s3995_s10), 4 }
 0x59b   : > { %p4787_p9 = scmp.eq.s32.totalorder %s7415_s10, 0 }
 0x59c   : > { %p4003_p10 = scmp.lt.u32.totalorder (!%p4787_p9), %s7415_s10, 8 }
 0x59d   : > { %4002 = sbr.rel (%p4787_p9) target bundleno = 1581 (0x62d), region = 56 }
 0x5a2   : > { %4006 = sbr.rel (%p4003_p10) target bundleno = 1572 (0x624), region = 60  ;;  %s7059_s9 = sand.u32 (!%p4003_p10), 7, %s7415_s10  }
 0x5a3   : > { %p4023_p11 = scmp.eq.s32.totalorder (!%p4003_p10), %s7059_s9, 0  ;;  %p4788_p12 = scmp.ne.s32.totalorder (!%p4003_p10), %s7059_s9, 0 }
 0x5a7   : > { %4026 = sbr.rel (%p4788_p12) target bundleno = 1507 (0x5e3), region = 75  ;;  %s4027_s27 = sshrl.u32 (!%p4788_p12), %s7415_s10, 3 }
 0x5a8   : > { %s7066_s14 = sshrl.u32 (!%p4788_p12), %s4027_s27, 5 }
 0x5a9   : > { %p4789_p13 = scmp.le.s32.totalorder (!%p4788_p12), %s7066_s14, 0 }
 0x5ac   : > { %4345 = sbr.rel (%p4789_p13) target bundleno = 1490 (0x5d2), region = 172  ;;  %s7398_s15 = smov (!%p4789_p13), %s7052_s13 }
 0x5ad   : > { %s7399_s16 = smov (!%p4789_p13), %s7043_s24  ;;  %s7075_s17 = smov (!%p4789_p13), 0  }
 0x5ae   : > { %s7077_s18 = smov (!%p4789_p13), 0  }
 0x5b1 LB: >> { %v4038_v45 = vld [vmem:[%s5304_s16] sm:$0xff]  ;;  %v4040_v56 = vld [vmem:[%s5304_s16 + $0x8] sm:$0xff]  ;;  %v4042_v24 = vld [vmem:[%s5304_s16 + $0x10] sm:$0xff]  ;;  %s4102_s19 = sadd.s32 1, %s5308_s17  ;;  %s4032_s18 = sadd.s32 1, %s5312_s18   ;;  %s5312_s18 = sphi %s7077_s18, %s4032_s18   ;;  %s5308_s17 = sphi %s7075_s17, %s7402_s17   ;;  %s5304_s16 = sphi %s7399_s16, %s7401_s16   ;;  %s5300_s15 = sphi %s7398_s15, %s7400_s15  }
 0x5b2   : >> { %4039 = vst [vmem:[%s5300_s15] sm:$0xff] %v4038_v45  ;;  %v4044_v15 = vld [vmem:[%s5304_s16 + $0x18] sm:$0xff]  ;;  %p4103_p0 = scmp.ge.s32.totalorder %s4102_s19, %s7066_s14  ;;  %v4046_v57 = vld [vmem:[%s5304_s16 + $0x20] sm:$0xff]  ;;  %v4048_v63 = vld [vmem:[%s5304_s16 + $0x28] sm:$0xff]  ;;  %p4031_p1 = scmp.ge.s32.totalorder %s4032_s18, %s7066_s14 }
 0x5b3   : >> { %4041 = vst [vmem:[%s5300_s15 + $0x8] sm:$0xff] %v4040_v56  ;;  %v4050_v6 = vld [vmem:[%s5304_s16 + $0x30] sm:$0xff]  ;;  %v4052_v9 = vld [vmem:[%s5304_s16 + $0x38] sm:$0xff]  ;;  %v4054_v53 = vld [vmem:[%s5304_s16 + $0x40] sm:$0xff] }
 0x5b4   : >> { %4043 = vst [vmem:[%s5300_s15 + $0x10] sm:$0xff] %v4042_v24  ;;  %s7417_s19 = smov (%p4103_p0, %s4102_s19), 0  ;;  %v4056_v26 = vld [vmem:[%s5304_s16 + $0x48] sm:$0xff]  ;;  %v4058_v55 = vld [vmem:[%s5304_s16 + $0x50] sm:$0xff]  ;;  %v4060_v41 = vld [vmem:[%s5304_s16 + $0x58] sm:$0xff] }
 0x5b5   : >> { %4045 = vst [vmem:[%s5300_s15 + $0x18] sm:$0xff] %v4044_v15  ;;  %s4790_s20 = sshll.u32 %s7417_s19, 8  ;;  %v4062_v28 = vld [vmem:[%s5304_s16 + $0x60] sm:$0xff]  ;;  %v4064_v30 = vld [vmem:[%s5304_s16 + $0x68] sm:$0xff]  ;;  %v4066_v40 = vld [vmem:[%s5304_s16 + $0x70] sm:$0xff]  ;;  %s7402_s17 = smov %s7417_s19 }
 0x5b6   : >> { %4047 = vst [vmem:[%s5300_s15 + $0x20] sm:$0xff] %v4046_v57  ;;  %s7109_s21 = scalar_lea.vmem %s7043_s24, %s4790_s20 [#allocation2]   ;;  %s7112_s22 = scalar_lea.vmem %s7052_s13, %s4790_s20   ;;  %v4068_v27 = vld [vmem:[%s5304_s16 + $0x78] sm:$0xff]  ;;  %v4070_v52 = vld [vmem:[%s5304_s16 + $0x80] sm:$0xff]  ;;  %v4072_v21 = vld [vmem:[%s5304_s16 + $0x88] sm:$0xff] }
 0x5b7   : >> { %4049 = vst [vmem:[%s5300_s15 + $0x28] sm:$0xff] %v4048_v63  ;;  %v4074_v51 = vld [vmem:[%s5304_s16 + $0x90] sm:$0xff]  ;;  %v4076_v25 = vld [vmem:[%s5304_s16 + $0x98] sm:$0xff]  ;;  %v4078_v12 = vld [vmem:[%s5304_s16 + $0xa0] sm:$0xff] }
 0x5b8   : >> { %4051 = vst [vmem:[%s5300_s15 + $0x30] sm:$0xff] %v4050_v6  ;;  %v4080_v22 = vld [vmem:[%s5304_s16 + $0xa8] sm:$0xff]  ;;  %v4082_v19 = vld [vmem:[%s5304_s16 + $0xb0] sm:$0xff]  ;;  %v4084_v49 = vld [vmem:[%s5304_s16 + $0xb8] sm:$0xff] }
 0x5b9   : >> { %4053 = vst [vmem:[%s5300_s15 + $0x38] sm:$0xff] %v4052_v9  ;;  %v4086_v14 = vld [vmem:[%s5304_s16 + $0xc0] sm:$0xff]  ;;  %v4088_v2 = vld [vmem:[%s5304_s16 + $0xc8] sm:$0xff]  ;;  %v4090_v34 = vld [vmem:[%s5304_s16 + $0xd0] sm:$0xff] }
 0x5ba   : >> { %4055 = vst [vmem:[%s5300_s15 + $0x40] sm:$0xff] %v4054_v53  ;;  %v4092_v44 = vld [vmem:[%s5304_s16 + $0xd8] sm:$0xff]  ;;  %v4094_v3 = vld [vmem:[%s5304_s16 + $0xe0] sm:$0xff]  ;;  %v4096_v10 = vld [vmem:[%s5304_s16 + $0xe8] sm:$0xff] }
 0x5bb   : >> { %4057 = vst [vmem:[%s5300_s15 + $0x48] sm:$0xff] %v4056_v26  ;;  %v4098_v29 = vld [vmem:[%s5304_s16 + $0xf0] sm:$0xff]  ;;  %v4100_v31 = vld [vmem:[%s5304_s16 + $0xf8] sm:$0xff]  ;;  %s7401_s16 = smov %s7109_s21 }
 0x5bc   : >> { %4059 = vst [vmem:[%s5300_s15 + $0x50] sm:$0xff] %v4058_v55 }
 0x5bd   : >> { %4061 = vst [vmem:[%s5300_s15 + $0x58] sm:$0xff] %v4060_v41 }
 0x5be   : >> { %4063 = vst [vmem:[%s5300_s15 + $0x60] sm:$0xff] %v4062_v28 }
 0x5bf   : >> { %4065 = vst [vmem:[%s5300_s15 + $0x68] sm:$0xff] %v4064_v30 }
 0x5c0   : >> { %4067 = vst [vmem:[%s5300_s15 + $0x70] sm:$0xff] %v4066_v40 }
 0x5c1   : >> { %4069 = vst [vmem:[%s5300_s15 + $0x78] sm:$0xff] %v4068_v27 }
 0x5c2   : >> { %4071 = vst [vmem:[%s5300_s15 + $0x80] sm:$0xff] %v4070_v52 }
 0x5c3   : >> { %4073 = vst [vmem:[%s5300_s15 + $0x88] sm:$0xff] %v4072_v21 }
 0x5c4   : >> { %4075 = vst [vmem:[%s5300_s15 + $0x90] sm:$0xff] %v4074_v51 }
 0x5c5   : >> { %4077 = vst [vmem:[%s5300_s15 + $0x98] sm:$0xff] %v4076_v25 }
 0x5c6   : >> { %4079 = vst [vmem:[%s5300_s15 + $0xa0] sm:$0xff] %v4078_v12 }
 0x5c7   : >> { %4081 = vst [vmem:[%s5300_s15 + $0xa8] sm:$0xff] %v4080_v22 }
 0x5c8   : >> { %4083 = vst [vmem:[%s5300_s15 + $0xb0] sm:$0xff] %v4082_v19 }
 0x5c9   : >> { %4085 = vst [vmem:[%s5300_s15 + $0xb8] sm:$0xff] %v4084_v49 }
 0x5ca   : >> { %4087 = vst [vmem:[%s5300_s15 + $0xc0] sm:$0xff] %v4086_v14 }
 0x5cb   : >> { %4089 = vst [vmem:[%s5300_s15 + $0xc8] sm:$0xff] %v4088_v2 }
 0x5cc   : >> { %4091 = vst [vmem:[%s5300_s15 + $0xd0] sm:$0xff] %v4090_v34 }
 0x5cd   : >> { %4093 = vst [vmem:[%s5300_s15 + $0xd8] sm:$0xff] %v4092_v44  ;;  %4034 = sbr.rel (!%p4031_p1) target bundleno = 1457 (0x5b1), region = 178 }
 0x5ce   : >> { %4095 = vst [vmem:[%s5300_s15 + $0xe0] sm:$0xff] %v4094_v3 }
 0x5cf   : >> { %4097 = vst [vmem:[%s5300_s15 + $0xe8] sm:$0xff] %v4096_v10 }
 0x5d0   : >> { %4099 = vst [vmem:[%s5300_s15 + $0xf0] sm:$0xff] %v4098_v29 }
 0x5d1   : >> { %4101 = vst [vmem:[%s5300_s15 + $0xf8] sm:$0xff] %v4100_v31  ;;  %s7400_s15 = smov %s7112_s22 }
 0x5d2 PF: > { %s7178_s23 = sand.u32 31, %s4027_s27   ;;  %s4880_s26 = sshll.u32 %s7066_s14, 8 }
 0x5d3   : > { %s4113_s29 = scalar_lea.vmem %s7043_s24, %s4880_s26 [#allocation2]   ;;  %s4115_s30 = scalar_lea.vmem %s7052_s13, %s4880_s26  }
 0x5d4   : > { %p4795_p2 = scmp.le.s32.totalorder %s7178_s23, 0 }
 0x5d5   : > { %s5314_s11 = smov (!%p4795_p2), %s4115_s30   ;;  %s5318_s12 = smov (!%p4795_p2), %s4113_s29  }
 0x5d6   : > { %4359 = sbr.rel (%p4795_p2) target bundleno = 1507 (0x5e3), region = 183  ;;  %s5322_s19 = smov (!%p4795_p2), 0  }
 0x5d7   : > { %s5326_s20 = smov (!%p4795_p2), 0  }
 0x5db LB: >> { %v4125_v54 = vld [vmem:[%s5320_s12] sm:$0xff]  ;;  %s4127_s27 = sadd.s32 1, %s5324_s19  ;;  %s4119_s20 = sadd.s32 1, %s5328_s20   ;;  %s5328_s20 = sphi %s5326_s20, %s4119_s20   ;;  %s5324_s19 = sphi %s5322_s19, %s5323_s19   ;;  %s5320_s12 = sphi %s5318_s12, %s4132_s12   ;;  %s5316_s11 = sphi %s5314_s11, %s4133_s11  }
 0x5dc   : >> { %4126 = vst [vmem:[%s5316_s11] sm:$0xff] %v4125_v54  ;;  %p4128_p3 = scmp.ge.s32.totalorder %s4127_s27, %s7178_s23  ;;  %p4118_p4 = scmp.ge.s32.totalorder %s4119_s20, %s7178_s23 }
 0x5de   : >> { %s7419_s27 = smov (%p4128_p3, %s4127_s27), 0  ;;  %4121 = sbr.rel (!%p4118_p4) target bundleno = 1499 (0x5db), region = 189 }
 0x5df   : >> { %s4796_s14 = sshll.u32 %s7419_s27, 3  ;;  %s5323_s19 = smov %s7419_s27  }
 0x5e0   : >> { %s4132_s12 = scalar_lea.vmem %s4113_s29, %s4796_s14 [#allocation2]   ;;  %s4133_s11 = scalar_lea.vmem %s4115_s30, %s4796_s14  }
 0x5e3 PF: > { %4136 = sbr.rel (%p4023_p11) target bundleno = 1572 (0x624), region = 93  ;;  %s7190_s15 = ssub.s32 (!%p4023_p11), %s7415_s10, %s7059_s9 }
 0x5e4   : > { %s4142_s16 = sshrl.u32 (!%p4023_p11), %s7415_s10, 3  ;;  %s4139_s17 = scalar_lea.vmem (!%p4023_p11), %s7043_s24, %s7190_s15 [#allocation2] }
 0x5e5   : > { %s7199_s21 = sshrl.u32 (!%p4023_p11), %s4142_s16, 5 }
 0x5e6   : > { %p4798_p5 = scmp.le.s32.totalorder (!%p4023_p11), %s7199_s21, 0 }
 0x5e8   : > { %4373 = sbr.rel (%p4798_p5) target bundleno = 1550 (0x60e), region = 194  ;;  %s7403_s22 = smov (!%p4798_p5), %s7052_s13 }
 0x5e9   : > { %s7404_s23 = smov (!%p4798_p5), %s7043_s24  ;;  %s7208_s26 = smov (!%p4798_p5), 0  }
 0x5ea   : > { %s7210_s29 = smov (!%p4798_p5), 0  }
 0x5ed LB: >> { %v4153_v4 = vld [vmem:[%s5336_s23] sm:$0xff]  ;;  %v4155_v23 = vld [vmem:[%s5336_s23 + $0x8] sm:$0xff]  ;;  %v4157_v11 = vld [vmem:[%s5336_s23 + $0x10] sm:$0xff]  ;;  %s4217_s30 = sadd.s32 1, %s5340_s26  ;;  %s4147_s29 = sadd.s32 1, %s5344_s29   ;;  %s5344_s29 = sphi %s7210_s29, %s4147_s29   ;;  %s5340_s26 = sphi %s7208_s26, %s7407_s26   ;;  %s5336_s23 = sphi %s7404_s23, %s7406_s23   ;;  %s5332_s22 = sphi %s7403_s22, %s7405_s22  }
 0x5ee   : >> { %4154 = vst [vmem:[%s5332_s22] sm:$0xff] %v4153_v4  ;;  %v4159_v16 = vld [vmem:[%s5336_s23 + $0x18] sm:$0xff]  ;;  %p4218_p6 = scmp.ge.s32.totalorder %s4217_s30, %s7199_s21  ;;  %v4161_v35 = vld [vmem:[%s5336_s23 + $0x20] sm:$0xff]  ;;  %v4163_v5 = vld [vmem:[%s5336_s23 + $0x28] sm:$0xff]  ;;  %p4146_p7 = scmp.ge.s32.totalorder %s4147_s29, %s7199_s21 }
 0x5ef   : >> { %4156 = vst [vmem:[%s5332_s22 + $0x8] sm:$0xff] %v4155_v23  ;;  %v4165_v36 = vld [vmem:[%s5336_s23 + $0x30] sm:$0xff]  ;;  %v4167_v17 = vld [vmem:[%s5336_s23 + $0x38] sm:$0xff]  ;;  %v4169_v13 = vld [vmem:[%s5336_s23 + $0x40] sm:$0xff] }
 0x5f0   : >> { %4158 = vst [vmem:[%s5332_s22 + $0x10] sm:$0xff] %v4157_v11  ;;  %s7421_s30 = smov (%p4218_p6, %s4217_s30), 0  ;;  %v4171_v18 = vld [vmem:[%s5336_s23 + $0x48] sm:$0xff]  ;;  %v4173_v1 = vld [vmem:[%s5336_s23 + $0x50] sm:$0xff]  ;;  %v4175_v8 = vld [vmem:[%s5336_s23 + $0x58] sm:$0xff] }
 0x5f1   : >> { %4160 = vst [vmem:[%s5332_s22 + $0x18] sm:$0xff] %v4159_v16  ;;  %s4799_s11 = sshll.u32 %s7421_s30, 8  ;;  %v4177_v38 = vld [vmem:[%s5336_s23 + $0x60] sm:$0xff]  ;;  %v4179_v33 = vld [vmem:[%s5336_s23 + $0x68] sm:$0xff]  ;;  %v4181_v61 = vld [vmem:[%s5336_s23 + $0x70] sm:$0xff]  ;;  %s7407_s26 = smov %s7421_s30 }
 0x5f2   : >> { %4162 = vst [vmem:[%s5332_s22 + $0x20] sm:$0xff] %v4161_v35  ;;  %s7242_s12 = scalar_lea.vmem %s7043_s24, %s4799_s11 [#allocation2]   ;;  %s7245_s19 = scalar_lea.vmem %s7052_s13, %s4799_s11   ;;  %v4183_v7 = vld [vmem:[%s5336_s23 + $0x78] sm:$0xff]  ;;  %v4185_v50 = vld [vmem:[%s5336_s23 + $0x80] sm:$0xff]  ;;  %v4187_v62 = vld [vmem:[%s5336_s23 + $0x88] sm:$0xff] }
 0x5f3   : >> { %4164 = vst [vmem:[%s5332_s22 + $0x28] sm:$0xff] %v4163_v5  ;;  %v4189_v43 = vld [vmem:[%s5336_s23 + $0x90] sm:$0xff]  ;;  %v4191_v39 = vld [vmem:[%s5336_s23 + $0x98] sm:$0xff]  ;;  %v4193_v60 = vld [vmem:[%s5336_s23 + $0xa0] sm:$0xff] }
 0x5f4   : >> { %4166 = vst [vmem:[%s5332_s22 + $0x30] sm:$0xff] %v4165_v36  ;;  %v4195_v46 = vld [vmem:[%s5336_s23 + $0xa8] sm:$0xff]  ;;  %v4197_v42 = vld [vmem:[%s5336_s23 + $0xb0] sm:$0xff]  ;;  %v4199_v32 = vld [vmem:[%s5336_s23 + $0xb8] sm:$0xff] }
 0x5f5   : >> { %4168 = vst [vmem:[%s5332_s22 + $0x38] sm:$0xff] %v4167_v17  ;;  %v4201_v58 = vld [vmem:[%s5336_s23 + $0xc0] sm:$0xff]  ;;  %v4203_v48 = vld [vmem:[%s5336_s23 + $0xc8] sm:$0xff]  ;;  %v4205_v37 = vld [vmem:[%s5336_s23 + $0xd0] sm:$0xff] }
 0x5f6   : >> { %4170 = vst [vmem:[%s5332_s22 + $0x40] sm:$0xff] %v4169_v13  ;;  %v4207_v47 = vld [vmem:[%s5336_s23 + $0xd8] sm:$0xff]  ;;  %v4209_v20 = vld [vmem:[%s5336_s23 + $0xe0] sm:$0xff]  ;;  %v4211_v59 = vld [vmem:[%s5336_s23 + $0xe8] sm:$0xff] }
 0x5f7   : >> { %4172 = vst [vmem:[%s5332_s22 + $0x48] sm:$0xff] %v4171_v18  ;;  %v4213_v0 = vld [vmem:[%s5336_s23 + $0xf0] sm:$0xff]  ;;  %v4215_v45 = vld [vmem:[%s5336_s23 + $0xf8] sm:$0xff]  ;;  %s7406_s23 = smov %s7242_s12 }
 0x5f8   : >> { %4174 = vst [vmem:[%s5332_s22 + $0x50] sm:$0xff] %v4173_v1 }
 0x5f9   : >> { %4176 = vst [vmem:[%s5332_s22 + $0x58] sm:$0xff] %v4175_v8 }
 0x5fa   : >> { %4178 = vst [vmem:[%s5332_s22 + $0x60] sm:$0xff] %v4177_v38 }
 0x5fb   : >> { %4180 = vst [vmem:[%s5332_s22 + $0x68] sm:$0xff] %v4179_v33 }
 0x5fc   : >> { %4182 = vst [vmem:[%s5332_s22 + $0x70] sm:$0xff] %v4181_v61 }
 0x5fd   : >> { %4184 = vst [vmem:[%s5332_s22 + $0x78] sm:$0xff] %v4183_v7 }
 0x5fe   : >> { %4186 = vst [vmem:[%s5332_s22 + $0x80] sm:$0xff] %v4185_v50 }
 0x5ff   : >> { %4188 = vst [vmem:[%s5332_s22 + $0x88] sm:$0xff] %v4187_v62 }
 0x600   : >> { %4190 = vst [vmem:[%s5332_s22 + $0x90] sm:$0xff] %v4189_v43 }
 0x601   : >> { %4192 = vst [vmem:[%s5332_s22 + $0x98] sm:$0xff] %v4191_v39 }
 0x602   : >> { %4194 = vst [vmem:[%s5332_s22 + $0xa0] sm:$0xff] %v4193_v60 }
 0x603   : >> { %4196 = vst [vmem:[%s5332_s22 + $0xa8] sm:$0xff] %v4195_v46 }
 0x604   : >> { %4198 = vst [vmem:[%s5332_s22 + $0xb0] sm:$0xff] %v4197_v42 }
 0x605   : >> { %4200 = vst [vmem:[%s5332_s22 + $0xb8] sm:$0xff] %v4199_v32 }
 0x606   : >> { %4202 = vst [vmem:[%s5332_s22 + $0xc0] sm:$0xff] %v4201_v58 }
 0x607   : >> { %4204 = vst [vmem:[%s5332_s22 + $0xc8] sm:$0xff] %v4203_v48 }
 0x608   : >> { %4206 = vst [vmem:[%s5332_s22 + $0xd0] sm:$0xff] %v4205_v37 }
 0x609   : >> { %4208 = vst [vmem:[%s5332_s22 + $0xd8] sm:$0xff] %v4207_v47  ;;  %4149 = sbr.rel (!%p4146_p7) target bundleno = 1517 (0x5ed), region = 200 }
 0x60a   : >> { %4210 = vst [vmem:[%s5332_s22 + $0xe0] sm:$0xff] %v4209_v20 }
 0x60b   : >> { %4212 = vst [vmem:[%s5332_s22 + $0xe8] sm:$0xff] %v4211_v59 }
 0x60c   : >> { %4214 = vst [vmem:[%s5332_s22 + $0xf0] sm:$0xff] %v4213_v0 }
 0x60d   : >> { %4216 = vst [vmem:[%s5332_s22 + $0xf8] sm:$0xff] %v4215_v45  ;;  %s7405_s22 = smov %s7245_s19 }
 0x60e PF: > { %s7311_s20 = sand.u32 31, %s4142_s16   ;;  %s4882_s27 = sshll.u32 %s7199_s21, 8 }
 0x60f   : > { %s4228_s14 = scalar_lea.vmem %s7043_s24, %s4882_s27 [#allocation2]   ;;  %s4230_s11 = scalar_lea.vmem %s7052_s13, %s4882_s27  }
 0x610   : > { %p4804_p8 = scmp.le.s32.totalorder %s7311_s20, 0 }
 0x611   : > { %s5346_s12 = smov (!%p4804_p8), %s4230_s11   ;;  %s5350_s19 = smov (!%p4804_p8), %s4228_s14  }
 0x612   : > { %4387 = sbr.rel (%p4804_p8) target bundleno = 1567 (0x61f), region = 205  ;;  %s5354_s30 = smov (!%p4804_p8), 0  }
 0x613   : > { %s5358_s18 = smov (!%p4804_p8), 0  }
 0x617 LB: >> { %v4240_v56 = vld [vmem:[%s5352_s19] sm:$0xff]  ;;  %s4242_s16 = sadd.s32 1, %s5356_s30  ;;  %s4234_s18 = sadd.s32 1, %s5360_s18   ;;  %s5360_s18 = sphi %s5358_s18, %s4234_s18   ;;  %s5356_s30 = sphi %s5354_s30, %s5355_s30   ;;  %s5352_s19 = sphi %s5350_s19, %s4247_s19   ;;  %s5348_s12 = sphi %s5346_s12, %s4248_s12  }
 0x618   : >> { %4241 = vst [vmem:[%s5348_s12] sm:$0xff] %v4240_v56  ;;  %p4243_p9 = scmp.ge.s32.totalorder %s4242_s16, %s7311_s20  ;;  %p4233_p10 = scmp.ge.s32.totalorder %s4234_s18, %s7311_s20 }
 0x61a   : >> { %s7423_s16 = smov (%p4243_p9, %s4242_s16), 0  ;;  %4236 = sbr.rel (!%p4233_p10) target bundleno = 1559 (0x617), region = 211 }
 0x61b   : >> { %s4805_s21 = sshll.u32 %s7423_s16, 3  ;;  %s5355_s30 = smov %s7423_s16  }
 0x61c   : >> { %s4247_s19 = scalar_lea.vmem %s4228_s14, %s4805_s21 [#allocation2]   ;;  %s4248_s12 = scalar_lea.vmem %s4230_s11, %s4805_s21  }
 0x61f PF: > { %s5363_s22 = smov 1   ;;  %s7408_s29 = scalar_lea.vmem %s7052_s13, %s7190_s15 }
 0x620   : > { %s4249_s23 = sshll.u32 %s5363_s22, %s7059_s9 }
 0x621   : > { %s4807_s26 = sadd.s32 4294967295, %s4249_s23 }
 0x622   : > { %v4259_v24 = vld [vmem:[%s4139_s17] sm:%s4807_s26] }
 0x623   : > { %4260 = vst [vmem:[%s7408_s29] sm:%s4807_s26] %v4259_v24 }
 0x624 PF: > { %p4808_p11 = scmp.ge.u32.totalorder %s7415_s10, 8 }
 0x625   : > { %s5364_s18 = smov (!%p4808_p11), 1  }
 0x626   : > { %4009 = sbr.rel (%p4808_p11) target bundleno = 1581 (0x62d), region = 64  ;;  %s4010_s20 = sshll.u32 (!%p4808_p11), %s5364_s18, %s7415_s10 }
 0x627   : > { %s4809_s27 = sadd.s32 (!%p4808_p11), 4294967295, %s4010_s20 }
 0x62b   : > { %v4020_v15 = vld [vmem:[%s7043_s24] sm:%s4809_s27] }
 0x62c   : > { %4021 = vst [vmem:[%s7052_s13] sm:%s4809_s27] %v4020_v15 }
 0x62d PF: > { %p14_p12 = scmp.ge.s32.totalorder %s5420_s28, 5   ;;  %s7409_s24 = smov %s5292_s25 }
 0x62e   : > { %s7410_s25 = smov %s5428_s8  ;;  %s7411_s26 = smov %s5420_s28 }
 0x62f   :  { %16 = sbr.rel (!%p14_p12) target bundleno = 2 (0x2), region = 222 }

</bundles_post_ra>
